<compile_context>
chip_gen: v7x
topology: tpu7x:2x2x1
jax: 0.10.0
libtpu: 0.0.40
codegen_flags: <defaults>
</compile_context>

<pallas_src>
import functools

import numpy as np

import jax
import jax.numpy as jnp
from jax import lax
from jax.experimental import pallas as pl
from jax.experimental.pallas import tpu as pltpu

BN_EPS = 1e-5
C_PAD = 128          # lane-dense channel padding
K1, S1 = 8, 4        # conv1 kernel / stride
K2, S2 = 4, 2        # conv2
K3, S3 = 3, 1        # conv3
C1_OUT = 32          # conv1 out channels (= conv2 in channels)
C2_OUT = 64          # conv2 out channels (= conv3 in channels)


def _round_up(v, m):
    return (v + m - 1) // m * m


# ----------------------------- Pallas kernel -------------------------------

def _bn_relu(z, g, b, inv_count):
    """Training-mode BatchNorm over rows (channel = lane) + ReLU.

    `inv_count` is 1/true_row_count so zero padding rows never bias the
    one-pass (sum / sum-of-squares) batch statistics.
    """
    mean = jnp.sum(z, axis=0, keepdims=True) * inv_count
    ex2 = jnp.sum(z * z, axis=0, keepdims=True) * inv_count
    var = jnp.maximum(ex2 - mean * mean, 0.0)
    scale = g * lax.rsqrt(var + BN_EPS)              # rsqrt -> EUP slot
    shift = b - mean * scale
    return jnp.maximum(z * scale + shift, 0.0)       # single FMA + ReLU


def dqnbn_fused_kernel(batch, h1, w1, h2, w2,
                       p1_ref, w1_ref, g1_ref, b1_ref,
                       w2_ref, g2_ref, b2_ref,
                       w3_ref, g3_ref, b3_ref,
                       wfc_ref, bfc_ref, wh_ref, bh_ref,
                       o_ref, a1_s, p2_s, p3_s):
    f32, bf16 = jnp.float32, jnp.bfloat16

    # ---- conv1 + BN1 + ReLU (one bf16 matmul; /255 folded into w1) --------
    z1 = jnp.dot(p1_ref[...], w1_ref[...], preferred_element_type=f32)
    a1 = _bn_relu(z1, g1_ref[...], b1_ref[...], 1.0 / (batch * h1 * w1))
    a1_s[...] = a1                       # park in VMEM so conv2 can gather rows

    # ---- conv2 im2col gather: dense K = 16*32 = 512, no selector matmuls ---
    # a1 rows are ordered (h1, w1, n), so for every (kernel offset, output
    # position) the needed rows are one contiguous block of `batch` rows.
    p2_s[...] = jnp.zeros_like(p2_s)     # zero pad rows + stale VMEM
    for kh in range(K2):
        for kw in range(K2):
            q = kh * K2 + kw
            for oh in range(h2):
                for ow in range(w2):
                    src = ((S2 * oh + kh) * w1 + (S2 * ow + kw)) * batch
                    dst = (oh * w2 + ow) * batch
                    p2_s[pl.ds(dst, batch), pl.ds(q * C1_OUT, C1_OUT)] = (
                        a1_s[pl.ds(src, batch), pl.ds(0, C1_OUT)])

    # ---- conv2 + BN2 + ReLU: ONE (9N_pad, 512) @ (512, 128) matmul ---------
    z2 = jnp.dot(p2_s[...].astype(bf16), w2_ref[...], preferred_element_type=f32)
    a2 = _bn_relu(z2, g2_ref[...], b2_ref[...], 1.0 / (batch * h2 * w2))

    # ---- conv3: pure row->lane repack, then ONE (N, 640) @ (640, 128) ------
    p3_s[...] = jnp.zeros_like(p3_s)     # zero K padding (576..639) + stale VMEM
    for p in range(h2 * w2):
        p3_s[pl.ds(0, batch), pl.ds(p * C2_OUT, C2_OUT)] = (
            a2[p * batch:(p + 1) * batch, 0:C2_OUT])
    z3 = jnp.dot(p3_s[...].astype(bf16), w3_ref[...], preferred_element_type=f32)
    a3 = _bn_relu(z3, g3_ref[...], b3_ref[...], 1.0 / batch)

    # ---- fc4 + ReLU, then head — the (N, 512) intermediate never leaves VMEM
    h = jnp.dot(a3.astype(bf16), wfc_ref[...], preferred_element_type=f32) + bfc_ref[...]
    h = jnp.maximum(h, 0.0)
    o_ref[...] = jnp.dot(h.astype(bf16), wh_ref[...],
                         preferred_element_type=f32) + bh_ref[...]


# --------------------------- parameter handling -----------------------------

def init_params(key, in_channels=4, n_actions=4, feature_size=64):
    ks = jax.random.split(key, 10)

    def w(k, shape, scale=0.05):
        return jax.random.normal(k, shape, jnp.float32) * scale

    return {
        # PyTorch layouts: conv (O, I, kH, kW); linear (out, in).
        "conv1_w": w(ks[0], (C1_OUT, in_channels, K1, K1)),
        "conv1_b": w(ks[1], (C1_OUT,)),   # dropped in prep: cancelled by BN1
        "conv2_w": w(ks[2], (C2_OUT, C1_OUT, K2, K2)),
        "conv2_b": w(ks[3], (C2_OUT,)),   # dropped in prep: cancelled by BN2
        "conv3_w": w(ks[4], (C2_OUT, C2_OUT, K3, K3)),
        "conv3_b": w(ks[5], (C2_OUT,)),   # dropped in prep: cancelled by BN3
        "fc4_w": w(ks[6], (512, feature_size)),
        "fc4_b": w(ks[7], (512,)),
        "head_w": w(ks[8], (n_actions, 512)),
        "head_b": w(ks[9], (n_actions,)),
        # BatchNorm affine params (PyTorch init: gamma=1, beta=0).
        "bn1_g": jnp.ones((C1_OUT,), jnp.float32), "bn1_b": jnp.zeros((C1_OUT,), jnp.float32),
        "bn2_g": jnp.ones((C2_OUT,), jnp.float32), "bn2_b": jnp.zeros((C2_OUT,), jnp.float32),
        "bn3_g": jnp.ones((C2_OUT,), jnp.float32), "bn3_b": jnp.zeros((C2_OUT,), jnp.float32),
    }


def _pad_last(a, size):
    return jnp.pad(a, [(0, 0)] * (a.ndim - 1) + [(0, size - a.shape[-1])])


def _bn_param(v):
    return _pad_last(v.astype(jnp.float32).reshape(1, -1), C_PAD)


def prepare_params(params):
    """One-time weight relayout / bf16 packing (outside the per-step forward).

    Conv biases are intentionally dropped: training-mode BatchNorm subtracts
    the per-channel batch mean, cancelling them exactly.
    # TODO(synk): eval-mode BN (running stats) would need the biases back and
    # a different scale/shift; only the training-mode forward is implemented.
    """
    f32, bf16 = jnp.float32, jnp.bfloat16
    c1w = params["conv1_w"].astype(f32)            # (32, C_in, 8, 8)
    c2w = params["conv2_w"].astype(f32)            # (64, 32, 4, 4)
    c3w = params["conv3_w"].astype(f32)            # (64, 64, 3, 3)

    # conv1: (O,I,kh,kw) -> (I*kh*kw, O), fold /255, pad out-channels to 128.
    w1 = _pad_last(c1w.reshape(c1w.shape[0], -1).T / 255.0, C_PAD).astype(bf16)

    # conv2 dense im2col weight: rows ordered (kh, kw, ci) -> K = 16*32 = 512.
    w2 = _pad_last(
        c2w.transpose(2, 3, 1, 0).reshape(K2 * K2 * c2w.shape[1], c2w.shape[0]),
        C_PAD).astype(bf16)

    # conv3 dense weight: rows (p = kh*3+kw, ci) -> K = 9*64 = 576, pad to 640.
    w3 = c3w.transpose(2, 3, 1, 0).reshape(K3 * K3 * c3w.shape[1], c3w.shape[0])
    w3 = jnp.pad(w3, ((0, _round_up(w3.shape[0], 128) - w3.shape[0]),
                      (0, C_PAD - w3.shape[1]))).astype(bf16)

    # fc4 / head: stored pre-transposed (in, out); fc4 K padded to 128 lanes.
    wfc = jnp.pad(params["fc4_w"].T.astype(f32),
                  ((0, C_PAD - params["fc4_w"].shape[1]), (0, 0))).astype(bf16)
    wh = _pad_last(params["head_w"].T.astype(f32), C_PAD).astype(bf16)

    return {
        "w1": w1, "g1": _bn_param(params["bn1_g"]), "b1": _bn_param(params["bn1_b"]),
        "w2": w2, "g2": _bn_param(params["bn2_g"]), "b2": _bn_param(params["bn2_b"]),
        "w3": w3, "g3": _bn_param(params["bn3_g"]), "b3": _bn_param(params["bn3_b"]),
        "wfc": wfc, "bfc": params["fc4_b"].reshape(1, -1).astype(jnp.float32),
        "wh": wh, "bh": _pad_last(params["head_b"].reshape(1, -1).astype(jnp.float32), C_PAD),
    }


# ------------------------------- forward ------------------------------------

@functools.partial(jax.jit, static_argnames=("n_actions",))
def dqnbn_forward(pp, x, n_actions=4):
    """x: (N, C_in, H, W) uint8 -> (N, n_actions) float32 Q-values."""
    n, c, hgt, wid = x.shape
    h1, w1 = (hgt - K1) // S1 + 1, (wid - K1) // S1 + 1
    h2, w2 = (h1 - K2) // S2 + 1, (w1 - K2) // S2 + 1
    h3, w3 = (h2 - K3) // S3 + 1, (w2 - K3) // S3 + 1
    assert h3 == 1 and w3 == 1, "flatten assumes the conv stack reduces to 1x1"

    # conv1 im2col: ONE vectorized gather on UINT8, cast to bf16 after.
    # Rows ordered (oh1, ow1, n) so the in-kernel conv2 gather needs only
    # contiguous row slices; cols ordered (c, kh, kw) to match OIHW flatten.
    hk = np.arange(h1)[:, None] * S1 + np.arange(K1)[None, :]          # (H1, K1)
    wk = np.arange(w1)[:, None] * S1 + np.arange(K1)[None, :]          # (W1, K1)
    pat_u8 = x[:, :, hk[:, :, None, None], wk[None, None, :, :]]       # (N,C,H1,K1,W1,K1)
    patches = (pat_u8.transpose(2, 4, 0, 1, 3, 5)
               .reshape(h1 * w1 * n, c * K1 * K1)
               .astype(jnp.bfloat16))          # /255 folded into conv1 weights

    m2p = _round_up(n * h2 * w2, 8)            # conv2 rows padded to sublanes
    k3 = pp["w3"].shape[0]                     # conv3 dense K (lane-padded 640)

    kernel = functools.partial(dqnbn_fused_kernel, n, h1, w1, h2, w2)
    args = (patches, pp["w1"], pp["g1"], pp["b1"],
            pp["w2"], pp["g2"], pp["b2"],
            pp["w3"], pp["g3"], pp["b3"],
            pp["wfc"], pp["bfc"], pp["wh"], pp["bh"])

    out = pl.pallas_call(
        kernel,
        out_shape=jax.ShapeDtypeStruct((n, C_PAD), jnp.float32),
        in_specs=[pl.BlockSpec(memory_space=pltpu.MemorySpace.VMEM)] * len(args),
        out_specs=pl.BlockSpec(memory_space=pltpu.MemorySpace.VMEM),
        scratch_shapes=[
            pltpu.VMEM((n * h1 * w1, C_PAD), jnp.float32),     # a1 (conv1 out)
            pltpu.VMEM((m2p, K2 * K2 * C1_OUT), jnp.float32),  # conv2 im2col patches
            pltpu.VMEM((n, k3), jnp.float32),                  # conv3 patches
        ],
    )(*args)
    return out[:, :n_actions]


if __name__ == "__main__":
    key = jax.random.PRNGKey(0)
    pkey, xkey = jax.random.split(key)

    in_channels, n_actions = 4, 4
    # 36 -> conv1(k8,s4): 8 -> conv2(k4,s2): 3 -> conv3(k3,s1): 1 => feature 64
    N, H, W = 2, 36, 36
    feature_size = 64

    params = init_params(pkey, in_channels, n_actions, feature_size)
    pp = prepare_params(params)                 # one-time bf16 weight relayout

    x = jax.random.randint(xkey, (N, in_channels, H, W), 0, 256,
                           dtype=jnp.int32).astype(jnp.uint8)

    out = dqnbn_forward(pp, x, n_actions=n_actions)
    jax.block_until_ready(out)
    assert out.shape == (N, n_actions) and out.dtype == jnp.float32
    assert bool(jnp.all(jnp.isfinite(out)))
    print("KERNEL_OK")
</pallas_src>

<mosaic_0001>
module attributes {stable_mosaic.version = 11 : i64} {
  func.func @dqnbn_fused_kernel(%arg0: memref<128x256xbf16, #tpu.memory_space<vmem>>, %arg1: memref<256x128xbf16, #tpu.memory_space<vmem>>, %arg2: memref<1x128xf32, #tpu.memory_space<vmem>>, %arg3: memref<1x128xf32, #tpu.memory_space<vmem>>, %arg4: memref<512x128xbf16, #tpu.memory_space<vmem>>, %arg5: memref<1x128xf32, #tpu.memory_space<vmem>>, %arg6: memref<1x128xf32, #tpu.memory_space<vmem>>, %arg7: memref<640x128xbf16, #tpu.memory_space<vmem>>, %arg8: memref<1x128xf32, #tpu.memory_space<vmem>>, %arg9: memref<1x128xf32, #tpu.memory_space<vmem>>, %arg10: memref<128x512xbf16, #tpu.memory_space<vmem>>, %arg11: memref<1x512xf32, #tpu.memory_space<vmem>>, %arg12: memref<512x128xbf16, #tpu.memory_space<vmem>>, %arg13: memref<1x128xf32, #tpu.memory_space<vmem>>, %arg14: memref<2x128xf32, #tpu.memory_space<vmem>>, %arg15: memref<128x128xf32, #tpu.memory_space<vmem>>, %arg16: memref<24x512xf32, #tpu.memory_space<vmem>>, %arg17: memref<2x640xf32, #tpu.memory_space<vmem>>) attributes {dimension_semantics = [], scalar_prefetch = 0 : i64, scratch_operands = 3 : i64, tpu.core_type = #tpu.core_type<tc>} {
    %c0 = arith.constant 0 : index
    %c0_0 = arith.constant 0 : index
    %0 = vector.load %arg0[%c0, %c0_0] : memref<128x256xbf16, #tpu.memory_space<vmem>>, vector<128x256xbf16>
    %c0_1 = arith.constant 0 : index
    %c0_2 = arith.constant 0 : index
    %1 = vector.load %arg1[%c0_1, %c0_2] : memref<256x128xbf16, #tpu.memory_space<vmem>>, vector<256x128xbf16>
    %cst = arith.constant dense<0.000000e+00> : vector<128x128xf32>
    %2 = tpu.matmul %0, %1, %cst {dimension_numbers = #tpu.dot_dimension_numbers<[1], [0], [0], [1], [0, 0, 1, 1], [], []>} : vector<128x256xbf16>, vector<256x128xbf16>, vector<128x128xf32> -> vector<128x128xf32>
    %c0_3 = arith.constant 0 : index
    %c0_4 = arith.constant 0 : index
    %3 = vector.load %arg2[%c0_3, %c0_4] : memref<1x128xf32, #tpu.memory_space<vmem>>, vector<1x128xf32>
    %c0_5 = arith.constant 0 : index
    %c0_6 = arith.constant 0 : index
    %4 = vector.load %arg3[%c0_5, %c0_6] : memref<1x128xf32, #tpu.memory_space<vmem>>, vector<1x128xf32>
    %cst_7 = arith.constant dense<0.000000e+00> : vector<128xf32>
    %5 = vector.multi_reduction <add>, %2, %cst_7 [0] : vector<128x128xf32> to vector<128xf32>
    %6 = vector.shape_cast %5 : vector<128xf32> to vector<1x128xf32>
    %cst_8 = arith.constant 7.812500e-03 : f32
    %7 = vector.broadcast %cst_8 : f32 to vector<1x128xf32>
    %8 = arith.mulf %6, %7 : vector<1x128xf32>
    %9 = arith.mulf %2, %2 : vector<128x128xf32>
    %cst_9 = arith.constant dense<0.000000e+00> : vector<128xf32>
    %10 = vector.multi_reduction <add>, %9, %cst_9 [0] : vector<128x128xf32> to vector<128xf32>
    %11 = vector.shape_cast %10 : vector<128xf32> to vector<1x128xf32>
    %cst_10 = arith.constant 7.812500e-03 : f32
    %12 = vector.broadcast %cst_10 : f32 to vector<1x128xf32>
    %13 = arith.mulf %11, %12 : vector<1x128xf32>
    %14 = arith.mulf %8, %8 : vector<1x128xf32>
    %15 = arith.subf %13, %14 : vector<1x128xf32>
    %cst_11 = arith.constant 0.000000e+00 : f32
    %16 = vector.broadcast %cst_11 : f32 to vector<1x128xf32>
    %17 = arith.maximumf %15, %16 : vector<1x128xf32>
    %cst_12 = arith.constant 9.99999974E-6 : f32
    %18 = vector.broadcast %cst_12 : f32 to vector<1x128xf32>
    %19 = arith.addf %17, %18 : vector<1x128xf32>
    %20 = math.rsqrt %19 : vector<1x128xf32>
    %21 = arith.mulf %3, %20 : vector<1x128xf32>
    %22 = arith.mulf %8, %21 : vector<1x128xf32>
    %23 = arith.subf %4, %22 : vector<1x128xf32>
    %24 = vector.broadcast %21 : vector<1x128xf32> to vector<128x128xf32>
    %25 = arith.mulf %2, %24 : vector<128x128xf32>
    %26 = vector.broadcast %23 : vector<1x128xf32> to vector<128x128xf32>
    %27 = arith.addf %25, %26 : vector<128x128xf32>
    %cst_13 = arith.constant 0.000000e+00 : f32
    %28 = vector.broadcast %cst_13 : f32 to vector<128x128xf32>
    %29 = arith.maximumf %27, %28 : vector<128x128xf32>
    %c0_14 = arith.constant 0 : index
    %c0_15 = arith.constant 0 : index
    %30 = vector.load %arg15[%c0_14, %c0_15] : memref<128x128xf32, #tpu.memory_space<vmem>>, vector<128x128xf32>
    tpu.vector_store %arg15[%c0_14, %c0_15], %29 {strides = array<i32>} : memref<128x128xf32, #tpu.memory_space<vmem>>, vector<128x128xf32>,
    %cst_16 = arith.constant 0.000000e+00 : f32
    %31 = vector.broadcast %cst_16 : f32 to vector<24x512xf32>
    %c0_17 = arith.constant 0 : index
    %c0_18 = arith.constant 0 : index
    %32 = vector.load %arg16[%c0_17, %c0_18] : memref<24x512xf32, #tpu.memory_space<vmem>>, vector<24x512xf32>
    tpu.vector_store %arg16[%c0_17, %c0_18], %31 {strides = array<i32>} : memref<24x512xf32, #tpu.memory_space<vmem>>, vector<24x512xf32>,
    %c0_19 = arith.constant 0 : index
    %c0_20 = arith.constant 0 : index
    %33 = vector.load %arg15[%c0_19, %c0_20] : memref<128x128xf32, #tpu.memory_space<vmem>>, vector<2x32xf32>
    %c0_21 = arith.constant 0 : index
    %c0_22 = arith.constant 0 : index
    %34 = vector.load %arg16[%c0_21, %c0_22] : memref<24x512xf32, #tpu.memory_space<vmem>>, vector<2x32xf32>
    tpu.vector_store %arg16[%c0_21, %c0_22], %33 {strides = array<i32>} : memref<24x512xf32, #tpu.memory_space<vmem>>, vector<2x32xf32>,
    %c4 = arith.constant 4 : index
    %c0_23 = arith.constant 0 : index
    %35 = vector.load %arg15[%c4, %c0_23] : memref<128x128xf32, #tpu.memory_space<vmem>>, vector<2x32xf32>
    %c2 = arith.constant 2 : index
    %c0_24 = arith.constant 0 : index
    %36 = vector.load %arg16[%c2, %c0_24] : memref<24x512xf32, #tpu.memory_space<vmem>>, vector<2x32xf32>
    tpu.vector_store %arg16[%c2, %c0_24], %35 {strides = array<i32>} : memref<24x512xf32, #tpu.memory_space<vmem>>, vector<2x32xf32>,
    %c8 = arith.constant 8 : index
    %c0_25 = arith.constant 0 : index
    %37 = vector.load %arg15[%c8, %c0_25] : memref<128x128xf32, #tpu.memory_space<vmem>>, vector<2x32xf32>
    %c4_26 = arith.constant 4 : index
    %c0_27 = arith.constant 0 : index
    %38 = vector.load %arg16[%c4_26, %c0_27] : memref<24x512xf32, #tpu.memory_space<vmem>>, vector<2x32xf32>
    tpu.vector_store %arg16[%c4_26, %c0_27], %37 {strides = array<i32>} : memref<24x512xf32, #tpu.memory_space<vmem>>, vector<2x32xf32>,
    %c32 = arith.constant 32 : index
    %c0_28 = arith.constant 0 : index
    %39 = vector.load %arg15[%c32, %c0_28] : memref<128x128xf32, #tpu.memory_space<vmem>>, vector<2x32xf32>
    %c6 = arith.constant 6 : index
    %c0_29 = arith.constant 0 : index
    %40 = vector.load %arg16[%c6, %c0_29] : memref<24x512xf32, #tpu.memory_space<vmem>>, vector<2x32xf32>
    tpu.vector_store %arg16[%c6, %c0_29], %39 {strides = array<i32>} : memref<24x512xf32, #tpu.memory_space<vmem>>, vector<2x32xf32>,
    %c36 = arith.constant 36 : index
    %c0_30 = arith.constant 0 : index
    %41 = vector.load %arg15[%c36, %c0_30] : memref<128x128xf32, #tpu.memory_space<vmem>>, vector<2x32xf32>
    %c8_31 = arith.constant 8 : index
    %c0_32 = arith.constant 0 : index
    %42 = vector.load %arg16[%c8_31, %c0_32] : memref<24x512xf32, #tpu.memory_space<vmem>>, vector<2x32xf32>
    tpu.vector_store %arg16[%c8_31, %c0_32], %41 {strides = array<i32>} : memref<24x512xf32, #tpu.memory_space<vmem>>, vector<2x32xf32>,
    %c40 = arith.constant 40 : index
    %c0_33 = arith.constant 0 : index
    %43 = vector.load %arg15[%c40, %c0_33] : memref<128x128xf32, #tpu.memory_space<vmem>>, vector<2x32xf32>
    %c10 = arith.constant 10 : index
    %c0_34 = arith.constant 0 : index
    %44 = vector.load %arg16[%c10, %c0_34] : memref<24x512xf32, #tpu.memory_space<vmem>>, vector<2x32xf32>
    tpu.vector_store %arg16[%c10, %c0_34], %43 {strides = array<i32>} : memref<24x512xf32, #tpu.memory_space<vmem>>, vector<2x32xf32>,
    %c64 = arith.constant 64 : index
    %c0_35 = arith.constant 0 : index
    %45 = vector.load %arg15[%c64, %c0_35] : memref<128x128xf32, #tpu.memory_space<vmem>>, vector<2x32xf32>
    %c12 = arith.constant 12 : index
    %c0_36 = arith.constant 0 : index
    %46 = vector.load %arg16[%c12, %c0_36] : memref<24x512xf32, #tpu.memory_space<vmem>>, vector<2x32xf32>
    tpu.vector_store %arg16[%c12, %c0_36], %45 {strides = array<i32>} : memref<24x512xf32, #tpu.memory_space<vmem>>, vector<2x32xf32>,
    %c68 = arith.constant 68 : index
    %c0_37 = arith.constant 0 : index
    %47 = vector.load %arg15[%c68, %c0_37] : memref<128x128xf32, #tpu.memory_space<vmem>>, vector<2x32xf32>
    %c14 = arith.constant 14 : index
    %c0_38 = arith.constant 0 : index
    %48 = vector.load %arg16[%c14, %c0_38] : memref<24x512xf32, #tpu.memory_space<vmem>>, vector<2x32xf32>
    tpu.vector_store %arg16[%c14, %c0_38], %47 {strides = array<i32>} : memref<24x512xf32, #tpu.memory_space<vmem>>, vector<2x32xf32>,
    %c72 = arith.constant 72 : index
    %c0_39 = arith.constant 0 : index
    %49 = vector.load %arg15[%c72, %c0_39] : memref<128x128xf32, #tpu.memory_space<vmem>>, vector<2x32xf32>
    %c16 = arith.constant 16 : index
    %c0_40 = arith.constant 0 : index
    %50 = vector.load %arg16[%c16, %c0_40] : memref<24x512xf32, #tpu.memory_space<vmem>>, vector<2x32xf32>
    tpu.vector_store %arg16[%c16, %c0_40], %49 {strides = array<i32>} : memref<24x512xf32, #tpu.memory_space<vmem>>, vector<2x32xf32>,
    %c2_41 = arith.constant 2 : index
    %c0_42 = arith.constant 0 : index
    %51 = vector.load %arg15[%c2_41, %c0_42] : memref<128x128xf32, #tpu.memory_space<vmem>>, vector<2x32xf32>
    %c0_43 = arith.constant 0 : index
    %c32_44 = arith.constant 32 : index
    %52 = vector.load %arg16[%c0_43, %c32_44] : memref<24x512xf32, #tpu.memory_space<vmem>>, vector<2x32xf32>
    tpu.vector_store %arg16[%c0_43, %c32_44], %51 {strides = array<i32>} : memref<24x512xf32, #tpu.memory_space<vmem>>, vector<2x32xf32>,
    %c6_45 = arith.constant 6 : index
    %c0_46 = arith.constant 0 : index
    %53 = vector.load %arg15[%c6_45, %c0_46] : memref<128x128xf32, #tpu.memory_space<vmem>>, vector<2x32xf32>
    %c2_47 = arith.constant 2 : index
    %c32_48 = arith.constant 32 : index
    %54 = vector.load %arg16[%c2_47, %c32_48] : memref<24x512xf32, #tpu.memory_space<vmem>>, vector<2x32xf32>
    tpu.vector_store %arg16[%c2_47, %c32_48], %53 {strides = array<i32>} : memref<24x512xf32, #tpu.memory_space<vmem>>, vector<2x32xf32>,
    %c10_49 = arith.constant 10 : index
    %c0_50 = arith.constant 0 : index
    %55 = vector.load %arg15[%c10_49, %c0_50] : memref<128x128xf32, #tpu.memory_space<vmem>>, vector<2x32xf32>
    %c4_51 = arith.constant 4 : index
    %c32_52 = arith.constant 32 : index
    %56 = vector.load %arg16[%c4_51, %c32_52] : memref<24x512xf32, #tpu.memory_space<vmem>>, vector<2x32xf32>
    tpu.vector_store %arg16[%c4_51, %c32_52], %55 {strides = array<i32>} : memref<24x512xf32, #tpu.memory_space<vmem>>, vector<2x32xf32>,
    %c34 = arith.constant 34 : index
    %c0_53 = arith.constant 0 : index
    %57 = vector.load %arg15[%c34, %c0_53] : memref<128x128xf32, #tpu.memory_space<vmem>>, vector<2x32xf32>
    %c6_54 = arith.constant 6 : index
    %c32_55 = arith.constant 32 : index
    %58 = vector.load %arg16[%c6_54, %c32_55] : memref<24x512xf32, #tpu.memory_space<vmem>>, vector<2x32xf32>
    tpu.vector_store %arg16[%c6_54, %c32_55], %57 {strides = array<i32>} : memref<24x512xf32, #tpu.memory_space<vmem>>, vector<2x32xf32>,
    %c38 = arith.constant 38 : index
    %c0_56 = arith.constant 0 : index
    %59 = vector.load %arg15[%c38, %c0_56] : memref<128x128xf32, #tpu.memory_space<vmem>>, vector<2x32xf32>
    %c8_57 = arith.constant 8 : index
    %c32_58 = arith.constant 32 : index
    %60 = vector.load %arg16[%c8_57, %c32_58] : memref<24x512xf32, #tpu.memory_space<vmem>>, vector<2x32xf32>
    tpu.vector_store %arg16[%c8_57, %c32_58], %59 {strides = array<i32>} : memref<24x512xf32, #tpu.memory_space<vmem>>, vector<2x32xf32>,
    %c42 = arith.constant 42 : index
    %c0_59 = arith.constant 0 : index
    %61 = vector.load %arg15[%c42, %c0_59] : memref<128x128xf32, #tpu.memory_space<vmem>>, vector<2x32xf32>
    %c10_60 = arith.constant 10 : index
    %c32_61 = arith.constant 32 : index
    %62 = vector.load %arg16[%c10_60, %c32_61] : memref<24x512xf32, #tpu.memory_space<vmem>>, vector<2x32xf32>
    tpu.vector_store %arg16[%c10_60, %c32_61], %61 {strides = array<i32>} : memref<24x512xf32, #tpu.memory_space<vmem>>, vector<2x32xf32>,
    %c66 = arith.constant 66 : index
    %c0_62 = arith.constant 0 : index
    %63 = vector.load %arg15[%c66, %c0_62] : memref<128x128xf32, #tpu.memory_space<vmem>>, vector<2x32xf32>
    %c12_63 = arith.constant 12 : index
    %c32_64 = arith.constant 32 : index
    %64 = vector.load %arg16[%c12_63, %c32_64] : memref<24x512xf32, #tpu.memory_space<vmem>>, vector<2x32xf32>
    tpu.vector_store %arg16[%c12_63, %c32_64], %63 {strides = array<i32>} : memref<24x512xf32, #tpu.memory_space<vmem>>, vector<2x32xf32>,
    %c70 = arith.constant 70 : index
    %c0_65 = arith.constant 0 : index
    %65 = vector.load %arg15[%c70, %c0_65] : memref<128x128xf32, #tpu.memory_space<vmem>>, vector<2x32xf32>
    %c14_66 = arith.constant 14 : index
    %c32_67 = arith.constant 32 : index
    %66 = vector.load %arg16[%c14_66, %c32_67] : memref<24x512xf32, #tpu.memory_space<vmem>>, vector<2x32xf32>
    tpu.vector_store %arg16[%c14_66, %c32_67], %65 {strides = array<i32>} : memref<24x512xf32, #tpu.memory_space<vmem>>, vector<2x32xf32>,
    %c74 = arith.constant 74 : index
    %c0_68 = arith.constant 0 : index
    %67 = vector.load %arg15[%c74, %c0_68] : memref<128x128xf32, #tpu.memory_space<vmem>>, vector<2x32xf32>
    %c16_69 = arith.constant 16 : index
    %c32_70 = arith.constant 32 : index
    %68 = vector.load %arg16[%c16_69, %c32_70] : memref<24x512xf32, #tpu.memory_space<vmem>>, vector<2x32xf32>
    tpu.vector_store %arg16[%c16_69, %c32_70], %67 {strides = array<i32>} : memref<24x512xf32, #tpu.memory_space<vmem>>, vector<2x32xf32>,
    %c4_71 = arith.constant 4 : index
    %c0_72 = arith.constant 0 : index
    %69 = vector.load %arg15[%c4_71, %c0_72] : memref<128x128xf32, #tpu.memory_space<vmem>>, vector<2x32xf32>
    %c0_73 = arith.constant 0 : index
    %c64_74 = arith.constant 64 : index
    %70 = vector.load %arg16[%c0_73, %c64_74] : memref<24x512xf32, #tpu.memory_space<vmem>>, vector<2x32xf32>
    tpu.vector_store %arg16[%c0_73, %c64_74], %69 {strides = array<i32>} : memref<24x512xf32, #tpu.memory_space<vmem>>, vector<2x32xf32>,
    %c8_75 = arith.constant 8 : index
    %c0_76 = arith.constant 0 : index
    %71 = vector.load %arg15[%c8_75, %c0_76] : memref<128x128xf32, #tpu.memory_space<vmem>>, vector<2x32xf32>
    %c2_77 = arith.constant 2 : index
    %c64_78 = arith.constant 64 : index
    %72 = vector.load %arg16[%c2_77, %c64_78] : memref<24x512xf32, #tpu.memory_space<vmem>>, vector<2x32xf32>
    tpu.vector_store %arg16[%c2_77, %c64_78], %71 {strides = array<i32>} : memref<24x512xf32, #tpu.memory_space<vmem>>, vector<2x32xf32>,
    %c12_79 = arith.constant 12 : index
    %c0_80 = arith.constant 0 : index
    %73 = vector.load %arg15[%c12_79, %c0_80] : memref<128x128xf32, #tpu.memory_space<vmem>>, vector<2x32xf32>
    %c4_81 = arith.constant 4 : index
    %c64_82 = arith.constant 64 : index
    %74 = vector.load %arg16[%c4_81, %c64_82] : memref<24x512xf32, #tpu.memory_space<vmem>>, vector<2x32xf32>
    tpu.vector_store %arg16[%c4_81, %c64_82], %73 {strides = array<i32>} : memref<24x512xf32, #tpu.memory_space<vmem>>, vector<2x32xf32>,
    %c36_83 = arith.constant 36 : index
    %c0_84 = arith.constant 0 : index
    %75 = vector.load %arg15[%c36_83, %c0_84] : memref<128x128xf32, #tpu.memory_space<vmem>>, vector<2x32xf32>
    %c6_85 = arith.constant 6 : index
    %c64_86 = arith.constant 64 : index
    %76 = vector.load %arg16[%c6_85, %c64_86] : memref<24x512xf32, #tpu.memory_space<vmem>>, vector<2x32xf32>
    tpu.vector_store %arg16[%c6_85, %c64_86], %75 {strides = array<i32>} : memref<24x512xf32, #tpu.memory_space<vmem>>, vector<2x32xf32>,
    %c40_87 = arith.constant 40 : index
    %c0_88 = arith.constant 0 : index
    %77 = vector.load %arg15[%c40_87, %c0_88] : memref<128x128xf32, #tpu.memory_space<vmem>>, vector<2x32xf32>
    %c8_89 = arith.constant 8 : index
    %c64_90 = arith.constant 64 : index
    %78 = vector.load %arg16[%c8_89, %c64_90] : memref<24x512xf32, #tpu.memory_space<vmem>>, vector<2x32xf32>
    tpu.vector_store %arg16[%c8_89, %c64_90], %77 {strides = array<i32>} : memref<24x512xf32, #tpu.memory_space<vmem>>, vector<2x32xf32>,
    %c44 = arith.constant 44 : index
    %c0_91 = arith.constant 0 : index
    %79 = vector.load %arg15[%c44, %c0_91] : memref<128x128xf32, #tpu.memory_space<vmem>>, vector<2x32xf32>
    %c10_92 = arith.constant 10 : index
    %c64_93 = arith.constant 64 : index
    %80 = vector.load %arg16[%c10_92, %c64_93] : memref<24x512xf32, #tpu.memory_space<vmem>>, vector<2x32xf32>
    tpu.vector_store %arg16[%c10_92, %c64_93], %79 {strides = array<i32>} : memref<24x512xf32, #tpu.memory_space<vmem>>, vector<2x32xf32>,
    %c68_94 = arith.constant 68 : index
    %c0_95 = arith.constant 0 : index
    %81 = vector.load %arg15[%c68_94, %c0_95] : memref<128x128xf32, #tpu.memory_space<vmem>>, vector<2x32xf32>
    %c12_96 = arith.constant 12 : index
    %c64_97 = arith.constant 64 : index
    %82 = vector.load %arg16[%c12_96, %c64_97] : memref<24x512xf32, #tpu.memory_space<vmem>>, vector<2x32xf32>
    tpu.vector_store %arg16[%c12_96, %c64_97], %81 {strides = array<i32>} : memref<24x512xf32, #tpu.memory_space<vmem>>, vector<2x32xf32>,
    %c72_98 = arith.constant 72 : index
    %c0_99 = arith.constant 0 : index
    %83 = vector.load %arg15[%c72_98, %c0_99] : memref<128x128xf32, #tpu.memory_space<vmem>>, vector<2x32xf32>
    %c14_100 = arith.constant 14 : index
    %c64_101 = arith.constant 64 : index
    %84 = vector.load %arg16[%c14_100, %c64_101] : memref<24x512xf32, #tpu.memory_space<vmem>>, vector<2x32xf32>
    tpu.vector_store %arg16[%c14_100, %c64_101], %83 {strides = array<i32>} : memref<24x512xf32, #tpu.memory_space<vmem>>, vector<2x32xf32>,
    %c76 = arith.constant 76 : index
    %c0_102 = arith.constant 0 : index
    %85 = vector.load %arg15[%c76, %c0_102] : memref<128x128xf32, #tpu.memory_space<vmem>>, vector<2x32xf32>
    %c16_103 = arith.constant 16 : index
    %c64_104 = arith.constant 64 : index
    %86 = vector.load %arg16[%c16_103, %c64_104] : memref<24x512xf32, #tpu.memory_space<vmem>>, vector<2x32xf32>
    tpu.vector_store %arg16[%c16_103, %c64_104], %85 {strides = array<i32>} : memref<24x512xf32, #tpu.memory_space<vmem>>, vector<2x32xf32>,
    %c6_105 = arith.constant 6 : index
    %c0_106 = arith.constant 0 : index
    %87 = vector.load %arg15[%c6_105, %c0_106] : memref<128x128xf32, #tpu.memory_space<vmem>>, vector<2x32xf32>
    %c0_107 = arith.constant 0 : index
    %c96 = arith.constant 96 : index
    %88 = vector.load %arg16[%c0_107, %c96] : memref<24x512xf32, #tpu.memory_space<vmem>>, vector<2x32xf32>
    tpu.vector_store %arg16[%c0_107, %c96], %87 {strides = array<i32>} : memref<24x512xf32, #tpu.memory_space<vmem>>, vector<2x32xf32>,
    %c10_108 = arith.constant 10 : index
    %c0_109 = arith.constant 0 : index
    %89 = vector.load %arg15[%c10_108, %c0_109] : memref<128x128xf32, #tpu.memory_space<vmem>>, vector<2x32xf32>
    %c2_110 = arith.constant 2 : index
    %c96_111 = arith.constant 96 : index
    %90 = vector.load %arg16[%c2_110, %c96_111] : memref<24x512xf32, #tpu.memory_space<vmem>>, vector<2x32xf32>
    tpu.vector_store %arg16[%c2_110, %c96_111], %89 {strides = array<i32>} : memref<24x512xf32, #tpu.memory_space<vmem>>, vector<2x32xf32>,
    %c14_112 = arith.constant 14 : index
    %c0_113 = arith.constant 0 : index
    %91 = vector.load %arg15[%c14_112, %c0_113] : memref<128x128xf32, #tpu.memory_space<vmem>>, vector<2x32xf32>
    %c4_114 = arith.constant 4 : index
    %c96_115 = arith.constant 96 : index
    %92 = vector.load %arg16[%c4_114, %c96_115] : memref<24x512xf32, #tpu.memory_space<vmem>>, vector<2x32xf32>
    tpu.vector_store %arg16[%c4_114, %c96_115], %91 {strides = array<i32>} : memref<24x512xf32, #tpu.memory_space<vmem>>, vector<2x32xf32>,
    %c38_116 = arith.constant 38 : index
    %c0_117 = arith.constant 0 : index
    %93 = vector.load %arg15[%c38_116, %c0_117] : memref<128x128xf32, #tpu.memory_space<vmem>>, vector<2x32xf32>
    %c6_118 = arith.constant 6 : index
    %c96_119 = arith.constant 96 : index
    %94 = vector.load %arg16[%c6_118, %c96_119] : memref<24x512xf32, #tpu.memory_space<vmem>>, vector<2x32xf32>
    tpu.vector_store %arg16[%c6_118, %c96_119], %93 {strides = array<i32>} : memref<24x512xf32, #tpu.memory_space<vmem>>, vector<2x32xf32>,
    %c42_120 = arith.constant 42 : index
    %c0_121 = arith.constant 0 : index
    %95 = vector.load %arg15[%c42_120, %c0_121] : memref<128x128xf32, #tpu.memory_space<vmem>>, vector<2x32xf32>
    %c8_122 = arith.constant 8 : index
    %c96_123 = arith.constant 96 : index
    %96 = vector.load %arg16[%c8_122, %c96_123] : memref<24x512xf32, #tpu.memory_space<vmem>>, vector<2x32xf32>
    tpu.vector_store %arg16[%c8_122, %c96_123], %95 {strides = array<i32>} : memref<24x512xf32, #tpu.memory_space<vmem>>, vector<2x32xf32>,
    %c46 = arith.constant 46 : index
    %c0_124 = arith.constant 0 : index
    %97 = vector.load %arg15[%c46, %c0_124] : memref<128x128xf32, #tpu.memory_space<vmem>>, vector<2x32xf32>
    %c10_125 = arith.constant 10 : index
    %c96_126 = arith.constant 96 : index
    %98 = vector.load %arg16[%c10_125, %c96_126] : memref<24x512xf32, #tpu.memory_space<vmem>>, vector<2x32xf32>
    tpu.vector_store %arg16[%c10_125, %c96_126], %97 {strides = array<i32>} : memref<24x512xf32, #tpu.memory_space<vmem>>, vector<2x32xf32>,
    %c70_127 = arith.constant 70 : index
    %c0_128 = arith.constant 0 : index
    %99 = vector.load %arg15[%c70_127, %c0_128] : memref<128x128xf32, #tpu.memory_space<vmem>>, vector<2x32xf32>
    %c12_129 = arith.constant 12 : index
    %c96_130 = arith.constant 96 : index
    %100 = vector.load %arg16[%c12_129, %c96_130] : memref<24x512xf32, #tpu.memory_space<vmem>>, vector<2x32xf32>
    tpu.vector_store %arg16[%c12_129, %c96_130], %99 {strides = array<i32>} : memref<24x512xf32, #tpu.memory_space<vmem>>, vector<2x32xf32>,
    %c74_131 = arith.constant 74 : index
    %c0_132 = arith.constant 0 : index
    %101 = vector.load %arg15[%c74_131, %c0_132] : memref<128x128xf32, #tpu.memory_space<vmem>>, vector<2x32xf32>
    %c14_133 = arith.constant 14 : index
    %c96_134 = arith.constant 96 : index
    %102 = vector.load %arg16[%c14_133, %c96_134] : memref<24x512xf32, #tpu.memory_space<vmem>>, vector<2x32xf32>
    tpu.vector_store %arg16[%c14_133, %c96_134], %101 {strides = array<i32>} : memref<24x512xf32, #tpu.memory_space<vmem>>, vector<2x32xf32>,
    %c78 = arith.constant 78 : index
    %c0_135 = arith.constant 0 : index
    %103 = vector.load %arg15[%c78, %c0_135] : memref<128x128xf32, #tpu.memory_space<vmem>>, vector<2x32xf32>
    %c16_136 = arith.constant 16 : index
    %c96_137 = arith.constant 96 : index
    %104 = vector.load %arg16[%c16_136, %c96_137] : memref<24x512xf32, #tpu.memory_space<vmem>>, vector<2x32xf32>
    tpu.vector_store %arg16[%c16_136, %c96_137], %103 {strides = array<i32>} : memref<24x512xf32, #tpu.memory_space<vmem>>, vector<2x32xf32>,
    %c16_138 = arith.constant 16 : index
    %c0_139 = arith.constant 0 : index
    %105 = vector.load %arg15[%c16_138, %c0_139] : memref<128x128xf32, #tpu.memory_space<vmem>>, vector<2x32xf32>
    %c0_140 = arith.constant 0 : index
    %c128 = arith.constant 128 : index
    %106 = vector.load %arg16[%c0_140, %c128] : memref<24x512xf32, #tpu.memory_space<vmem>>, vector<2x32xf32>
    tpu.vector_store %arg16[%c0_140, %c128], %105 {strides = array<i32>} : memref<24x512xf32, #tpu.memory_space<vmem>>, vector<2x32xf32>,
    %c20 = arith.constant 20 : index
    %c0_141 = arith.constant 0 : index
    %107 = vector.load %arg15[%c20, %c0_141] : memref<128x128xf32, #tpu.memory_space<vmem>>, vector<2x32xf32>
    %c2_142 = arith.constant 2 : index
    %c128_143 = arith.constant 128 : index
    %108 = vector.load %arg16[%c2_142, %c128_143] : memref<24x512xf32, #tpu.memory_space<vmem>>, vector<2x32xf32>
    tpu.vector_store %arg16[%c2_142, %c128_143], %107 {strides = array<i32>} : memref<24x512xf32, #tpu.memory_space<vmem>>, vector<2x32xf32>,
    %c24 = arith.constant 24 : index
    %c0_144 = arith.constant 0 : index
    %109 = vector.load %arg15[%c24, %c0_144] : memref<128x128xf32, #tpu.memory_space<vmem>>, vector<2x32xf32>
    %c4_145 = arith.constant 4 : index
    %c128_146 = arith.constant 128 : index
    %110 = vector.load %arg16[%c4_145, %c128_146] : memref<24x512xf32, #tpu.memory_space<vmem>>, vector<2x32xf32>
    tpu.vector_store %arg16[%c4_145, %c128_146], %109 {strides = array<i32>} : memref<24x512xf32, #tpu.memory_space<vmem>>, vector<2x32xf32>,
    %c48 = arith.constant 48 : index
    %c0_147 = arith.constant 0 : index
    %111 = vector.load %arg15[%c48, %c0_147] : memref<128x128xf32, #tpu.memory_space<vmem>>, vector<2x32xf32>
    %c6_148 = arith.constant 6 : index
    %c128_149 = arith.constant 128 : index
    %112 = vector.load %arg16[%c6_148, %c128_149] : memref<24x512xf32, #tpu.memory_space<vmem>>, vector<2x32xf32>
    tpu.vector_store %arg16[%c6_148, %c128_149], %111 {strides = array<i32>} : memref<24x512xf32, #tpu.memory_space<vmem>>, vector<2x32xf32>,
    %c52 = arith.constant 52 : index
    %c0_150 = arith.constant 0 : index
    %113 = vector.load %arg15[%c52, %c0_150] : memref<128x128xf32, #tpu.memory_space<vmem>>, vector<2x32xf32>
    %c8_151 = arith.constant 8 : index
    %c128_152 = arith.constant 128 : index
    %114 = vector.load %arg16[%c8_151, %c128_152] : memref<24x512xf32, #tpu.memory_space<vmem>>, vector<2x32xf32>
    tpu.vector_store %arg16[%c8_151, %c128_152], %113 {strides = array<i32>} : memref<24x512xf32, #tpu.memory_space<vmem>>, vector<2x32xf32>,
    %c56 = arith.constant 56 : index
    %c0_153 = arith.constant 0 : index
    %115 = vector.load %arg15[%c56, %c0_153] : memref<128x128xf32, #tpu.memory_space<vmem>>, vector<2x32xf32>
    %c10_154 = arith.constant 10 : index
    %c128_155 = arith.constant 128 : index
    %116 = vector.load %arg16[%c10_154, %c128_155] : memref<24x512xf32, #tpu.memory_space<vmem>>, vector<2x32xf32>
    tpu.vector_store %arg16[%c10_154, %c128_155], %115 {strides = array<i32>} : memref<24x512xf32, #tpu.memory_space<vmem>>, vector<2x32xf32>,
    %c80 = arith.constant 80 : index
    %c0_156 = arith.constant 0 : index
    %117 = vector.load %arg15[%c80, %c0_156] : memref<128x128xf32, #tpu.memory_space<vmem>>, vector<2x32xf32>
    %c12_157 = arith.constant 12 : index
    %c128_158 = arith.constant 128 : index
    %118 = vector.load %arg16[%c12_157, %c128_158] : memref<24x512xf32, #tpu.memory_space<vmem>>, vector<2x32xf32>
    tpu.vector_store %arg16[%c12_157, %c128_158], %117 {strides = array<i32>} : memref<24x512xf32, #tpu.memory_space<vmem>>, vector<2x32xf32>,
    %c84 = arith.constant 84 : index
    %c0_159 = arith.constant 0 : index
    %119 = vector.load %arg15[%c84, %c0_159] : memref<128x128xf32, #tpu.memory_space<vmem>>, vector<2x32xf32>
    %c14_160 = arith.constant 14 : index
    %c128_161 = arith.constant 128 : index
    %120 = vector.load %arg16[%c14_160, %c128_161] : memref<24x512xf32, #tpu.memory_space<vmem>>, vector<2x32xf32>
    tpu.vector_store %arg16[%c14_160, %c128_161], %119 {strides = array<i32>} : memref<24x512xf32, #tpu.memory_space<vmem>>, vector<2x32xf32>,
    %c88 = arith.constant 88 : index
    %c0_162 = arith.constant 0 : index
    %121 = vector.load %arg15[%c88, %c0_162] : memref<128x128xf32, #tpu.memory_space<vmem>>, vector<2x32xf32>
    %c16_163 = arith.constant 16 : index
    %c128_164 = arith.constant 128 : index
    %122 = vector.load %arg16[%c16_163, %c128_164] : memref<24x512xf32, #tpu.memory_space<vmem>>, vector<2x32xf32>
    tpu.vector_store %arg16[%c16_163, %c128_164], %121 {strides = array<i32>} : memref<24x512xf32, #tpu.memory_space<vmem>>, vector<2x32xf32>,
    %c18 = arith.constant 18 : index
    %c0_165 = arith.constant 0 : index
    %123 = vector.load %arg15[%c18, %c0_165] : memref<128x128xf32, #tpu.memory_space<vmem>>, vector<2x32xf32>
    %c0_166 = arith.constant 0 : index
    %c160 = arith.constant 160 : index
    %124 = vector.load %arg16[%c0_166, %c160] : memref<24x512xf32, #tpu.memory_space<vmem>>, vector<2x32xf32>
    tpu.vector_store %arg16[%c0_166, %c160], %123 {strides = array<i32>} : memref<24x512xf32, #tpu.memory_space<vmem>>, vector<2x32xf32>,
    %c22 = arith.constant 22 : index
    %c0_167 = arith.constant 0 : index
    %125 = vector.load %arg15[%c22, %c0_167] : memref<128x128xf32, #tpu.memory_space<vmem>>, vector<2x32xf32>
    %c2_168 = arith.constant 2 : index
    %c160_169 = arith.constant 160 : index
    %126 = vector.load %arg16[%c2_168, %c160_169] : memref<24x512xf32, #tpu.memory_space<vmem>>, vector<2x32xf32>
    tpu.vector_store %arg16[%c2_168, %c160_169], %125 {strides = array<i32>} : memref<24x512xf32, #tpu.memory_space<vmem>>, vector<2x32xf32>,
    %c26 = arith.constant 26 : index
    %c0_170 = arith.constant 0 : index
    %127 = vector.load %arg15[%c26, %c0_170] : memref<128x128xf32, #tpu.memory_space<vmem>>, vector<2x32xf32>
    %c4_171 = arith.constant 4 : index
    %c160_172 = arith.constant 160 : index
    %128 = vector.load %arg16[%c4_171, %c160_172] : memref<24x512xf32, #tpu.memory_space<vmem>>, vector<2x32xf32>
    tpu.vector_store %arg16[%c4_171, %c160_172], %127 {strides = array<i32>} : memref<24x512xf32, #tpu.memory_space<vmem>>, vector<2x32xf32>,
    %c50 = arith.constant 50 : index
    %c0_173 = arith.constant 0 : index
    %129 = vector.load %arg15[%c50, %c0_173] : memref<128x128xf32, #tpu.memory_space<vmem>>, vector<2x32xf32>
    %c6_174 = arith.constant 6 : index
    %c160_175 = arith.constant 160 : index
    %130 = vector.load %arg16[%c6_174, %c160_175] : memref<24x512xf32, #tpu.memory_space<vmem>>, vector<2x32xf32>
    tpu.vector_store %arg16[%c6_174, %c160_175], %129 {strides = array<i32>} : memref<24x512xf32, #tpu.memory_space<vmem>>, vector<2x32xf32>,
    %c54 = arith.constant 54 : index
    %c0_176 = arith.constant 0 : index
    %131 = vector.load %arg15[%c54, %c0_176] : memref<128x128xf32, #tpu.memory_space<vmem>>, vector<2x32xf32>
    %c8_177 = arith.constant 8 : index
    %c160_178 = arith.constant 160 : index
    %132 = vector.load %arg16[%c8_177, %c160_178] : memref<24x512xf32, #tpu.memory_space<vmem>>, vector<2x32xf32>
    tpu.vector_store %arg16[%c8_177, %c160_178], %131 {strides = array<i32>} : memref<24x512xf32, #tpu.memory_space<vmem>>, vector<2x32xf32>,
    %c58 = arith.constant 58 : index
    %c0_179 = arith.constant 0 : index
    %133 = vector.load %arg15[%c58, %c0_179] : memref<128x128xf32, #tpu.memory_space<vmem>>, vector<2x32xf32>
    %c10_180 = arith.constant 10 : index
    %c160_181 = arith.constant 160 : index
    %134 = vector.load %arg16[%c10_180, %c160_181] : memref<24x512xf32, #tpu.memory_space<vmem>>, vector<2x32xf32>
    tpu.vector_store %arg16[%c10_180, %c160_181], %133 {strides = array<i32>} : memref<24x512xf32, #tpu.memory_space<vmem>>, vector<2x32xf32>,
    %c82 = arith.constant 82 : index
    %c0_182 = arith.constant 0 : index
    %135 = vector.load %arg15[%c82, %c0_182] : memref<128x128xf32, #tpu.memory_space<vmem>>, vector<2x32xf32>
    %c12_183 = arith.constant 12 : index
    %c160_184 = arith.constant 160 : index
    %136 = vector.load %arg16[%c12_183, %c160_184] : memref<24x512xf32, #tpu.memory_space<vmem>>, vector<2x32xf32>
    tpu.vector_store %arg16[%c12_183, %c160_184], %135 {strides = array<i32>} : memref<24x512xf32, #tpu.memory_space<vmem>>, vector<2x32xf32>,
    %c86 = arith.constant 86 : index
    %c0_185 = arith.constant 0 : index
    %137 = vector.load %arg15[%c86, %c0_185] : memref<128x128xf32, #tpu.memory_space<vmem>>, vector<2x32xf32>
    %c14_186 = arith.constant 14 : index
    %c160_187 = arith.constant 160 : index
    %138 = vector.load %arg16[%c14_186, %c160_187] : memref<24x512xf32, #tpu.memory_space<vmem>>, vector<2x32xf32>
    tpu.vector_store %arg16[%c14_186, %c160_187], %137 {strides = array<i32>} : memref<24x512xf32, #tpu.memory_space<vmem>>, vector<2x32xf32>,
    %c90 = arith.constant 90 : index
    %c0_188 = arith.constant 0 : index
    %139 = vector.load %arg15[%c90, %c0_188] : memref<128x128xf32, #tpu.memory_space<vmem>>, vector<2x32xf32>
    %c16_189 = arith.constant 16 : index
    %c160_190 = arith.constant 160 : index
    %140 = vector.load %arg16[%c16_189, %c160_190] : memref<24x512xf32, #tpu.memory_space<vmem>>, vector<2x32xf32>
    tpu.vector_store %arg16[%c16_189, %c160_190], %139 {strides = array<i32>} : memref<24x512xf32, #tpu.memory_space<vmem>>, vector<2x32xf32>,
    %c20_191 = arith.constant 20 : index
    %c0_192 = arith.constant 0 : index
    %141 = vector.load %arg15[%c20_191, %c0_192] : memref<128x128xf32, #tpu.memory_space<vmem>>, vector<2x32xf32>
    %c0_193 = arith.constant 0 : index
    %c192 = arith.constant 192 : index
    %142 = vector.load %arg16[%c0_193, %c192] : memref<24x512xf32, #tpu.memory_space<vmem>>, vector<2x32xf32>
    tpu.vector_store %arg16[%c0_193, %c192], %141 {strides = array<i32>} : memref<24x512xf32, #tpu.memory_space<vmem>>, vector<2x32xf32>,
    %c24_194 = arith.constant 24 : index
    %c0_195 = arith.constant 0 : index
    %143 = vector.load %arg15[%c24_194, %c0_195] : memref<128x128xf32, #tpu.memory_space<vmem>>, vector<2x32xf32>
    %c2_196 = arith.constant 2 : index
    %c192_197 = arith.constant 192 : index
    %144 = vector.load %arg16[%c2_196, %c192_197] : memref<24x512xf32, #tpu.memory_space<vmem>>, vector<2x32xf32>
    tpu.vector_store %arg16[%c2_196, %c192_197], %143 {strides = array<i32>} : memref<24x512xf32, #tpu.memory_space<vmem>>, vector<2x32xf32>,
    %c28 = arith.constant 28 : index
    %c0_198 = arith.constant 0 : index
    %145 = vector.load %arg15[%c28, %c0_198] : memref<128x128xf32, #tpu.memory_space<vmem>>, vector<2x32xf32>
    %c4_199 = arith.constant 4 : index
    %c192_200 = arith.constant 192 : index
    %146 = vector.load %arg16[%c4_199, %c192_200] : memref<24x512xf32, #tpu.memory_space<vmem>>, vector<2x32xf32>
    tpu.vector_store %arg16[%c4_199, %c192_200], %145 {strides = array<i32>} : memref<24x512xf32, #tpu.memory_space<vmem>>, vector<2x32xf32>,
    %c52_201 = arith.constant 52 : index
    %c0_202 = arith.constant 0 : index
    %147 = vector.load %arg15[%c52_201, %c0_202] : memref<128x128xf32, #tpu.memory_space<vmem>>, vector<2x32xf32>
    %c6_203 = arith.constant 6 : index
    %c192_204 = arith.constant 192 : index
    %148 = vector.load %arg16[%c6_203, %c192_204] : memref<24x512xf32, #tpu.memory_space<vmem>>, vector<2x32xf32>
    tpu.vector_store %arg16[%c6_203, %c192_204], %147 {strides = array<i32>} : memref<24x512xf32, #tpu.memory_space<vmem>>, vector<2x32xf32>,
    %c56_205 = arith.constant 56 : index
    %c0_206 = arith.constant 0 : index
    %149 = vector.load %arg15[%c56_205, %c0_206] : memref<128x128xf32, #tpu.memory_space<vmem>>, vector<2x32xf32>
    %c8_207 = arith.constant 8 : index
    %c192_208 = arith.constant 192 : index
    %150 = vector.load %arg16[%c8_207, %c192_208] : memref<24x512xf32, #tpu.memory_space<vmem>>, vector<2x32xf32>
    tpu.vector_store %arg16[%c8_207, %c192_208], %149 {strides = array<i32>} : memref<24x512xf32, #tpu.memory_space<vmem>>, vector<2x32xf32>,
    %c60 = arith.constant 60 : index
    %c0_209 = arith.constant 0 : index
    %151 = vector.load %arg15[%c60, %c0_209] : memref<128x128xf32, #tpu.memory_space<vmem>>, vector<2x32xf32>
    %c10_210 = arith.constant 10 : index
    %c192_211 = arith.constant 192 : index
    %152 = vector.load %arg16[%c10_210, %c192_211] : memref<24x512xf32, #tpu.memory_space<vmem>>, vector<2x32xf32>
    tpu.vector_store %arg16[%c10_210, %c192_211], %151 {strides = array<i32>} : memref<24x512xf32, #tpu.memory_space<vmem>>, vector<2x32xf32>,
    %c84_212 = arith.constant 84 : index
    %c0_213 = arith.constant 0 : index
    %153 = vector.load %arg15[%c84_212, %c0_213] : memref<128x128xf32, #tpu.memory_space<vmem>>, vector<2x32xf32>
    %c12_214 = arith.constant 12 : index
    %c192_215 = arith.constant 192 : index
    %154 = vector.load %arg16[%c12_214, %c192_215] : memref<24x512xf32, #tpu.memory_space<vmem>>, vector<2x32xf32>
    tpu.vector_store %arg16[%c12_214, %c192_215], %153 {strides = array<i32>} : memref<24x512xf32, #tpu.memory_space<vmem>>, vector<2x32xf32>,
    %c88_216 = arith.constant 88 : index
    %c0_217 = arith.constant 0 : index
    %155 = vector.load %arg15[%c88_216, %c0_217] : memref<128x128xf32, #tpu.memory_space<vmem>>, vector<2x32xf32>
    %c14_218 = arith.constant 14 : index
    %c192_219 = arith.constant 192 : index
    %156 = vector.load %arg16[%c14_218, %c192_219] : memref<24x512xf32, #tpu.memory_space<vmem>>, vector<2x32xf32>
    tpu.vector_store %arg16[%c14_218, %c192_219], %155 {strides = array<i32>} : memref<24x512xf32, #tpu.memory_space<vmem>>, vector<2x32xf32>,
    %c92 = arith.constant 92 : index
    %c0_220 = arith.constant 0 : index
    %157 = vector.load %arg15[%c92, %c0_220] : memref<128x128xf32, #tpu.memory_space<vmem>>, vector<2x32xf32>
    %c16_221 = arith.constant 16 : index
    %c192_222 = arith.constant 192 : index
    %158 = vector.load %arg16[%c16_221, %c192_222] : memref<24x512xf32, #tpu.memory_space<vmem>>, vector<2x32xf32>
    tpu.vector_store %arg16[%c16_221, %c192_222], %157 {strides = array<i32>} : memref<24x512xf32, #tpu.memory_space<vmem>>, vector<2x32xf32>,
    %c22_223 = arith.constant 22 : index
    %c0_224 = arith.constant 0 : index
    %159 = vector.load %arg15[%c22_223, %c0_224] : memref<128x128xf32, #tpu.memory_space<vmem>>, vector<2x32xf32>
    %c0_225 = arith.constant 0 : index
    %c224 = arith.constant 224 : index
    %160 = vector.load %arg16[%c0_225, %c224] : memref<24x512xf32, #tpu.memory_space<vmem>>, vector<2x32xf32>
    tpu.vector_store %arg16[%c0_225, %c224], %159 {strides = array<i32>} : memref<24x512xf32, #tpu.memory_space<vmem>>, vector<2x32xf32>,
    %c26_226 = arith.constant 26 : index
    %c0_227 = arith.constant 0 : index
    %161 = vector.load %arg15[%c26_226, %c0_227] : memref<128x128xf32, #tpu.memory_space<vmem>>, vector<2x32xf32>
    %c2_228 = arith.constant 2 : index
    %c224_229 = arith.constant 224 : index
    %162 = vector.load %arg16[%c2_228, %c224_229] : memref<24x512xf32, #tpu.memory_space<vmem>>, vector<2x32xf32>
    tpu.vector_store %arg16[%c2_228, %c224_229], %161 {strides = array<i32>} : memref<24x512xf32, #tpu.memory_space<vmem>>, vector<2x32xf32>,
    %c30 = arith.constant 30 : index
    %c0_230 = arith.constant 0 : index
    %163 = vector.load %arg15[%c30, %c0_230] : memref<128x128xf32, #tpu.memory_space<vmem>>, vector<2x32xf32>
    %c4_231 = arith.constant 4 : index
    %c224_232 = arith.constant 224 : index
    %164 = vector.load %arg16[%c4_231, %c224_232] : memref<24x512xf32, #tpu.memory_space<vmem>>, vector<2x32xf32>
    tpu.vector_store %arg16[%c4_231, %c224_232], %163 {strides = array<i32>} : memref<24x512xf32, #tpu.memory_space<vmem>>, vector<2x32xf32>,
    %c54_233 = arith.constant 54 : index
    %c0_234 = arith.constant 0 : index
    %165 = vector.load %arg15[%c54_233, %c0_234] : memref<128x128xf32, #tpu.memory_space<vmem>>, vector<2x32xf32>
    %c6_235 = arith.constant 6 : index
    %c224_236 = arith.constant 224 : index
    %166 = vector.load %arg16[%c6_235, %c224_236] : memref<24x512xf32, #tpu.memory_space<vmem>>, vector<2x32xf32>
    tpu.vector_store %arg16[%c6_235, %c224_236], %165 {strides = array<i32>} : memref<24x512xf32, #tpu.memory_space<vmem>>, vector<2x32xf32>,
    %c58_237 = arith.constant 58 : index
    %c0_238 = arith.constant 0 : index
    %167 = vector.load %arg15[%c58_237, %c0_238] : memref<128x128xf32, #tpu.memory_space<vmem>>, vector<2x32xf32>
    %c8_239 = arith.constant 8 : index
    %c224_240 = arith.constant 224 : index
    %168 = vector.load %arg16[%c8_239, %c224_240] : memref<24x512xf32, #tpu.memory_space<vmem>>, vector<2x32xf32>
    tpu.vector_store %arg16[%c8_239, %c224_240], %167 {strides = array<i32>} : memref<24x512xf32, #tpu.memory_space<vmem>>, vector<2x32xf32>,
    %c62 = arith.constant 62 : index
    %c0_241 = arith.constant 0 : index
    %169 = vector.load %arg15[%c62, %c0_241] : memref<128x128xf32, #tpu.memory_space<vmem>>, vector<2x32xf32>
    %c10_242 = arith.constant 10 : index
    %c224_243 = arith.constant 224 : index
    %170 = vector.load %arg16[%c10_242, %c224_243] : memref<24x512xf32, #tpu.memory_space<vmem>>, vector<2x32xf32>
    tpu.vector_store %arg16[%c10_242, %c224_243], %169 {strides = array<i32>} : memref<24x512xf32, #tpu.memory_space<vmem>>, vector<2x32xf32>,
    %c86_244 = arith.constant 86 : index
    %c0_245 = arith.constant 0 : index
    %171 = vector.load %arg15[%c86_244, %c0_245] : memref<128x128xf32, #tpu.memory_space<vmem>>, vector<2x32xf32>
    %c12_246 = arith.constant 12 : index
    %c224_247 = arith.constant 224 : index
    %172 = vector.load %arg16[%c12_246, %c224_247] : memref<24x512xf32, #tpu.memory_space<vmem>>, vector<2x32xf32>
    tpu.vector_store %arg16[%c12_246, %c224_247], %171 {strides = array<i32>} : memref<24x512xf32, #tpu.memory_space<vmem>>, vector<2x32xf32>,
    %c90_248 = arith.constant 90 : index
    %c0_249 = arith.constant 0 : index
    %173 = vector.load %arg15[%c90_248, %c0_249] : memref<128x128xf32, #tpu.memory_space<vmem>>, vector<2x32xf32>
    %c14_250 = arith.constant 14 : index
    %c224_251 = arith.constant 224 : index
    %174 = vector.load %arg16[%c14_250, %c224_251] : memref<24x512xf32, #tpu.memory_space<vmem>>, vector<2x32xf32>
    tpu.vector_store %arg16[%c14_250, %c224_251], %173 {strides = array<i32>} : memref<24x512xf32, #tpu.memory_space<vmem>>, vector<2x32xf32>,
    %c94 = arith.constant 94 : index
    %c0_252 = arith.constant 0 : index
    %175 = vector.load %arg15[%c94, %c0_252] : memref<128x128xf32, #tpu.memory_space<vmem>>, vector<2x32xf32>
    %c16_253 = arith.constant 16 : index
    %c224_254 = arith.constant 224 : index
    %176 = vector.load %arg16[%c16_253, %c224_254] : memref<24x512xf32, #tpu.memory_space<vmem>>, vector<2x32xf32>
    tpu.vector_store %arg16[%c16_253, %c224_254], %175 {strides = array<i32>} : memref<24x512xf32, #tpu.memory_space<vmem>>, vector<2x32xf32>,
    %c32_255 = arith.constant 32 : index
    %c0_256 = arith.constant 0 : index
    %177 = vector.load %arg15[%c32_255, %c0_256] : memref<128x128xf32, #tpu.memory_space<vmem>>, vector<2x32xf32>
    %c0_257 = arith.constant 0 : index
    %c256 = arith.constant 256 : index
    %178 = vector.load %arg16[%c0_257, %c256] : memref<24x512xf32, #tpu.memory_space<vmem>>, vector<2x32xf32>
    tpu.vector_store %arg16[%c0_257, %c256], %177 {strides = array<i32>} : memref<24x512xf32, #tpu.memory_space<vmem>>, vector<2x32xf32>,
    %c36_258 = arith.constant 36 : index
    %c0_259 = arith.constant 0 : index
    %179 = vector.load %arg15[%c36_258, %c0_259] : memref<128x128xf32, #tpu.memory_space<vmem>>, vector<2x32xf32>
    %c2_260 = arith.constant 2 : index
    %c256_261 = arith.constant 256 : index
    %180 = vector.load %arg16[%c2_260, %c256_261] : memref<24x512xf32, #tpu.memory_space<vmem>>, vector<2x32xf32>
    tpu.vector_store %arg16[%c2_260, %c256_261], %179 {strides = array<i32>} : memref<24x512xf32, #tpu.memory_space<vmem>>, vector<2x32xf32>,
    %c40_262 = arith.constant 40 : index
    %c0_263 = arith.constant 0 : index
    %181 = vector.load %arg15[%c40_262, %c0_263] : memref<128x128xf32, #tpu.memory_space<vmem>>, vector<2x32xf32>
    %c4_264 = arith.constant 4 : index
    %c256_265 = arith.constant 256 : index
    %182 = vector.load %arg16[%c4_264, %c256_265] : memref<24x512xf32, #tpu.memory_space<vmem>>, vector<2x32xf32>
    tpu.vector_store %arg16[%c4_264, %c256_265], %181 {strides = array<i32>} : memref<24x512xf32, #tpu.memory_space<vmem>>, vector<2x32xf32>,
    %c64_266 = arith.constant 64 : index
    %c0_267 = arith.constant 0 : index
    %183 = vector.load %arg15[%c64_266, %c0_267] : memref<128x128xf32, #tpu.memory_space<vmem>>, vector<2x32xf32>
    %c6_268 = arith.constant 6 : index
    %c256_269 = arith.constant 256 : index
    %184 = vector.load %arg16[%c6_268, %c256_269] : memref<24x512xf32, #tpu.memory_space<vmem>>, vector<2x32xf32>
    tpu.vector_store %arg16[%c6_268, %c256_269], %183 {strides = array<i32>} : memref<24x512xf32, #tpu.memory_space<vmem>>, vector<2x32xf32>,
    %c68_270 = arith.constant 68 : index
    %c0_271 = arith.constant 0 : index
    %185 = vector.load %arg15[%c68_270, %c0_271] : memref<128x128xf32, #tpu.memory_space<vmem>>, vector<2x32xf32>
    %c8_272 = arith.constant 8 : index
    %c256_273 = arith.constant 256 : index
    %186 = vector.load %arg16[%c8_272, %c256_273] : memref<24x512xf32, #tpu.memory_space<vmem>>, vector<2x32xf32>
    tpu.vector_store %arg16[%c8_272, %c256_273], %185 {strides = array<i32>} : memref<24x512xf32, #tpu.memory_space<vmem>>, vector<2x32xf32>,
    %c72_274 = arith.constant 72 : index
    %c0_275 = arith.constant 0 : index
    %187 = vector.load %arg15[%c72_274, %c0_275] : memref<128x128xf32, #tpu.memory_space<vmem>>, vector<2x32xf32>
    %c10_276 = arith.constant 10 : index
    %c256_277 = arith.constant 256 : index
    %188 = vector.load %arg16[%c10_276, %c256_277] : memref<24x512xf32, #tpu.memory_space<vmem>>, vector<2x32xf32>
    tpu.vector_store %arg16[%c10_276, %c256_277], %187 {strides = array<i32>} : memref<24x512xf32, #tpu.memory_space<vmem>>, vector<2x32xf32>,
    %c96_278 = arith.constant 96 : index
    %c0_279 = arith.constant 0 : index
    %189 = vector.load %arg15[%c96_278, %c0_279] : memref<128x128xf32, #tpu.memory_space<vmem>>, vector<2x32xf32>
    %c12_280 = arith.constant 12 : index
    %c256_281 = arith.constant 256 : index
    %190 = vector.load %arg16[%c12_280, %c256_281] : memref<24x512xf32, #tpu.memory_space<vmem>>, vector<2x32xf32>
    tpu.vector_store %arg16[%c12_280, %c256_281], %189 {strides = array<i32>} : memref<24x512xf32, #tpu.memory_space<vmem>>, vector<2x32xf32>,
    %c100 = arith.constant 100 : index
    %c0_282 = arith.constant 0 : index
    %191 = vector.load %arg15[%c100, %c0_282] : memref<128x128xf32, #tpu.memory_space<vmem>>, vector<2x32xf32>
    %c14_283 = arith.constant 14 : index
    %c256_284 = arith.constant 256 : index
    %192 = vector.load %arg16[%c14_283, %c256_284] : memref<24x512xf32, #tpu.memory_space<vmem>>, vector<2x32xf32>
    tpu.vector_store %arg16[%c14_283, %c256_284], %191 {strides = array<i32>} : memref<24x512xf32, #tpu.memory_space<vmem>>, vector<2x32xf32>,
    %c104 = arith.constant 104 : index
    %c0_285 = arith.constant 0 : index
    %193 = vector.load %arg15[%c104, %c0_285] : memref<128x128xf32, #tpu.memory_space<vmem>>, vector<2x32xf32>
    %c16_286 = arith.constant 16 : index
    %c256_287 = arith.constant 256 : index
    %194 = vector.load %arg16[%c16_286, %c256_287] : memref<24x512xf32, #tpu.memory_space<vmem>>, vector<2x32xf32>
    tpu.vector_store %arg16[%c16_286, %c256_287], %193 {strides = array<i32>} : memref<24x512xf32, #tpu.memory_space<vmem>>, vector<2x32xf32>,
    %c34_288 = arith.constant 34 : index
    %c0_289 = arith.constant 0 : index
    %195 = vector.load %arg15[%c34_288, %c0_289] : memref<128x128xf32, #tpu.memory_space<vmem>>, vector<2x32xf32>
    %c0_290 = arith.constant 0 : index
    %c288 = arith.constant 288 : index
    %196 = vector.load %arg16[%c0_290, %c288] : memref<24x512xf32, #tpu.memory_space<vmem>>, vector<2x32xf32>
    tpu.vector_store %arg16[%c0_290, %c288], %195 {strides = array<i32>} : memref<24x512xf32, #tpu.memory_space<vmem>>, vector<2x32xf32>,
    %c38_291 = arith.constant 38 : index
    %c0_292 = arith.constant 0 : index
    %197 = vector.load %arg15[%c38_291, %c0_292] : memref<128x128xf32, #tpu.memory_space<vmem>>, vector<2x32xf32>
    %c2_293 = arith.constant 2 : index
    %c288_294 = arith.constant 288 : index
    %198 = vector.load %arg16[%c2_293, %c288_294] : memref<24x512xf32, #tpu.memory_space<vmem>>, vector<2x32xf32>
    tpu.vector_store %arg16[%c2_293, %c288_294], %197 {strides = array<i32>} : memref<24x512xf32, #tpu.memory_space<vmem>>, vector<2x32xf32>,
    %c42_295 = arith.constant 42 : index
    %c0_296 = arith.constant 0 : index
    %199 = vector.load %arg15[%c42_295, %c0_296] : memref<128x128xf32, #tpu.memory_space<vmem>>, vector<2x32xf32>
    %c4_297 = arith.constant 4 : index
    %c288_298 = arith.constant 288 : index
    %200 = vector.load %arg16[%c4_297, %c288_298] : memref<24x512xf32, #tpu.memory_space<vmem>>, vector<2x32xf32>
    tpu.vector_store %arg16[%c4_297, %c288_298], %199 {strides = array<i32>} : memref<24x512xf32, #tpu.memory_space<vmem>>, vector<2x32xf32>,
    %c66_299 = arith.constant 66 : index
    %c0_300 = arith.constant 0 : index
    %201 = vector.load %arg15[%c66_299, %c0_300] : memref<128x128xf32, #tpu.memory_space<vmem>>, vector<2x32xf32>
    %c6_301 = arith.constant 6 : index
    %c288_302 = arith.constant 288 : index
    %202 = vector.load %arg16[%c6_301, %c288_302] : memref<24x512xf32, #tpu.memory_space<vmem>>, vector<2x32xf32>
    tpu.vector_store %arg16[%c6_301, %c288_302], %201 {strides = array<i32>} : memref<24x512xf32, #tpu.memory_space<vmem>>, vector<2x32xf32>,
    %c70_303 = arith.constant 70 : index
    %c0_304 = arith.constant 0 : index
    %203 = vector.load %arg15[%c70_303, %c0_304] : memref<128x128xf32, #tpu.memory_space<vmem>>, vector<2x32xf32>
    %c8_305 = arith.constant 8 : index
    %c288_306 = arith.constant 288 : index
    %204 = vector.load %arg16[%c8_305, %c288_306] : memref<24x512xf32, #tpu.memory_space<vmem>>, vector<2x32xf32>
    tpu.vector_store %arg16[%c8_305, %c288_306], %203 {strides = array<i32>} : memref<24x512xf32, #tpu.memory_space<vmem>>, vector<2x32xf32>,
    %c74_307 = arith.constant 74 : index
    %c0_308 = arith.constant 0 : index
    %205 = vector.load %arg15[%c74_307, %c0_308] : memref<128x128xf32, #tpu.memory_space<vmem>>, vector<2x32xf32>
    %c10_309 = arith.constant 10 : index
    %c288_310 = arith.constant 288 : index
    %206 = vector.load %arg16[%c10_309, %c288_310] : memref<24x512xf32, #tpu.memory_space<vmem>>, vector<2x32xf32>
    tpu.vector_store %arg16[%c10_309, %c288_310], %205 {strides = array<i32>} : memref<24x512xf32, #tpu.memory_space<vmem>>, vector<2x32xf32>,
    %c98 = arith.constant 98 : index
    %c0_311 = arith.constant 0 : index
    %207 = vector.load %arg15[%c98, %c0_311] : memref<128x128xf32, #tpu.memory_space<vmem>>, vector<2x32xf32>
    %c12_312 = arith.constant 12 : index
    %c288_313 = arith.constant 288 : index
    %208 = vector.load %arg16[%c12_312, %c288_313] : memref<24x512xf32, #tpu.memory_space<vmem>>, vector<2x32xf32>
    tpu.vector_store %arg16[%c12_312, %c288_313], %207 {strides = array<i32>} : memref<24x512xf32, #tpu.memory_space<vmem>>, vector<2x32xf32>,
    %c102 = arith.constant 102 : index
    %c0_314 = arith.constant 0 : index
    %209 = vector.load %arg15[%c102, %c0_314] : memref<128x128xf32, #tpu.memory_space<vmem>>, vector<2x32xf32>
    %c14_315 = arith.constant 14 : index
    %c288_316 = arith.constant 288 : index
    %210 = vector.load %arg16[%c14_315, %c288_316] : memref<24x512xf32, #tpu.memory_space<vmem>>, vector<2x32xf32>
    tpu.vector_store %arg16[%c14_315, %c288_316], %209 {strides = array<i32>} : memref<24x512xf32, #tpu.memory_space<vmem>>, vector<2x32xf32>,
    %c106 = arith.constant 106 : index
    %c0_317 = arith.constant 0 : index
    %211 = vector.load %arg15[%c106, %c0_317] : memref<128x128xf32, #tpu.memory_space<vmem>>, vector<2x32xf32>
    %c16_318 = arith.constant 16 : index
    %c288_319 = arith.constant 288 : index
    %212 = vector.load %arg16[%c16_318, %c288_319] : memref<24x512xf32, #tpu.memory_space<vmem>>, vector<2x32xf32>
    tpu.vector_store %arg16[%c16_318, %c288_319], %211 {strides = array<i32>} : memref<24x512xf32, #tpu.memory_space<vmem>>, vector<2x32xf32>,
    %c36_320 = arith.constant 36 : index
    %c0_321 = arith.constant 0 : index
    %213 = vector.load %arg15[%c36_320, %c0_321] : memref<128x128xf32, #tpu.memory_space<vmem>>, vector<2x32xf32>
    %c0_322 = arith.constant 0 : index
    %c320 = arith.constant 320 : index
    %214 = vector.load %arg16[%c0_322, %c320] : memref<24x512xf32, #tpu.memory_space<vmem>>, vector<2x32xf32>
    tpu.vector_store %arg16[%c0_322, %c320], %213 {strides = array<i32>} : memref<24x512xf32, #tpu.memory_space<vmem>>, vector<2x32xf32>,
    %c40_323 = arith.constant 40 : index
    %c0_324 = arith.constant 0 : index
    %215 = vector.load %arg15[%c40_323, %c0_324] : memref<128x128xf32, #tpu.memory_space<vmem>>, vector<2x32xf32>
    %c2_325 = arith.constant 2 : index
    %c320_326 = arith.constant 320 : index
    %216 = vector.load %arg16[%c2_325, %c320_326] : memref<24x512xf32, #tpu.memory_space<vmem>>, vector<2x32xf32>
    tpu.vector_store %arg16[%c2_325, %c320_326], %215 {strides = array<i32>} : memref<24x512xf32, #tpu.memory_space<vmem>>, vector<2x32xf32>,
    %c44_327 = arith.constant 44 : index
    %c0_328 = arith.constant 0 : index
    %217 = vector.load %arg15[%c44_327, %c0_328] : memref<128x128xf32, #tpu.memory_space<vmem>>, vector<2x32xf32>
    %c4_329 = arith.constant 4 : index
    %c320_330 = arith.constant 320 : index
    %218 = vector.load %arg16[%c4_329, %c320_330] : memref<24x512xf32, #tpu.memory_space<vmem>>, vector<2x32xf32>
    tpu.vector_store %arg16[%c4_329, %c320_330], %217 {strides = array<i32>} : memref<24x512xf32, #tpu.memory_space<vmem>>, vector<2x32xf32>,
    %c68_331 = arith.constant 68 : index
    %c0_332 = arith.constant 0 : index
    %219 = vector.load %arg15[%c68_331, %c0_332] : memref<128x128xf32, #tpu.memory_space<vmem>>, vector<2x32xf32>
    %c6_333 = arith.constant 6 : index
    %c320_334 = arith.constant 320 : index
    %220 = vector.load %arg16[%c6_333, %c320_334] : memref<24x512xf32, #tpu.memory_space<vmem>>, vector<2x32xf32>
    tpu.vector_store %arg16[%c6_333, %c320_334], %219 {strides = array<i32>} : memref<24x512xf32, #tpu.memory_space<vmem>>, vector<2x32xf32>,
    %c72_335 = arith.constant 72 : index
    %c0_336 = arith.constant 0 : index
    %221 = vector.load %arg15[%c72_335, %c0_336] : memref<128x128xf32, #tpu.memory_space<vmem>>, vector<2x32xf32>
    %c8_337 = arith.constant 8 : index
    %c320_338 = arith.constant 320 : index
    %222 = vector.load %arg16[%c8_337, %c320_338] : memref<24x512xf32, #tpu.memory_space<vmem>>, vector<2x32xf32>
    tpu.vector_store %arg16[%c8_337, %c320_338], %221 {strides = array<i32>} : memref<24x512xf32, #tpu.memory_space<vmem>>, vector<2x32xf32>,
    %c76_339 = arith.constant 76 : index
    %c0_340 = arith.constant 0 : index
    %223 = vector.load %arg15[%c76_339, %c0_340] : memref<128x128xf32, #tpu.memory_space<vmem>>, vector<2x32xf32>
    %c10_341 = arith.constant 10 : index
    %c320_342 = arith.constant 320 : index
    %224 = vector.load %arg16[%c10_341, %c320_342] : memref<24x512xf32, #tpu.memory_space<vmem>>, vector<2x32xf32>
    tpu.vector_store %arg16[%c10_341, %c320_342], %223 {strides = array<i32>} : memref<24x512xf32, #tpu.memory_space<vmem>>, vector<2x32xf32>,
    %c100_343 = arith.constant 100 : index
    %c0_344 = arith.constant 0 : index
    %225 = vector.load %arg15[%c100_343, %c0_344] : memref<128x128xf32, #tpu.memory_space<vmem>>, vector<2x32xf32>
    %c12_345 = arith.constant 12 : index
    %c320_346 = arith.constant 320 : index
    %226 = vector.load %arg16[%c12_345, %c320_346] : memref<24x512xf32, #tpu.memory_space<vmem>>, vector<2x32xf32>
    tpu.vector_store %arg16[%c12_345, %c320_346], %225 {strides = array<i32>} : memref<24x512xf32, #tpu.memory_space<vmem>>, vector<2x32xf32>,
    %c104_347 = arith.constant 104 : index
    %c0_348 = arith.constant 0 : index
    %227 = vector.load %arg15[%c104_347, %c0_348] : memref<128x128xf32, #tpu.memory_space<vmem>>, vector<2x32xf32>
    %c14_349 = arith.constant 14 : index
    %c320_350 = arith.constant 320 : index
    %228 = vector.load %arg16[%c14_349, %c320_350] : memref<24x512xf32, #tpu.memory_space<vmem>>, vector<2x32xf32>
    tpu.vector_store %arg16[%c14_349, %c320_350], %227 {strides = array<i32>} : memref<24x512xf32, #tpu.memory_space<vmem>>, vector<2x32xf32>,
    %c108 = arith.constant 108 : index
    %c0_351 = arith.constant 0 : index
    %229 = vector.load %arg15[%c108, %c0_351] : memref<128x128xf32, #tpu.memory_space<vmem>>, vector<2x32xf32>
    %c16_352 = arith.constant 16 : index
    %c320_353 = arith.constant 320 : index
    %230 = vector.load %arg16[%c16_352, %c320_353] : memref<24x512xf32, #tpu.memory_space<vmem>>, vector<2x32xf32>
    tpu.vector_store %arg16[%c16_352, %c320_353], %229 {strides = array<i32>} : memref<24x512xf32, #tpu.memory_space<vmem>>, vector<2x32xf32>,
    %c38_354 = arith.constant 38 : index
    %c0_355 = arith.constant 0 : index
    %231 = vector.load %arg15[%c38_354, %c0_355] : memref<128x128xf32, #tpu.memory_space<vmem>>, vector<2x32xf32>
    %c0_356 = arith.constant 0 : index
    %c352 = arith.constant 352 : index
    %232 = vector.load %arg16[%c0_356, %c352] : memref<24x512xf32, #tpu.memory_space<vmem>>, vector<2x32xf32>
    tpu.vector_store %arg16[%c0_356, %c352], %231 {strides = array<i32>} : memref<24x512xf32, #tpu.memory_space<vmem>>, vector<2x32xf32>,
    %c42_357 = arith.constant 42 : index
    %c0_358 = arith.constant 0 : index
    %233 = vector.load %arg15[%c42_357, %c0_358] : memref<128x128xf32, #tpu.memory_space<vmem>>, vector<2x32xf32>
    %c2_359 = arith.constant 2 : index
    %c352_360 = arith.constant 352 : index
    %234 = vector.load %arg16[%c2_359, %c352_360] : memref<24x512xf32, #tpu.memory_space<vmem>>, vector<2x32xf32>
    tpu.vector_store %arg16[%c2_359, %c352_360], %233 {strides = array<i32>} : memref<24x512xf32, #tpu.memory_space<vmem>>, vector<2x32xf32>,
    %c46_361 = arith.constant 46 : index
    %c0_362 = arith.constant 0 : index
    %235 = vector.load %arg15[%c46_361, %c0_362] : memref<128x128xf32, #tpu.memory_space<vmem>>, vector<2x32xf32>
    %c4_363 = arith.constant 4 : index
    %c352_364 = arith.constant 352 : index
    %236 = vector.load %arg16[%c4_363, %c352_364] : memref<24x512xf32, #tpu.memory_space<vmem>>, vector<2x32xf32>
    tpu.vector_store %arg16[%c4_363, %c352_364], %235 {strides = array<i32>} : memref<24x512xf32, #tpu.memory_space<vmem>>, vector<2x32xf32>,
    %c70_365 = arith.constant 70 : index
    %c0_366 = arith.constant 0 : index
    %237 = vector.load %arg15[%c70_365, %c0_366] : memref<128x128xf32, #tpu.memory_space<vmem>>, vector<2x32xf32>
    %c6_367 = arith.constant 6 : index
    %c352_368 = arith.constant 352 : index
    %238 = vector.load %arg16[%c6_367, %c352_368] : memref<24x512xf32, #tpu.memory_space<vmem>>, vector<2x32xf32>
    tpu.vector_store %arg16[%c6_367, %c352_368], %237 {strides = array<i32>} : memref<24x512xf32, #tpu.memory_space<vmem>>, vector<2x32xf32>,
    %c74_369 = arith.constant 74 : index
    %c0_370 = arith.constant 0 : index
    %239 = vector.load %arg15[%c74_369, %c0_370] : memref<128x128xf32, #tpu.memory_space<vmem>>, vector<2x32xf32>
    %c8_371 = arith.constant 8 : index
    %c352_372 = arith.constant 352 : index
    %240 = vector.load %arg16[%c8_371, %c352_372] : memref<24x512xf32, #tpu.memory_space<vmem>>, vector<2x32xf32>
    tpu.vector_store %arg16[%c8_371, %c352_372], %239 {strides = array<i32>} : memref<24x512xf32, #tpu.memory_space<vmem>>, vector<2x32xf32>,
    %c78_373 = arith.constant 78 : index
    %c0_374 = arith.constant 0 : index
    %241 = vector.load %arg15[%c78_373, %c0_374] : memref<128x128xf32, #tpu.memory_space<vmem>>, vector<2x32xf32>
    %c10_375 = arith.constant 10 : index
    %c352_376 = arith.constant 352 : index
    %242 = vector.load %arg16[%c10_375, %c352_376] : memref<24x512xf32, #tpu.memory_space<vmem>>, vector<2x32xf32>
    tpu.vector_store %arg16[%c10_375, %c352_376], %241 {strides = array<i32>} : memref<24x512xf32, #tpu.memory_space<vmem>>, vector<2x32xf32>,
    %c102_377 = arith.constant 102 : index
    %c0_378 = arith.constant 0 : index
    %243 = vector.load %arg15[%c102_377, %c0_378] : memref<128x128xf32, #tpu.memory_space<vmem>>, vector<2x32xf32>
    %c12_379 = arith.constant 12 : index
    %c352_380 = arith.constant 352 : index
    %244 = vector.load %arg16[%c12_379, %c352_380] : memref<24x512xf32, #tpu.memory_space<vmem>>, vector<2x32xf32>
    tpu.vector_store %arg16[%c12_379, %c352_380], %243 {strides = array<i32>} : memref<24x512xf32, #tpu.memory_space<vmem>>, vector<2x32xf32>,
    %c106_381 = arith.constant 106 : index
    %c0_382 = arith.constant 0 : index
    %245 = vector.load %arg15[%c106_381, %c0_382] : memref<128x128xf32, #tpu.memory_space<vmem>>, vector<2x32xf32>
    %c14_383 = arith.constant 14 : index
    %c352_384 = arith.constant 352 : index
    %246 = vector.load %arg16[%c14_383, %c352_384] : memref<24x512xf32, #tpu.memory_space<vmem>>, vector<2x32xf32>
    tpu.vector_store %arg16[%c14_383, %c352_384], %245 {strides = array<i32>} : memref<24x512xf32, #tpu.memory_space<vmem>>, vector<2x32xf32>,
    %c110 = arith.constant 110 : index
    %c0_385 = arith.constant 0 : index
    %247 = vector.load %arg15[%c110, %c0_385] : memref<128x128xf32, #tpu.memory_space<vmem>>, vector<2x32xf32>
    %c16_386 = arith.constant 16 : index
    %c352_387 = arith.constant 352 : index
    %248 = vector.load %arg16[%c16_386, %c352_387] : memref<24x512xf32, #tpu.memory_space<vmem>>, vector<2x32xf32>
    tpu.vector_store %arg16[%c16_386, %c352_387], %247 {strides = array<i32>} : memref<24x512xf32, #tpu.memory_space<vmem>>, vector<2x32xf32>,
    %c48_388 = arith.constant 48 : index
    %c0_389 = arith.constant 0 : index
    %249 = vector.load %arg15[%c48_388, %c0_389] : memref<128x128xf32, #tpu.memory_space<vmem>>, vector<2x32xf32>
    %c0_390 = arith.constant 0 : index
    %c384 = arith.constant 384 : index
    %250 = vector.load %arg16[%c0_390, %c384] : memref<24x512xf32, #tpu.memory_space<vmem>>, vector<2x32xf32>
    tpu.vector_store %arg16[%c0_390, %c384], %249 {strides = array<i32>} : memref<24x512xf32, #tpu.memory_space<vmem>>, vector<2x32xf32>,
    %c52_391 = arith.constant 52 : index
    %c0_392 = arith.constant 0 : index
    %251 = vector.load %arg15[%c52_391, %c0_392] : memref<128x128xf32, #tpu.memory_space<vmem>>, vector<2x32xf32>
    %c2_393 = arith.constant 2 : index
    %c384_394 = arith.constant 384 : index
    %252 = vector.load %arg16[%c2_393, %c384_394] : memref<24x512xf32, #tpu.memory_space<vmem>>, vector<2x32xf32>
    tpu.vector_store %arg16[%c2_393, %c384_394], %251 {strides = array<i32>} : memref<24x512xf32, #tpu.memory_space<vmem>>, vector<2x32xf32>,
    %c56_395 = arith.constant 56 : index
    %c0_396 = arith.constant 0 : index
    %253 = vector.load %arg15[%c56_395, %c0_396] : memref<128x128xf32, #tpu.memory_space<vmem>>, vector<2x32xf32>
    %c4_397 = arith.constant 4 : index
    %c384_398 = arith.constant 384 : index
    %254 = vector.load %arg16[%c4_397, %c384_398] : memref<24x512xf32, #tpu.memory_space<vmem>>, vector<2x32xf32>
    tpu.vector_store %arg16[%c4_397, %c384_398], %253 {strides = array<i32>} : memref<24x512xf32, #tpu.memory_space<vmem>>, vector<2x32xf32>,
    %c80_399 = arith.constant 80 : index
    %c0_400 = arith.constant 0 : index
    %255 = vector.load %arg15[%c80_399, %c0_400] : memref<128x128xf32, #tpu.memory_space<vmem>>, vector<2x32xf32>
    %c6_401 = arith.constant 6 : index
    %c384_402 = arith.constant 384 : index
    %256 = vector.load %arg16[%c6_401, %c384_402] : memref<24x512xf32, #tpu.memory_space<vmem>>, vector<2x32xf32>
    tpu.vector_store %arg16[%c6_401, %c384_402], %255 {strides = array<i32>} : memref<24x512xf32, #tpu.memory_space<vmem>>, vector<2x32xf32>,
    %c84_403 = arith.constant 84 : index
    %c0_404 = arith.constant 0 : index
    %257 = vector.load %arg15[%c84_403, %c0_404] : memref<128x128xf32, #tpu.memory_space<vmem>>, vector<2x32xf32>
    %c8_405 = arith.constant 8 : index
    %c384_406 = arith.constant 384 : index
    %258 = vector.load %arg16[%c8_405, %c384_406] : memref<24x512xf32, #tpu.memory_space<vmem>>, vector<2x32xf32>
    tpu.vector_store %arg16[%c8_405, %c384_406], %257 {strides = array<i32>} : memref<24x512xf32, #tpu.memory_space<vmem>>, vector<2x32xf32>,
    %c88_407 = arith.constant 88 : index
    %c0_408 = arith.constant 0 : index
    %259 = vector.load %arg15[%c88_407, %c0_408] : memref<128x128xf32, #tpu.memory_space<vmem>>, vector<2x32xf32>
    %c10_409 = arith.constant 10 : index
    %c384_410 = arith.constant 384 : index
    %260 = vector.load %arg16[%c10_409, %c384_410] : memref<24x512xf32, #tpu.memory_space<vmem>>, vector<2x32xf32>
    tpu.vector_store %arg16[%c10_409, %c384_410], %259 {strides = array<i32>} : memref<24x512xf32, #tpu.memory_space<vmem>>, vector<2x32xf32>,
    %c112 = arith.constant 112 : index
    %c0_411 = arith.constant 0 : index
    %261 = vector.load %arg15[%c112, %c0_411] : memref<128x128xf32, #tpu.memory_space<vmem>>, vector<2x32xf32>
    %c12_412 = arith.constant 12 : index
    %c384_413 = arith.constant 384 : index
    %262 = vector.load %arg16[%c12_412, %c384_413] : memref<24x512xf32, #tpu.memory_space<vmem>>, vector<2x32xf32>
    tpu.vector_store %arg16[%c12_412, %c384_413], %261 {strides = array<i32>} : memref<24x512xf32, #tpu.memory_space<vmem>>, vector<2x32xf32>,
    %c116 = arith.constant 116 : index
    %c0_414 = arith.constant 0 : index
    %263 = vector.load %arg15[%c116, %c0_414] : memref<128x128xf32, #tpu.memory_space<vmem>>, vector<2x32xf32>
    %c14_415 = arith.constant 14 : index
    %c384_416 = arith.constant 384 : index
    %264 = vector.load %arg16[%c14_415, %c384_416] : memref<24x512xf32, #tpu.memory_space<vmem>>, vector<2x32xf32>
    tpu.vector_store %arg16[%c14_415, %c384_416], %263 {strides = array<i32>} : memref<24x512xf32, #tpu.memory_space<vmem>>, vector<2x32xf32>,
    %c120 = arith.constant 120 : index
    %c0_417 = arith.constant 0 : index
    %265 = vector.load %arg15[%c120, %c0_417] : memref<128x128xf32, #tpu.memory_space<vmem>>, vector<2x32xf32>
    %c16_418 = arith.constant 16 : index
    %c384_419 = arith.constant 384 : index
    %266 = vector.load %arg16[%c16_418, %c384_419] : memref<24x512xf32, #tpu.memory_space<vmem>>, vector<2x32xf32>
    tpu.vector_store %arg16[%c16_418, %c384_419], %265 {strides = array<i32>} : memref<24x512xf32, #tpu.memory_space<vmem>>, vector<2x32xf32>,
    %c50_420 = arith.constant 50 : index
    %c0_421 = arith.constant 0 : index
    %267 = vector.load %arg15[%c50_420, %c0_421] : memref<128x128xf32, #tpu.memory_space<vmem>>, vector<2x32xf32>
    %c0_422 = arith.constant 0 : index
    %c416 = arith.constant 416 : index
    %268 = vector.load %arg16[%c0_422, %c416] : memref<24x512xf32, #tpu.memory_space<vmem>>, vector<2x32xf32>
    tpu.vector_store %arg16[%c0_422, %c416], %267 {strides = array<i32>} : memref<24x512xf32, #tpu.memory_space<vmem>>, vector<2x32xf32>,
    %c54_423 = arith.constant 54 : index
    %c0_424 = arith.constant 0 : index
    %269 = vector.load %arg15[%c54_423, %c0_424] : memref<128x128xf32, #tpu.memory_space<vmem>>, vector<2x32xf32>
    %c2_425 = arith.constant 2 : index
    %c416_426 = arith.constant 416 : index
    %270 = vector.load %arg16[%c2_425, %c416_426] : memref<24x512xf32, #tpu.memory_space<vmem>>, vector<2x32xf32>
    tpu.vector_store %arg16[%c2_425, %c416_426], %269 {strides = array<i32>} : memref<24x512xf32, #tpu.memory_space<vmem>>, vector<2x32xf32>,
    %c58_427 = arith.constant 58 : index
    %c0_428 = arith.constant 0 : index
    %271 = vector.load %arg15[%c58_427, %c0_428] : memref<128x128xf32, #tpu.memory_space<vmem>>, vector<2x32xf32>
    %c4_429 = arith.constant 4 : index
    %c416_430 = arith.constant 416 : index
    %272 = vector.load %arg16[%c4_429, %c416_430] : memref<24x512xf32, #tpu.memory_space<vmem>>, vector<2x32xf32>
    tpu.vector_store %arg16[%c4_429, %c416_430], %271 {strides = array<i32>} : memref<24x512xf32, #tpu.memory_space<vmem>>, vector<2x32xf32>,
    %c82_431 = arith.constant 82 : index
    %c0_432 = arith.constant 0 : index
    %273 = vector.load %arg15[%c82_431, %c0_432] : memref<128x128xf32, #tpu.memory_space<vmem>>, vector<2x32xf32>
    %c6_433 = arith.constant 6 : index
    %c416_434 = arith.constant 416 : index
    %274 = vector.load %arg16[%c6_433, %c416_434] : memref<24x512xf32, #tpu.memory_space<vmem>>, vector<2x32xf32>
    tpu.vector_store %arg16[%c6_433, %c416_434], %273 {strides = array<i32>} : memref<24x512xf32, #tpu.memory_space<vmem>>, vector<2x32xf32>,
    %c86_435 = arith.constant 86 : index
    %c0_436 = arith.constant 0 : index
    %275 = vector.load %arg15[%c86_435, %c0_436] : memref<128x128xf32, #tpu.memory_space<vmem>>, vector<2x32xf32>
    %c8_437 = arith.constant 8 : index
    %c416_438 = arith.constant 416 : index
    %276 = vector.load %arg16[%c8_437, %c416_438] : memref<24x512xf32, #tpu.memory_space<vmem>>, vector<2x32xf32>
    tpu.vector_store %arg16[%c8_437, %c416_438], %275 {strides = array<i32>} : memref<24x512xf32, #tpu.memory_space<vmem>>, vector<2x32xf32>,
    %c90_439 = arith.constant 90 : index
    %c0_440 = arith.constant 0 : index
    %277 = vector.load %arg15[%c90_439, %c0_440] : memref<128x128xf32, #tpu.memory_space<vmem>>, vector<2x32xf32>
    %c10_441 = arith.constant 10 : index
    %c416_442 = arith.constant 416 : index
    %278 = vector.load %arg16[%c10_441, %c416_442] : memref<24x512xf32, #tpu.memory_space<vmem>>, vector<2x32xf32>
    tpu.vector_store %arg16[%c10_441, %c416_442], %277 {strides = array<i32>} : memref<24x512xf32, #tpu.memory_space<vmem>>, vector<2x32xf32>,
    %c114 = arith.constant 114 : index
    %c0_443 = arith.constant 0 : index
    %279 = vector.load %arg15[%c114, %c0_443] : memref<128x128xf32, #tpu.memory_space<vmem>>, vector<2x32xf32>
    %c12_444 = arith.constant 12 : index
    %c416_445 = arith.constant 416 : index
    %280 = vector.load %arg16[%c12_444, %c416_445] : memref<24x512xf32, #tpu.memory_space<vmem>>, vector<2x32xf32>
    tpu.vector_store %arg16[%c12_444, %c416_445], %279 {strides = array<i32>} : memref<24x512xf32, #tpu.memory_space<vmem>>, vector<2x32xf32>,
    %c118 = arith.constant 118 : index
    %c0_446 = arith.constant 0 : index
    %281 = vector.load %arg15[%c118, %c0_446] : memref<128x128xf32, #tpu.memory_space<vmem>>, vector<2x32xf32>
    %c14_447 = arith.constant 14 : index
    %c416_448 = arith.constant 416 : index
    %282 = vector.load %arg16[%c14_447, %c416_448] : memref<24x512xf32, #tpu.memory_space<vmem>>, vector<2x32xf32>
    tpu.vector_store %arg16[%c14_447, %c416_448], %281 {strides = array<i32>} : memref<24x512xf32, #tpu.memory_space<vmem>>, vector<2x32xf32>,
    %c122 = arith.constant 122 : index
    %c0_449 = arith.constant 0 : index
    %283 = vector.load %arg15[%c122, %c0_449] : memref<128x128xf32, #tpu.memory_space<vmem>>, vector<2x32xf32>
    %c16_450 = arith.constant 16 : index
    %c416_451 = arith.constant 416 : index
    %284 = vector.load %arg16[%c16_450, %c416_451] : memref<24x512xf32, #tpu.memory_space<vmem>>, vector<2x32xf32>
    tpu.vector_store %arg16[%c16_450, %c416_451], %283 {strides = array<i32>} : memref<24x512xf32, #tpu.memory_space<vmem>>, vector<2x32xf32>,
    %c52_452 = arith.constant 52 : index
    %c0_453 = arith.constant 0 : index
    %285 = vector.load %arg15[%c52_452, %c0_453] : memref<128x128xf32, #tpu.memory_space<vmem>>, vector<2x32xf32>
    %c0_454 = arith.constant 0 : index
    %c448 = arith.constant 448 : index
    %286 = vector.load %arg16[%c0_454, %c448] : memref<24x512xf32, #tpu.memory_space<vmem>>, vector<2x32xf32>
    tpu.vector_store %arg16[%c0_454, %c448], %285 {strides = array<i32>} : memref<24x512xf32, #tpu.memory_space<vmem>>, vector<2x32xf32>,
    %c56_455 = arith.constant 56 : index
    %c0_456 = arith.constant 0 : index
    %287 = vector.load %arg15[%c56_455, %c0_456] : memref<128x128xf32, #tpu.memory_space<vmem>>, vector<2x32xf32>
    %c2_457 = arith.constant 2 : index
    %c448_458 = arith.constant 448 : index
    %288 = vector.load %arg16[%c2_457, %c448_458] : memref<24x512xf32, #tpu.memory_space<vmem>>, vector<2x32xf32>
    tpu.vector_store %arg16[%c2_457, %c448_458], %287 {strides = array<i32>} : memref<24x512xf32, #tpu.memory_space<vmem>>, vector<2x32xf32>,
    %c60_459 = arith.constant 60 : index
    %c0_460 = arith.constant 0 : index
    %289 = vector.load %arg15[%c60_459, %c0_460] : memref<128x128xf32, #tpu.memory_space<vmem>>, vector<2x32xf32>
    %c4_461 = arith.constant 4 : index
    %c448_462 = arith.constant 448 : index
    %290 = vector.load %arg16[%c4_461, %c448_462] : memref<24x512xf32, #tpu.memory_space<vmem>>, vector<2x32xf32>
    tpu.vector_store %arg16[%c4_461, %c448_462], %289 {strides = array<i32>} : memref<24x512xf32, #tpu.memory_space<vmem>>, vector<2x32xf32>,
    %c84_463 = arith.constant 84 : index
    %c0_464 = arith.constant 0 : index
    %291 = vector.load %arg15[%c84_463, %c0_464] : memref<128x128xf32, #tpu.memory_space<vmem>>, vector<2x32xf32>
    %c6_465 = arith.constant 6 : index
    %c448_466 = arith.constant 448 : index
    %292 = vector.load %arg16[%c6_465, %c448_466] : memref<24x512xf32, #tpu.memory_space<vmem>>, vector<2x32xf32>
    tpu.vector_store %arg16[%c6_465, %c448_466], %291 {strides = array<i32>} : memref<24x512xf32, #tpu.memory_space<vmem>>, vector<2x32xf32>,
    %c88_467 = arith.constant 88 : index
    %c0_468 = arith.constant 0 : index
    %293 = vector.load %arg15[%c88_467, %c0_468] : memref<128x128xf32, #tpu.memory_space<vmem>>, vector<2x32xf32>
    %c8_469 = arith.constant 8 : index
    %c448_470 = arith.constant 448 : index
    %294 = vector.load %arg16[%c8_469, %c448_470] : memref<24x512xf32, #tpu.memory_space<vmem>>, vector<2x32xf32>
    tpu.vector_store %arg16[%c8_469, %c448_470], %293 {strides = array<i32>} : memref<24x512xf32, #tpu.memory_space<vmem>>, vector<2x32xf32>,
    %c92_471 = arith.constant 92 : index
    %c0_472 = arith.constant 0 : index
    %295 = vector.load %arg15[%c92_471, %c0_472] : memref<128x128xf32, #tpu.memory_space<vmem>>, vector<2x32xf32>
    %c10_473 = arith.constant 10 : index
    %c448_474 = arith.constant 448 : index
    %296 = vector.load %arg16[%c10_473, %c448_474] : memref<24x512xf32, #tpu.memory_space<vmem>>, vector<2x32xf32>
    tpu.vector_store %arg16[%c10_473, %c448_474], %295 {strides = array<i32>} : memref<24x512xf32, #tpu.memory_space<vmem>>, vector<2x32xf32>,
    %c116_475 = arith.constant 116 : index
    %c0_476 = arith.constant 0 : index
    %297 = vector.load %arg15[%c116_475, %c0_476] : memref<128x128xf32, #tpu.memory_space<vmem>>, vector<2x32xf32>
    %c12_477 = arith.constant 12 : index
    %c448_478 = arith.constant 448 : index
    %298 = vector.load %arg16[%c12_477, %c448_478] : memref<24x512xf32, #tpu.memory_space<vmem>>, vector<2x32xf32>
    tpu.vector_store %arg16[%c12_477, %c448_478], %297 {strides = array<i32>} : memref<24x512xf32, #tpu.memory_space<vmem>>, vector<2x32xf32>,
    %c120_479 = arith.constant 120 : index
    %c0_480 = arith.constant 0 : index
    %299 = vector.load %arg15[%c120_479, %c0_480] : memref<128x128xf32, #tpu.memory_space<vmem>>, vector<2x32xf32>
    %c14_481 = arith.constant 14 : index
    %c448_482 = arith.constant 448 : index
    %300 = vector.load %arg16[%c14_481, %c448_482] : memref<24x512xf32, #tpu.memory_space<vmem>>, vector<2x32xf32>
    tpu.vector_store %arg16[%c14_481, %c448_482], %299 {strides = array<i32>} : memref<24x512xf32, #tpu.memory_space<vmem>>, vector<2x32xf32>,
    %c124 = arith.constant 124 : index
    %c0_483 = arith.constant 0 : index
    %301 = vector.load %arg15[%c124, %c0_483] : memref<128x128xf32, #tpu.memory_space<vmem>>, vector<2x32xf32>
    %c16_484 = arith.constant 16 : index
    %c448_485 = arith.constant 448 : index
    %302 = vector.load %arg16[%c16_484, %c448_485] : memref<24x512xf32, #tpu.memory_space<vmem>>, vector<2x32xf32>
    tpu.vector_store %arg16[%c16_484, %c448_485], %301 {strides = array<i32>} : memref<24x512xf32, #tpu.memory_space<vmem>>, vector<2x32xf32>,
    %c54_486 = arith.constant 54 : index
    %c0_487 = arith.constant 0 : index
    %303 = vector.load %arg15[%c54_486, %c0_487] : memref<128x128xf32, #tpu.memory_space<vmem>>, vector<2x32xf32>
    %c0_488 = arith.constant 0 : index
    %c480 = arith.constant 480 : index
    %304 = vector.load %arg16[%c0_488, %c480] : memref<24x512xf32, #tpu.memory_space<vmem>>, vector<2x32xf32>
    tpu.vector_store %arg16[%c0_488, %c480], %303 {strides = array<i32>} : memref<24x512xf32, #tpu.memory_space<vmem>>, vector<2x32xf32>,
    %c58_489 = arith.constant 58 : index
    %c0_490 = arith.constant 0 : index
    %305 = vector.load %arg15[%c58_489, %c0_490] : memref<128x128xf32, #tpu.memory_space<vmem>>, vector<2x32xf32>
    %c2_491 = arith.constant 2 : index
    %c480_492 = arith.constant 480 : index
    %306 = vector.load %arg16[%c2_491, %c480_492] : memref<24x512xf32, #tpu.memory_space<vmem>>, vector<2x32xf32>
    tpu.vector_store %arg16[%c2_491, %c480_492], %305 {strides = array<i32>} : memref<24x512xf32, #tpu.memory_space<vmem>>, vector<2x32xf32>,
    %c62_493 = arith.constant 62 : index
    %c0_494 = arith.constant 0 : index
    %307 = vector.load %arg15[%c62_493, %c0_494] : memref<128x128xf32, #tpu.memory_space<vmem>>, vector<2x32xf32>
    %c4_495 = arith.constant 4 : index
    %c480_496 = arith.constant 480 : index
    %308 = vector.load %arg16[%c4_495, %c480_496] : memref<24x512xf32, #tpu.memory_space<vmem>>, vector<2x32xf32>
    tpu.vector_store %arg16[%c4_495, %c480_496], %307 {strides = array<i32>} : memref<24x512xf32, #tpu.memory_space<vmem>>, vector<2x32xf32>,
    %c86_497 = arith.constant 86 : index
    %c0_498 = arith.constant 0 : index
    %309 = vector.load %arg15[%c86_497, %c0_498] : memref<128x128xf32, #tpu.memory_space<vmem>>, vector<2x32xf32>
    %c6_499 = arith.constant 6 : index
    %c480_500 = arith.constant 480 : index
    %310 = vector.load %arg16[%c6_499, %c480_500] : memref<24x512xf32, #tpu.memory_space<vmem>>, vector<2x32xf32>
    tpu.vector_store %arg16[%c6_499, %c480_500], %309 {strides = array<i32>} : memref<24x512xf32, #tpu.memory_space<vmem>>, vector<2x32xf32>,
    %c90_501 = arith.constant 90 : index
    %c0_502 = arith.constant 0 : index
    %311 = vector.load %arg15[%c90_501, %c0_502] : memref<128x128xf32, #tpu.memory_space<vmem>>, vector<2x32xf32>
    %c8_503 = arith.constant 8 : index
    %c480_504 = arith.constant 480 : index
    %312 = vector.load %arg16[%c8_503, %c480_504] : memref<24x512xf32, #tpu.memory_space<vmem>>, vector<2x32xf32>
    tpu.vector_store %arg16[%c8_503, %c480_504], %311 {strides = array<i32>} : memref<24x512xf32, #tpu.memory_space<vmem>>, vector<2x32xf32>,
    %c94_505 = arith.constant 94 : index
    %c0_506 = arith.constant 0 : index
    %313 = vector.load %arg15[%c94_505, %c0_506] : memref<128x128xf32, #tpu.memory_space<vmem>>, vector<2x32xf32>
    %c10_507 = arith.constant 10 : index
    %c480_508 = arith.constant 480 : index
    %314 = vector.load %arg16[%c10_507, %c480_508] : memref<24x512xf32, #tpu.memory_space<vmem>>, vector<2x32xf32>
    tpu.vector_store %arg16[%c10_507, %c480_508], %313 {strides = array<i32>} : memref<24x512xf32, #tpu.memory_space<vmem>>, vector<2x32xf32>,
    %c118_509 = arith.constant 118 : index
    %c0_510 = arith.constant 0 : index
    %315 = vector.load %arg15[%c118_509, %c0_510] : memref<128x128xf32, #tpu.memory_space<vmem>>, vector<2x32xf32>
    %c12_511 = arith.constant 12 : index
    %c480_512 = arith.constant 480 : index
    %316 = vector.load %arg16[%c12_511, %c480_512] : memref<24x512xf32, #tpu.memory_space<vmem>>, vector<2x32xf32>
    tpu.vector_store %arg16[%c12_511, %c480_512], %315 {strides = array<i32>} : memref<24x512xf32, #tpu.memory_space<vmem>>, vector<2x32xf32>,
    %c122_513 = arith.constant 122 : index
    %c0_514 = arith.constant 0 : index
    %317 = vector.load %arg15[%c122_513, %c0_514] : memref<128x128xf32, #tpu.memory_space<vmem>>, vector<2x32xf32>
    %c14_515 = arith.constant 14 : index
    %c480_516 = arith.constant 480 : index
    %318 = vector.load %arg16[%c14_515, %c480_516] : memref<24x512xf32, #tpu.memory_space<vmem>>, vector<2x32xf32>
    tpu.vector_store %arg16[%c14_515, %c480_516], %317 {strides = array<i32>} : memref<24x512xf32, #tpu.memory_space<vmem>>, vector<2x32xf32>,
    %c126 = arith.constant 126 : index
    %c0_517 = arith.constant 0 : index
    %319 = vector.load %arg15[%c126, %c0_517] : memref<128x128xf32, #tpu.memory_space<vmem>>, vector<2x32xf32>
    %c16_518 = arith.constant 16 : index
    %c480_519 = arith.constant 480 : index
    %320 = vector.load %arg16[%c16_518, %c480_519] : memref<24x512xf32, #tpu.memory_space<vmem>>, vector<2x32xf32>
    tpu.vector_store %arg16[%c16_518, %c480_519], %319 {strides = array<i32>} : memref<24x512xf32, #tpu.memory_space<vmem>>, vector<2x32xf32>,
    %c0_520 = arith.constant 0 : index
    %c0_521 = arith.constant 0 : index
    %321 = vector.load %arg16[%c0_520, %c0_521] : memref<24x512xf32, #tpu.memory_space<vmem>>, vector<24x512xf32>
    %322 = arith.truncf %321 : vector<24x512xf32> to vector<24x512xbf16>
    %c0_522 = arith.constant 0 : index
    %c0_523 = arith.constant 0 : index
    %323 = vector.load %arg4[%c0_522, %c0_523] : memref<512x128xbf16, #tpu.memory_space<vmem>>, vector<512x128xbf16>
    %cst_524 = arith.constant dense<0.000000e+00> : vector<24x128xf32>
    %324 = tpu.matmul %322, %323, %cst_524 {dimension_numbers = #tpu.dot_dimension_numbers<[1], [0], [0], [1], [0, 0, 1, 1], [], []>} : vector<24x512xbf16>, vector<512x128xbf16>, vector<24x128xf32> -> vector<24x128xf32>
    %c0_525 = arith.constant 0 : index
    %c0_526 = arith.constant 0 : index
    %325 = vector.load %arg5[%c0_525, %c0_526] : memref<1x128xf32, #tpu.memory_space<vmem>>, vector<1x128xf32>
    %c0_527 = arith.constant 0 : index
    %c0_528 = arith.constant 0 : index
    %326 = vector.load %arg6[%c0_527, %c0_528] : memref<1x128xf32, #tpu.memory_space<vmem>>, vector<1x128xf32>
    %cst_529 = arith.constant dense<0.000000e+00> : vector<128xf32>
    %327 = vector.multi_reduction <add>, %324, %cst_529 [0] : vector<24x128xf32> to vector<128xf32>
    %328 = vector.shape_cast %327 : vector<128xf32> to vector<1x128xf32>
    %cst_530 = arith.constant 0.055555556 : f32
    %329 = vector.broadcast %cst_530 : f32 to vector<1x128xf32>
    %330 = arith.mulf %328, %329 : vector<1x128xf32>
    %331 = arith.mulf %324, %324 : vector<24x128xf32>
    %cst_531 = arith.constant dense<0.000000e+00> : vector<128xf32>
    %332 = vector.multi_reduction <add>, %331, %cst_531 [0] : vector<24x128xf32> to vector<128xf32>
    %333 = vector.shape_cast %332 : vector<128xf32> to vector<1x128xf32>
    %cst_532 = arith.constant 0.055555556 : f32
    %334 = vector.broadcast %cst_532 : f32 to vector<1x128xf32>
    %335 = arith.mulf %333, %334 : vector<1x128xf32>
    %336 = arith.mulf %330, %330 : vector<1x128xf32>
    %337 = arith.subf %335, %336 : vector<1x128xf32>
    %cst_533 = arith.constant 0.000000e+00 : f32
    %338 = vector.broadcast %cst_533 : f32 to vector<1x128xf32>
    %339 = arith.maximumf %337, %338 : vector<1x128xf32>
    %cst_534 = arith.constant 9.99999974E-6 : f32
    %340 = vector.broadcast %cst_534 : f32 to vector<1x128xf32>
    %341 = arith.addf %339, %340 : vector<1x128xf32>
    %342 = math.rsqrt %341 : vector<1x128xf32>
    %343 = arith.mulf %325, %342 : vector<1x128xf32>
    %344 = arith.mulf %330, %343 : vector<1x128xf32>
    %345 = arith.subf %326, %344 : vector<1x128xf32>
    %346 = vector.broadcast %343 : vector<1x128xf32> to vector<24x128xf32>
    %347 = arith.mulf %324, %346 : vector<24x128xf32>
    %348 = vector.broadcast %345 : vector<1x128xf32> to vector<24x128xf32>
    %349 = arith.addf %347, %348 : vector<24x128xf32>
    %cst_535 = arith.constant 0.000000e+00 : f32
    %350 = vector.broadcast %cst_535 : f32 to vector<24x128xf32>
    %351 = arith.maximumf %349, %350 : vector<24x128xf32>
    %cst_536 = arith.constant 0.000000e+00 : f32
    %352 = vector.broadcast %cst_536 : f32 to vector<2x640xf32>
    %c0_537 = arith.constant 0 : index
    %c0_538 = arith.constant 0 : index
    %353 = vector.load %arg17[%c0_537, %c0_538] : memref<2x640xf32, #tpu.memory_space<vmem>>, vector<2x640xf32>
    tpu.vector_store %arg17[%c0_537, %c0_538], %352 {strides = array<i32>} : memref<2x640xf32, #tpu.memory_space<vmem>>, vector<2x640xf32>,
    %354 = vector.extract_strided_slice %351 {offsets = [0, 0], sizes = [2, 64], strides = [1, 1]} : vector<24x128xf32> to vector<2x64xf32>
    %c0_539 = arith.constant 0 : index
    %c0_540 = arith.constant 0 : index
    %355 = vector.load %arg17[%c0_539, %c0_540] : memref<2x640xf32, #tpu.memory_space<vmem>>, vector<2x64xf32>
    tpu.vector_store %arg17[%c0_539, %c0_540], %354 {strides = array<i32>} : memref<2x640xf32, #tpu.memory_space<vmem>>, vector<2x64xf32>,
    %356 = vector.extract_strided_slice %351 {offsets = [2, 0], sizes = [2, 64], strides = [1, 1]} : vector<24x128xf32> to vector<2x64xf32>
    %c0_541 = arith.constant 0 : index
    %c64_542 = arith.constant 64 : index
    %357 = vector.load %arg17[%c0_541, %c64_542] : memref<2x640xf32, #tpu.memory_space<vmem>>, vector<2x64xf32>
    tpu.vector_store %arg17[%c0_541, %c64_542], %356 {strides = array<i32>} : memref<2x640xf32, #tpu.memory_space<vmem>>, vector<2x64xf32>,
    %358 = vector.extract_strided_slice %351 {offsets = [4, 0], sizes = [2, 64], strides = [1, 1]} : vector<24x128xf32> to vector<2x64xf32>
    %c0_543 = arith.constant 0 : index
    %c128_544 = arith.constant 128 : index
    %359 = vector.load %arg17[%c0_543, %c128_544] : memref<2x640xf32, #tpu.memory_space<vmem>>, vector<2x64xf32>
    tpu.vector_store %arg17[%c0_543, %c128_544], %358 {strides = array<i32>} : memref<2x640xf32, #tpu.memory_space<vmem>>, vector<2x64xf32>,
    %360 = vector.extract_strided_slice %351 {offsets = [6, 0], sizes = [2, 64], strides = [1, 1]} : vector<24x128xf32> to vector<2x64xf32>
    %c0_545 = arith.constant 0 : index
    %c192_546 = arith.constant 192 : index
    %361 = vector.load %arg17[%c0_545, %c192_546] : memref<2x640xf32, #tpu.memory_space<vmem>>, vector<2x64xf32>
    tpu.vector_store %arg17[%c0_545, %c192_546], %360 {strides = array<i32>} : memref<2x640xf32, #tpu.memory_space<vmem>>, vector<2x64xf32>,
    %362 = vector.extract_strided_slice %351 {offsets = [8, 0], sizes = [2, 64], strides = [1, 1]} : vector<24x128xf32> to vector<2x64xf32>
    %c0_547 = arith.constant 0 : index
    %c256_548 = arith.constant 256 : index
    %363 = vector.load %arg17[%c0_547, %c256_548] : memref<2x640xf32, #tpu.memory_space<vmem>>, vector<2x64xf32>
    tpu.vector_store %arg17[%c0_547, %c256_548], %362 {strides = array<i32>} : memref<2x640xf32, #tpu.memory_space<vmem>>, vector<2x64xf32>,
    %364 = vector.extract_strided_slice %351 {offsets = [10, 0], sizes = [2, 64], strides = [1, 1]} : vector<24x128xf32> to vector<2x64xf32>
    %c0_549 = arith.constant 0 : index
    %c320_550 = arith.constant 320 : index
    %365 = vector.load %arg17[%c0_549, %c320_550] : memref<2x640xf32, #tpu.memory_space<vmem>>, vector<2x64xf32>
    tpu.vector_store %arg17[%c0_549, %c320_550], %364 {strides = array<i32>} : memref<2x640xf32, #tpu.memory_space<vmem>>, vector<2x64xf32>,
    %366 = vector.extract_strided_slice %351 {offsets = [12, 0], sizes = [2, 64], strides = [1, 1]} : vector<24x128xf32> to vector<2x64xf32>
    %c0_551 = arith.constant 0 : index
    %c384_552 = arith.constant 384 : index
    %367 = vector.load %arg17[%c0_551, %c384_552] : memref<2x640xf32, #tpu.memory_space<vmem>>, vector<2x64xf32>
    tpu.vector_store %arg17[%c0_551, %c384_552], %366 {strides = array<i32>} : memref<2x640xf32, #tpu.memory_space<vmem>>, vector<2x64xf32>,
    %368 = vector.extract_strided_slice %351 {offsets = [14, 0], sizes = [2, 64], strides = [1, 1]} : vector<24x128xf32> to vector<2x64xf32>
    %c0_553 = arith.constant 0 : index
    %c448_554 = arith.constant 448 : index
    %369 = vector.load %arg17[%c0_553, %c448_554] : memref<2x640xf32, #tpu.memory_space<vmem>>, vector<2x64xf32>
    tpu.vector_store %arg17[%c0_553, %c448_554], %368 {strides = array<i32>} : memref<2x640xf32, #tpu.memory_space<vmem>>, vector<2x64xf32>,
    %370 = vector.extract_strided_slice %351 {offsets = [16, 0], sizes = [2, 64], strides = [1, 1]} : vector<24x128xf32> to vector<2x64xf32>
    %c0_555 = arith.constant 0 : index
    %c512 = arith.constant 512 : index
    %371 = vector.load %arg17[%c0_555, %c512] : memref<2x640xf32, #tpu.memory_space<vmem>>, vector<2x64xf32>
    tpu.vector_store %arg17[%c0_555, %c512], %370 {strides = array<i32>} : memref<2x640xf32, #tpu.memory_space<vmem>>, vector<2x64xf32>,
    %c0_556 = arith.constant 0 : index
    %c0_557 = arith.constant 0 : index
    %372 = vector.load %arg17[%c0_556, %c0_557] : memref<2x640xf32, #tpu.memory_space<vmem>>, vector<2x640xf32>
    %373 = arith.truncf %372 : vector<2x640xf32> to vector<2x640xbf16>
    %c0_558 = arith.constant 0 : index
    %c0_559 = arith.constant 0 : index
    %374 = vector.load %arg7[%c0_558, %c0_559] : memref<640x128xbf16, #tpu.memory_space<vmem>>, vector<640x128xbf16>
    %cst_560 = arith.constant dense<0.000000e+00> : vector<2x128xf32>
    %375 = tpu.matmul %373, %374, %cst_560 {dimension_numbers = #tpu.dot_dimension_numbers<[1], [0], [0], [1], [0, 0, 1, 1], [], []>} : vector<2x640xbf16>, vector<640x128xbf16>, vector<2x128xf32> -> vector<2x128xf32>
    %c0_561 = arith.constant 0 : index
    %c0_562 = arith.constant 0 : index
    %376 = vector.load %arg8[%c0_561, %c0_562] : memref<1x128xf32, #tpu.memory_space<vmem>>, vector<1x128xf32>
    %c0_563 = arith.constant 0 : index
    %c0_564 = arith.constant 0 : index
    %377 = vector.load %arg9[%c0_563, %c0_564] : memref<1x128xf32, #tpu.memory_space<vmem>>, vector<1x128xf32>
    %cst_565 = arith.constant dense<0.000000e+00> : vector<128xf32>
    %378 = vector.multi_reduction <add>, %375, %cst_565 [0] : vector<2x128xf32> to vector<128xf32>
    %379 = vector.shape_cast %378 : vector<128xf32> to vector<1x128xf32>
    %cst_566 = arith.constant 5.000000e-01 : f32
    %380 = vector.broadcast %cst_566 : f32 to vector<1x128xf32>
    %381 = arith.mulf %379, %380 : vector<1x128xf32>
    %382 = arith.mulf %375, %375 : vector<2x128xf32>
    %cst_567 = arith.constant dense<0.000000e+00> : vector<128xf32>
    %383 = vector.multi_reduction <add>, %382, %cst_567 [0] : vector<2x128xf32> to vector<128xf32>
    %384 = vector.shape_cast %383 : vector<128xf32> to vector<1x128xf32>
    %cst_568 = arith.constant 5.000000e-01 : f32
    %385 = vector.broadcast %cst_568 : f32 to vector<1x128xf32>
    %386 = arith.mulf %384, %385 : vector<1x128xf32>
    %387 = arith.mulf %381, %381 : vector<1x128xf32>
    %388 = arith.subf %386, %387 : vector<1x128xf32>
    %cst_569 = arith.constant 0.000000e+00 : f32
    %389 = vector.broadcast %cst_569 : f32 to vector<1x128xf32>
    %390 = arith.maximumf %388, %389 : vector<1x128xf32>
    %cst_570 = arith.constant 9.99999974E-6 : f32
    %391 = vector.broadcast %cst_570 : f32 to vector<1x128xf32>
    %392 = arith.addf %390, %391 : vector<1x128xf32>
    %393 = math.rsqrt %392 : vector<1x128xf32>
    %394 = arith.mulf %376, %393 : vector<1x128xf32>
    %395 = arith.mulf %381, %394 : vector<1x128xf32>
    %396 = arith.subf %377, %395 : vector<1x128xf32>
    %397 = vector.broadcast %394 : vector<1x128xf32> to vector<2x128xf32>
    %398 = arith.mulf %375, %397 : vector<2x128xf32>
    %399 = vector.broadcast %396 : vector<1x128xf32> to vector<2x128xf32>
    %400 = arith.addf %398, %399 : vector<2x128xf32>
    %cst_571 = arith.constant 0.000000e+00 : f32
    %401 = vector.broadcast %cst_571 : f32 to vector<2x128xf32>
    %402 = arith.maximumf %400, %401 : vector<2x128xf32>
    %403 = arith.truncf %402 : vector<2x128xf32> to vector<2x128xbf16>
    %c0_572 = arith.constant 0 : index
    %c0_573 = arith.constant 0 : index
    %404 = vector.load %arg10[%c0_572, %c0_573] : memref<128x512xbf16, #tpu.memory_space<vmem>>, vector<128x512xbf16>
    %cst_574 = arith.constant dense<0.000000e+00> : vector<2x512xf32>
    %405 = tpu.matmul %403, %404, %cst_574 {dimension_numbers = #tpu.dot_dimension_numbers<[1], [0], [0], [1], [0, 0, 1, 1], [], []>} : vector<2x128xbf16>, vector<128x512xbf16>, vector<2x512xf32> -> vector<2x512xf32>
    %c0_575 = arith.constant 0 : index
    %c0_576 = arith.constant 0 : index
    %406 = vector.load %arg11[%c0_575, %c0_576] : memref<1x512xf32, #tpu.memory_space<vmem>>, vector<1x512xf32>
    %407 = vector.broadcast %406 : vector<1x512xf32> to vector<2x512xf32>
    %408 = arith.addf %405, %407 : vector<2x512xf32>
    %cst_577 = arith.constant 0.000000e+00 : f32
    %409 = vector.broadcast %cst_577 : f32 to vector<2x512xf32>
    %410 = arith.maximumf %408, %409 : vector<2x512xf32>
    %411 = arith.truncf %410 : vector<2x512xf32> to vector<2x512xbf16>
    %c0_578 = arith.constant 0 : index
    %c0_579 = arith.constant 0 : index
    %412 = vector.load %arg12[%c0_578, %c0_579] : memref<512x128xbf16, #tpu.memory_space<vmem>>, vector<512x128xbf16>
    %cst_580 = arith.constant dense<0.000000e+00> : vector<2x128xf32>
    %413 = tpu.matmul %411, %412, %cst_580 {dimension_numbers = #tpu.dot_dimension_numbers<[1], [0], [0], [1], [0, 0, 1, 1], [], []>} : vector<2x512xbf16>, vector<512x128xbf16>, vector<2x128xf32> -> vector<2x128xf32>
    %c0_581 = arith.constant 0 : index
    %c0_582 = arith.constant 0 : index
    %414 = vector.load %arg13[%c0_581, %c0_582] : memref<1x128xf32, #tpu.memory_space<vmem>>, vector<1x128xf32>
    %415 = vector.broadcast %414 : vector<1x128xf32> to vector<2x128xf32>
    %416 = arith.addf %413, %415 : vector<2x128xf32>
    %c0_583 = arith.constant 0 : index
    %c0_584 = arith.constant 0 : index
    %417 = vector.load %arg14[%c0_583, %c0_584] : memref<2x128xf32, #tpu.memory_space<vmem>>, vector<2x128xf32>
    tpu.vector_store %arg14[%c0_583, %c0_584], %416 {strides = array<i32>} : memref<2x128xf32, #tpu.memory_space<vmem>>, vector<2x128xf32>,
    return
  }
}

</mosaic_0001>

<bundles_post_ra>
// kernel: dqnbn_forward.1
= control target key start
LH: loop header
LB: loop body
LE: loop exit
PB: predicated region body
PF: predicated region fallthrough
CT: control target
= control target key end

     0   :  { %s4727_s0 = inlined_call_operand.vmem [shape: bf16[128,256], index: 0, kind: input, shape index: {}]   ;;  %s4728_s1 = inlined_call_operand.vmem [shape: bf16[256,128], index: 1, kind: input, shape index: {}]   ;;  %s4729_s2 = inlined_call_operand.vmem [shape: f32[1,128], index: 2, kind: input, shape index: {}]   ;;  %s4730_s3 = inlined_call_operand.vmem [shape: f32[1,128], index: 3, kind: input, shape index: {}]   ;;  %s4731_s4 = inlined_call_operand.vmem [shape: bf16[512,128], index: 4, kind: input, shape index: {}]   ;;  %s4732_s5 = inlined_call_operand.vmem [shape: f32[1,128], index: 5, kind: input, shape index: {}]   ;;  %s4733_s6 = inlined_call_operand.vmem [shape: f32[1,128], index: 6, kind: input, shape index: {}]   ;;  %s4734_s7 = inlined_call_operand.vmem [shape: bf16[640,128], index: 7, kind: input, shape index: {}]   ;;  %s4735_s8 = inlined_call_operand.vmem [shape: f32[1,128], index: 8, kind: input, shape index: {}]   ;;  %s4736_s9 = inlined_call_operand.vmem [shape: f32[1,128], index: 9, kind: input, shape index: {}]   ;;  %s4737_s10 = inlined_call_operand.vmem [shape: bf16[128,512], index: 10, kind: input, shape index: {}]   ;;  %s4738_s11 = inlined_call_operand.vmem [shape: f32[1,512], index: 11, kind: input, shape index: {}]   ;;  %s4739_s12 = inlined_call_operand.vmem [shape: bf16[512,128], index: 12, kind: input, shape index: {}]   ;;  %s4740_s13 = inlined_call_operand.vmem [shape: f32[1,128], index: 13, kind: input, shape index: {}]   ;;  %s4741_s14 = inlined_call_operand.hbm [shape: f32[2,128], index: 14, kind: output, shape index: {}]  }
   0x1   :  { %v3494_v0 = vld [vmem:[%s4728_s1 + $0x40] sm:$0xff]   ;;  %v3496_v2 = vld [vmem:[%s4728_s1 + $0x48] sm:$0xff]   ;;  %v3498_v4 = vld [vmem:[%s4728_s1 + $0x50] sm:$0xff]  }
   0x2   :  { %v3495_v1 = vld [vmem:[%s4728_s1] sm:$0xff]   ;;  %3249 = vmatprep.subr.bf16.mxu0 %v3494_v0  ;;  %v3497_v3 = vld [vmem:[%s4728_s1 + $0x8] sm:$0xff]   ;;  %v3499_v5 = vld [vmem:[%s4728_s1 + $0x10] sm:$0xff]  }
   0x3   :  { %3250 = vmatpush3.bf16.msra.mxu0 %v3495_v1  ;;  %v3500_v6 = vld [vmem:[%s4728_s1 + $0x58] sm:$0xff]   ;;  %v3502_v8 = vld [vmem:[%s4728_s1 + $0x60] sm:$0xff]   ;;  %v3504_v10 = vld [vmem:[%s4728_s1 + $0x68] sm:$0xff]  }
   0x4   :  { %3251 = vmatprep.subr.bf16.mxu0 %v3496_v2  ;;  %v3501_v7 = vld [vmem:[%s4728_s1 + $0x18] sm:$0xff]   ;;  %v3503_v9 = vld [vmem:[%s4728_s1 + $0x20] sm:$0xff]   ;;  %v3505_v12 = vld [vmem:[%s4728_s1 + $0x28] sm:$0xff]  }
   0x5   :  { %v3512_v11 = vld [vmem:[%s4727_s0 + $0x4] ss:$8 sps:$4 sm:$0xff]   ;;  %v3506_v13 = vld [vmem:[%s4728_s1 + $0x70] sm:$0xff]   ;;  %v3508_v15 = vld [vmem:[%s4728_s1 + $0x78] sm:$0xff]  }
   0x6   :  { %305 = vmatprep.mubr.bf16.mxu0 %v3512_v11  ;;  %v3507_v14 = vld [vmem:[%s4728_s1 + $0x30] sm:$0xff]   ;;  %v3509_v16 = vld [vmem:[%s4728_s1 + $0x38] sm:$0xff]   ;;  %v3510_v17 = vld [vmem:[%s4727_s0] ss:$8 sps:$4 sm:$0xff]  }
   0x7   :  { %3252 = vmatpush3.bf16.msra.mxu0 %v3497_v3  ;;  %v3513_v18 = vld [vmem:[%s4727_s0 + $0x14] ss:$8 sps:$4 sm:$0xff]   ;;  %v3515_v19 = vld [vmem:[%s4727_s0 + $0x10] ss:$8 sps:$4 sm:$0xff]   ;;  %v3516_v20 = vld [vmem:[%s4727_s0 + $0x24] ss:$8 sps:$4 sm:$0xff]  }
   0x8   :  { %3253 = vmatprep.subr.bf16.mxu0 %v3498_v4  ;;  %v3518_v21 = vld [vmem:[%s4727_s0 + $0x20] ss:$8 sps:$4 sm:$0xff]   ;;  %v3519_v22 = vld [vmem:[%s4727_s0 + $0x34] ss:$8 sps:$4 sm:$0xff]   ;;  %v3521_v23 = vld [vmem:[%s4727_s0 + $0x30] ss:$8 sps:$4 sm:$0xff]  }
   0x9   :  { %v3522_v24 = vld [vmem:[%s4727_s0 + $0x44] ss:$8 sps:$4 sm:$0xff]   ;;  %v3524_v25 = vld [vmem:[%s4727_s0 + $0x40] ss:$8 sps:$4 sm:$0xff]   ;;  %v3525_v26 = vld [vmem:[%s4727_s0 + $0x54] ss:$8 sps:$4 sm:$0xff]  }
   0xa   :  { %v3527_v27 = vld [vmem:[%s4727_s0 + $0x50] ss:$8 sps:$4 sm:$0xff]   ;;  %v3528_v28 = vld [vmem:[%s4727_s0 + $0x64] ss:$8 sps:$4 sm:$0xff]   ;;  %v3530_v29 = vld [vmem:[%s4727_s0 + $0x60] ss:$8 sps:$4 sm:$0xff]  }
   0xb   :  { %3254 = vmatpush3.bf16.msra.mxu0 %v3499_v5  ;;  %v3531_v30 = vld [vmem:[%s4727_s0 + $0x74] ss:$8 sps:$4 sm:$0xff]   ;;  %v3533_v31 = vld [vmem:[%s4727_s0 + $0x70] ss:$8 sps:$4 sm:$0xff]  }
   0xc   :  { %3255 = vmatprep.subr.bf16.mxu0 %v3500_v6 }
   0xf   :  { %3256 = vmatpush3.bf16.msra.mxu0 %v3501_v7 }
  0x10   :  { %3257 = vmatprep.subr.bf16.mxu0 %v3502_v8 }
  0x13   :  { %3258 = vmatpush3.bf16.msra.mxu0 %v3503_v9 }
  0x14   :  { %3259 = vmatprep.subr.bf16.mxu0 %v3504_v10 }
  0x17   :  { %3260 = vmatpush3.bf16.msra.mxu0 %v3505_v12 }
  0x18   :  { %3261 = vmatprep.subr.bf16.mxu0 %v3506_v13 }
  0x1b   :  { %3262 = vmatpush3.bf16.msra.mxu0 %v3507_v14 }
  0x1c   :  { %3263 = vmatprep.subr.bf16.mxu0 %v3508_v15 }
  0x1f   :  { %3264 = vmatpush3.bf16.msra.mxu0 %v3509_v16 }
  0x22   :  { %306 = vmatmul.mubr.bf16.vlgmr.msra.gmra.mrb[0].mxu0 %v3510_v17 }
  0x23   :  { %313 = vmatprep.mubr.bf16.mxu0 %v3513_v18 }
  0x2a   :  { %314 = vmatmul.mubr.bf16.gmra.mrb[4].mxu0 %v3515_v19 }
  0x2b   :  { %321 = vmatprep.mubr.bf16.mxu0 %v3516_v20 }
  0x32   :  { %322 = vmatmul.mubr.bf16.gmra.mrb[8].mxu0 %v3518_v21 }
  0x33   :  { %329 = vmatprep.mubr.bf16.mxu0 %v3519_v22 }
  0x3a   :  { %330 = vmatmul.mubr.bf16.gmra.mrb[12].mxu0 %v3521_v23 }
  0x3b   :  { %337 = vmatprep.mubr.bf16.mxu0 %v3522_v24 }
  0x42   :  { %338 = vmatmul.mubr.bf16.gmra.mrb[16].mxu0 %v3524_v25 }
  0x43   :  { %345 = vmatprep.mubr.bf16.mxu0 %v3525_v26 }
  0x4a   :  { %346 = vmatmul.mubr.bf16.gmra.mrb[20].mxu0 %v3527_v27 }
  0x4b   :  { %353 = vmatprep.mubr.bf16.mxu0 %v3528_v28 }
  0x52   :  { %354 = vmatmul.mubr.bf16.gmra.mrb[24].mxu0 %v3530_v29 }
  0x53   :  { %361 = vmatprep.mubr.bf16.mxu0 %v3531_v30 }
  0x5a   :  { %362 = vmatmul.mubr.bf16.gmra.mrb[28].mxu0 %v3533_v31 }
  0x5b   :  { %19 = vsyncpa [#allocation6], 0  ;;  %v3717_v48 = vmov 0.0   ;;  %s3720_s30 = smov 96   ;;  %vm529_vm0 = vcmask 254976   ;;  %vm541_vm1 = vcmask 259076  }
  0x5c   :  { %524 = vst [vmem:[#allocation3 + $0x40] sm:$0xff] %v3717_v48  ;;  %516 = vst [vmem:[#allocation3] sm:$0xff] %v3717_v48  ;;  %vm547_vm2 = vcmask 261126   ;;  %vm535_vm3 = vcmask 257026   ;;  %vm573_vm4 = vcmask 517376   ;;  %vm637_vm5 = vcmask 779776  }
  0x5d   :  { %517 = vst [vmem:[#allocation3 + $0x8] sm:$0xff] %v3717_v48  ;;  %518 = vst [vmem:[#allocation3 + $0x10] sm:$0xff] %v3717_v48  ;;  %vm701_vm6 = vcmask 1042176   ;;  %vm589_vm7 = vcmask 521476   ;;  %vm597_vm8 = vcmask 523526   ;;  %vm581_vm9 = vcmask 519426  }
  0x5e   :  { %519 = vst [vmem:[#allocation3 + $0x18] sm:$0xff] %v3717_v48  ;;  %520 = vst [vmem:[#allocation3 + $0x20] sm:$0xff] %v3717_v48  ;;  %vm661_vm10 = vcmask 785926   ;;  %vm645_vm11 = vcmask 781826   ;;  %vm725_vm12 = vcmask 1048326   ;;  %vm709_vm13 = vcmask 1044226  }
  0x5f   :  { %521 = vst [vmem:[#allocation3 + $0x28] sm:$0xff] %v3717_v48  ;;  %522 = vst [vmem:[#allocation3 + $0x30] sm:$0xff] %v3717_v48  ;;  %vm653_vm14 = vcmask 783876   ;;  %vm717_vm15 = vcmask 1046276   ;;  %s3724_s24 = smov [#allocation5]  }
  0x60   :  { %523 = vst [vmem:[#allocation3 + $0x38] sm:$0xff] %v3717_v48  ;;  %525 = vst [vmem:[#allocation3 + $0x48] sm:$0xff] %v3717_v48  ;;  %s3071_s25 = sshll.u32 %s3724_s24, 4  ;;  %s3072_s25 = int_to_ptr.vmem [resolvable:$true] %s3071_s25 }
  0x61   :  { %526 = vst [vmem:[#allocation3 + $0x50] sm:$0xff] %v3717_v48  ;;  %527 = vst [vmem:[#allocation3 + $0x58] sm:$0xff] %v3717_v48  ;;  %p3698_p1 = scmp.lt.s32.totalorder %s3072_s25, %s3072_s25 }
  0x62   :  { %1832 = vst [vmem:[#allocation4] sm:$0xff] %v3717_v48  ;;  %1833 = vst [vmem:[#allocation4 + $0x8] sm:$0x3] %v3717_v48 }
  0xf5   :  { %v3265_v32 = vpop.f32.mrb[0].mxu0 }
  0xf6   :  { %v3266_v33 = vpop.f32.mrb[1].mxu0 }
  0xf7   :  { %v3896_v34 = vadd.f32 %v3266_v33, %v3265_v32  ;;  %v3268_v35 = vpop.f32.mrb[2].mxu0 }
  0xf8   :  { %v3269_v36 = vpop.f32.mrb[3].mxu0 }
  0xf9   :  { %v3898_v37 = vadd.f32 %v3269_v36, %v3268_v35  ;;  %v394_v45 = vmul.f32 %v3896_v34, %v3896_v34 }
  0xfb   :  { %v395_v43 = vmul.f32 %v3898_v37, %v3898_v37  ;;  %v372_v46 = vadd.f32 %v3898_v37, %v3896_v34 }
  0xfd   :  { %v3271_v38 = vpop.f32.mrb[4].mxu0  ;;  %v410_v49 = vadd.f32 %v395_v43, %v394_v45 }
  0xfe   :  { %v3272_v39 = vpop.f32.mrb[5].mxu0 }
  0xff   :  { %v3900_v40 = vadd.f32 %v3272_v39, %v3271_v38  ;;  %v3274_v41 = vpop.f32.mrb[6].mxu0 }
 0x100   :  { %v3275_v42 = vpop.f32.mrb[7].mxu0 }
 0x101   :  { %v3904_v44 = vadd.f32 %v3275_v42, %v3274_v41  ;;  %v396_v47 = vmul.f32 %v3900_v40, %v3900_v40  ;;  %v373_v50 = vadd.f32 %v3900_v40, %v372_v46 }
 0x103   :  { %v411_v53 = vadd.f32 %v410_v49, %v396_v47  ;;  %v397_v54 = vmul.f32 %v3904_v44, %v3904_v44  ;;  %v374_v58 = vadd.f32 %v3904_v44, %v373_v50 }
 0x105   :  { %v3277_v51 = vpop.f32.mrb[8].mxu0  ;;  %v412_v61 = vadd.f32 %v411_v53, %v397_v54 }
 0x106   :  { %v3278_v52 = vpop.f32.mrb[9].mxu0 }
 0x107   :  { %v3929_v55 = vadd.f32 %v3278_v52, %v3277_v51  ;;  %v3280_v56 = vpop.f32.mrb[10].mxu0 }
 0x108   :  { %v3281_v57 = vpop.f32.mrb[11].mxu0 }
 0x109   :  { %v398_v59 = vmul.f32 %v3929_v55, %v3929_v55  ;;  %v3934_v60 = vadd.f32 %v3281_v57, %v3280_v56  ;;  %v375_v62 = vadd.f32 %v3929_v55, %v374_v58 }
 0x10b   :  { %v413_v63 = vadd.f32 %v412_v61, %v398_v59  ;;  %v399_v0 = vmul.f32 %v3934_v60, %v3934_v60  ;;  %v376_v3 = vadd.f32 %v3934_v60, %v375_v62 }
 0x10d   :  { %v3283_v1 = vpop.f32.mrb[12].mxu0  ;;  %v414_v7 = vadd.f32 %v413_v63, %v399_v0 }
 0x10e   :  { %v3284_v2 = vpop.f32.mrb[13].mxu0 }
 0x10f   :  { %v3940_v4 = vadd.f32 %v3284_v2, %v3283_v1  ;;  %v3286_v5 = vpop.f32.mrb[14].mxu0 }
 0x110   :  { %v3287_v6 = vpop.f32.mrb[15].mxu0 }
 0x111   :  { %v377_v8 = vadd.f32 %v3940_v4, %v376_v3  ;;  %v400_v9 = vmul.f32 %v3940_v4, %v3940_v4  ;;  %v3945_v10 = vadd.f32 %v3287_v6, %v3286_v5 }
 0x113   :  { %v415_v11 = vadd.f32 %v414_v7, %v400_v9  ;;  %v378_v12 = vadd.f32 %v3945_v10, %v377_v8  ;;  %v401_v13 = vmul.f32 %v3945_v10, %v3945_v10 }
 0x115   :  { %v416_v14 = vadd.f32 %v415_v11, %v401_v13  ;;  %v3289_v15 = vpop.f32.mrb[16].mxu0 }
 0x116   :  { %v3290_v16 = vpop.f32.mrb[17].mxu0 }
 0x117   :  { %v3950_v17 = vadd.f32 %v3290_v16, %v3289_v15  ;;  %v3292_v18 = vpop.f32.mrb[18].mxu0 }
 0x118   :  { %v3293_v19 = vpop.f32.mrb[19].mxu0 }
 0x119   :  { %v379_v20 = vadd.f32 %v3950_v17, %v378_v12  ;;  %v402_v21 = vmul.f32 %v3950_v17, %v3950_v17  ;;  %v3955_v22 = vadd.f32 %v3293_v19, %v3292_v18 }
 0x11b   :  { %v417_v23 = vadd.f32 %v416_v14, %v402_v21  ;;  %v380_v24 = vadd.f32 %v3955_v22, %v379_v20  ;;  %v403_v25 = vmul.f32 %v3955_v22, %v3955_v22 }
 0x11d   :  { %v418_v26 = vadd.f32 %v417_v23, %v403_v25  ;;  %v3295_v27 = vpop.f32.mrb[20].mxu0 }
 0x11e   :  { %v3296_v28 = vpop.f32.mrb[21].mxu0 }
 0x11f   :  { %v3960_v29 = vadd.f32 %v3296_v28, %v3295_v27  ;;  %v3298_v30 = vpop.f32.mrb[22].mxu0  ;;  %v441_v28 = vlaneseq }
 0x120   :  { %v3299_v31 = vpop.f32.mrb[23].mxu0 }
 0x121   :  { %v381_v32 = vadd.f32 %v3960_v29, %v380_v24  ;;  %v404_v33 = vmul.f32 %v3960_v29, %v3960_v29  ;;  %v3965_v35 = vadd.f32 %v3299_v31, %v3298_v30  ;;  %v3980_v30 = vshrl.u32 %v441_v28, 7  ;;  %v370_v31 = vld [vmem:[%s4729_s2] sm:$0x1]  ;;  %s3718_s2 = smov 32  }
 0x123   :  { %v419_v36 = vadd.f32 %v418_v26, %v404_v33  ;;  %v382_v38 = vadd.f32 %v3965_v35, %v381_v32  ;;  %v405_v39 = vmul.f32 %v3965_v35, %v3965_v35  ;;  %v3986_v32 = vsub.s32 0, %v3980_v30 }
 0x125   :  { %v420_v41 = vadd.f32 %v419_v36, %v405_v39  ;;  %v3301_v42 = vpop.f32.mrb[24].mxu0 }
 0x126   :  { %v3302_v43 = vpop.f32.mrb[25].mxu0 }
 0x127   :  { %v3970_v45 = vadd.f32 %v3302_v43, %v3301_v42  ;;  %v3304_v46 = vpop.f32.mrb[26].mxu0 }
 0x128   :  { %v3305_v47 = vpop.f32.mrb[27].mxu0 }
 0x129   :  { %v383_v49 = vadd.f32 %v3970_v45, %v382_v38  ;;  %v406_v50 = vmul.f32 %v3970_v45, %v3970_v45  ;;  %v3306_v51 = vadd.f32 %v3305_v47, %v3304_v46  ;;  %v371_v38 = vld [vmem:[%s4730_s3] sm:$0x1]  ;;  %s3719_s3 = smov 64  }
 0x12b   :  { %v421_v52 = vadd.f32 %v420_v41, %v406_v50  ;;  %v384_v53 = vadd.f32 %v3306_v51, %v383_v49  ;;  %v407_v54 = vmul.f32 %v3306_v51, %v3306_v51 }
 0x12d   :  { %v422_v56 = vadd.f32 %v421_v52, %v407_v54  ;;  %v3307_v57 = vpop.f32.mrb[28].mxu0 }
 0x12e   :  { %v3308_v58 = vpop.f32.mrb[29].mxu0 }
 0x12f   :  { %v3975_v59 = vadd.f32 %v3308_v58, %v3307_v57  ;;  %v3310_v61 = vpop.f32.mrb[30].mxu0 }
 0x130   :  { %v3311_v62 = vpop.f32.mrb[31].mxu0 }
 0x131   :  { %v385_v63 = vadd.f32 %v3975_v59, %v384_v53  ;;  %v408_v0 = vmul.f32 %v3975_v59, %v3975_v59  ;;  %v3312_v1 = vadd.f32 %v3311_v62, %v3310_v61 }
 0x133   :  { %v423_v2 = vadd.f32 %v422_v56, %v408_v0  ;;  %v386_v3 = vadd.f32 %v3312_v1, %v385_v63  ;;  %v409_v5 = vmul.f32 %v3312_v1, %v3312_v1 }
 0x135   :  { %v387_v6 = vrot.slane %v386_v3, 4  ;;  %v424_v7 = vadd.f32 %v423_v2, %v409_v5 }
 0x137   :  { %v388_v8 = vadd.f32 %v387_v6, %v386_v3  ;;  %v425_v9 = vrot.slane %v424_v7, 4 }
 0x139   :  { %v389_v11 = vrot.slane %v388_v8, 2  ;;  %v426_v12 = vadd.f32 %v425_v9, %v424_v7 }
 0x13b   :  { %v390_v13 = vadd.f32 %v389_v11, %v388_v8  ;;  %v427_v14 = vrot.slane %v426_v12, 2 }
 0x13d   :  { %v391_v15 = vrot.slane %v390_v13, 1  ;;  %v428_v16 = vadd.f32 %v427_v14, %v426_v12 }
 0x13f   :  { %v392_v18 = vadd.f32 %v391_v15, %v390_v13  ;;  %v429_v19 = vrot.slane %v428_v16, 1 }
 0x141   :  { %v393_v20 = vmul.f32 0.0078125, %v392_v18  ;;  %v430_v21 = vadd.f32 %v429_v19, %v428_v16 }
 0x143   :  { %v431_v23 = vmul.f32 0.0078125, %v430_v21  ;;  %v432_v24 = vmul.f32 %v393_v20, %v393_v20 }
 0x145   :  { %v433_v25 = vsub.f32 %v431_v23, %v432_v24 }
 0x147   :  { %v434_v26 = vmax.f32 %v433_v25, 0.0 }
 0x149   :  { %v435_v27 = vadd.f32 1e-05, %v434_v26 }
 0x14b   :  { %3687 = vrsqrt.f32 %v435_v27 }
 0x155   :  { %v3688_v33 = vpop.eup %3687 }
 0x156   :  { %v437_v36 = vmul.f32 %v3688_v33, %v370_v31 }
 0x158   :  { %v438_v39 = vmul.f32 %v437_v36, %v393_v20  ;;  %v444_v41 = vrot.slane %v437_v36, %v3986_v32 }
 0x15a   :  { %v439_v42 = vsub.f32 %v371_v38, %v438_v39  ;;  %v461_v43 = vmul.f32 %v3312_v1, %v444_v41  ;;  %v455_v46 = vmul.f32 %v3955_v22, %v444_v41  ;;  %v448_v47 = vmul.f32 %v3900_v40, %v444_v41 }
 0x15b   :  { %v452_v49 = vmul.f32 %v3940_v4, %v444_v41  ;;  %v446_v50 = vmul.f32 %v3896_v34, %v444_v41  ;;  %v459_v52 = vmul.f32 %v3306_v51, %v444_v41  ;;  %v450_v53 = vmul.f32 %v3929_v55, %v444_v41 }
 0x15c   :  { %v466_v54 = vrot.slane %v439_v42, %v3986_v32  ;;  %v449_v56 = vmul.f32 %v3904_v44, %v444_v41  ;;  %v453_v57 = vmul.f32 %v3945_v10, %v444_v41  ;;  %v456_v58 = vmul.f32 %v3960_v29, %v444_v41 }
 0x15d   :  { %v451_v61 = vmul.f32 %v3934_v60, %v444_v41  ;;  %v454_v22 = vmul.f32 %v3950_v17, %v444_v41  ;;  %v457_v40 = vmul.f32 %v3965_v35, %v444_v41  ;;  %v447_v4 = vmul.f32 %v3898_v37, %v444_v41 }
 0x15e   :  { %v483_v34 = vadd.f32 %v466_v54, %v461_v43  ;;  %v477_v51 = vadd.f32 %v466_v54, %v455_v46  ;;  %v470_v62 = vadd.f32 %v466_v54, %v448_v47  ;;  %v474_v55 = vadd.f32 %v466_v54, %v452_v49 }
 0x15f   :  { %v468_v63 = vadd.f32 %v466_v54, %v446_v50  ;;  %v481_v0 = vadd.f32 %v466_v54, %v459_v52  ;;  %v472_v1 = vadd.f32 %v466_v54, %v450_v53  ;;  %v471_v44 = vadd.f32 %v466_v54, %v449_v56 }
 0x160   :  { %v499_v2 = vmax.f32 %v483_v34, 0.0  ;;  %v493_v10 = vmax.f32 %v477_v51, 0.0  ;;  %v486_v3 = vmax.f32 %v470_v62, 0.0  ;;  %v490_v29 = vmax.f32 %v474_v55, 0.0 }
 0x161   :  { %v484_v5 = vmax.f32 %v468_v63, 0.0  ;;  %v497_v60 = vmax.f32 %v481_v0, 0.0  ;;  %v488_v6 = vmax.f32 %v472_v1, 0.0  ;;  %v487_v17 = vmax.f32 %v471_v44, 0.0 }
 0x162   :  { %515 = vst [vmem:[#allocation2 + $0x78] sm:$0xff] %v499_v2  ;;  %509 = vst [vmem:[#allocation2 + $0x48] sm:$0xff] %v493_v10  ;;  %v475_v37 = vadd.f32 %v466_v54, %v453_v57  ;;  %v478_v35 = vadd.f32 %v466_v54, %v456_v58  ;;  %v473_v7 = vadd.f32 %v466_v54, %v451_v61 }
 0x163   :  { %502 = vst [vmem:[#allocation2 + $0x10] sm:$0xff] %v486_v3  ;;  %506 = vst [vmem:[#allocation2 + $0x30] sm:$0xff] %v490_v29  ;;  %v476_v8 = vadd.f32 %v466_v54, %v454_v22  ;;  %v479_v9 = vadd.f32 %v466_v54, %v457_v40  ;;  %v469_v11 = vadd.f32 %v466_v54, %v447_v4 }
 0x164   :  { %500 = vst [vmem:[#allocation2] sm:$0xff] %v484_v5  ;;  %513 = vst [vmem:[#allocation2 + $0x68] sm:$0xff] %v497_v60  ;;  %v491_v12 = vmax.f32 %v475_v37, 0.0  ;;  %v494_v13 = vmax.f32 %v478_v35, 0.0  ;;  %v489_v14 = vmax.f32 %v473_v7, 0.0  ;;  %v460_v19 = vmul.f32 %v3975_v59, %v444_v41 }
 0x165   :  { %504 = vst [vmem:[#allocation2 + $0x20] sm:$0xff] %v488_v6  ;;  %503 = vst [vmem:[#allocation2 + $0x18] sm:$0xff] %v487_v17  ;;  %v492_v15 = vmax.f32 %v476_v8, 0.0  ;;  %v495_v16 = vmax.f32 %v479_v9, 0.0  ;;  %v485_v18 = vmax.f32 %v469_v11, 0.0  ;;  %v458_v20 = vmul.f32 %v3970_v45, %v444_v41 }
 0x166   :  { %507 = vst [vmem:[#allocation2 + $0x38] sm:$0xff] %v491_v12  ;;  %510 = vst [vmem:[#allocation2 + $0x50] sm:$0xff] %v494_v13  ;;  %v482_v21 = vadd.f32 %v466_v54, %v460_v19 }
 0x167   :  { %505 = vst [vmem:[#allocation2 + $0x28] sm:$0xff] %v489_v14  ;;  %508 = vst [vmem:[#allocation2 + $0x40] sm:$0xff] %v492_v15  ;;  %v480_v23 = vadd.f32 %v466_v54, %v458_v20 }
 0x168   :  { %511 = vst [vmem:[#allocation2 + $0x58] sm:$0xff] %v495_v16  ;;  %501 = vst [vmem:[#allocation2 + $0x8] sm:$0xff] %v485_v18  ;;  %v498_v26 = vmax.f32 %v482_v21, 0.0 }
 0x169   :  { %v626_v24 = vld [vmem:[#allocation2 + $0x4a] sm:$0x3]  ;;  %v690_v27 = vld [vmem:[#allocation2 + $0x4c] sm:$0x3]  ;;  %v496_v45 = vmax.f32 %v480_v23, 0.0 }
 0x16a   :  { %v796_v25 = vld [vmem:[#allocation2 + $0x12] sm:$0x3]  ;;  %628 = vrot.lane.b32.xlu1 %v626_v24, %s3718_s2  ;;  %v823_v59 = vld [vmem:[#allocation2 + $0x36] sm:$0x3]  ;;  %514 = vst [vmem:[#allocation2 + $0x70] sm:$0xff] %v498_v26 }
 0x16b   :  { %798 = vrot.lane.b32.xlu0 %v796_v25, %s3718_s2  ;;  %v754_v28 = vld [vmem:[#allocation2 + $0x4e] sm:$0x3]  ;;  %v568_v31 = vld [vmem:[#allocation2 + $0x2] sm:$0x3]  ;;  %512 = vst [vmem:[#allocation2 + $0x60] sm:$0xff] %v496_v45 }
 0x16c   :  { %v1066_v33 = vld [vmem:[#allocation2 + $0x6a] sm:$0x3]  ;;  %v599_v36 = vld [vmem:[#allocation2 + $0x26] sm:$0x3]  ;;  %v809_v38 = vld [vmem:[#allocation2 + $0x1a] sm:$0x3] }
 0x16d   :  { %v811_v39 = vrot.slane %v809_v38, 4  ;;  %v856_v41 = vld [vmem:[#allocation2 + $0x14] sm:$0x3]  ;;  %v816_v42 = vld [vmem:[#allocation2 + $0x32] sm:$0x3] }
 0x16e   :  { %692 = vrot.lane.b32.xlu1 %v690_v27, %s3719_s3  ;;  %v818_v43 = vrot.slane %v816_v42, 2  ;;  %v883_v46 = vld [vmem:[#allocation2 + $0x38] sm:$0x3]  ;;  %v829_v47 = vld [vmem:[#allocation2 + $0x3a] sm:$0x3] }
 0x16f   :  { %825 = vrot.lane.b32.xlu0 %v823_v59, %s3718_s2  ;;  %v831_v49 = vrot.slane %v829_v47, 6  ;;  %v632_v50 = vld [vmem:[#allocation2 + $0x4] sm:$0x3]  ;;  %v843_v52 = vld [vmem:[#allocation2 + $0x56] sm:$0x3] }
 0x170   :  { %v845_v53 = vrot.slane %v843_v52, 2  ;;  %v566_v54 = vld [vmem:[#allocation2 + $0x48] sm:$0x3]  ;;  %v575_v57 = vld [vmem:[#allocation2 + $0x6] sm:$0x3] }
 0x171   :  { %v663_v56 = vld [vmem:[#allocation2 + $0x28] sm:$0x3]  ;;  %567 = vst.msk [vmem:[#allocation3 + $0x40] sm:$0x3] %vm529_vm0, %v566_v54  ;;  %v760_v58 = vld [vmem:[#allocation2 + $0x10] sm:$0x3] }
 0x172   :  { %756 = vrot.lane.b32.xlu1 %v754_v28, %s3720_s30  ;;  %761 = vst.msk [vmem:[#allocation3 + $0x8] sm:$0x3] %vm529_vm0, %v760_v58  ;;  %v777_v61 = vld [vmem:[#allocation2 + $0x34] sm:$0x3]  ;;  %v577_v22 = vrot.slane %v575_v57, 6 }
 0x173   :  { %570 = vrot.lane.b32.xlu0 %v568_v31, %s3718_s2  ;;  %778 = vst.msk [vmem:[#allocation3 + $0x28] sm:$0x3] %vm529_vm0, %v777_v61  ;;  %v528_v40 = vld [vmem:[#allocation2] sm:$0x3]  ;;  %v916_v4 = vld [vmem:[#allocation2 + $0x16] sm:$0x3] }
 0x174   :  { %v591_v34 = vld [vmem:[#allocation2 + $0x22] sm:$0x3]  ;;  %530 = vst.msk [vmem:[#allocation3] sm:$0x3] %vm529_vm0, %v528_v40  ;;  %v1010_v51 = vld [vmem:[#allocation2 + $0x68] sm:$0x3] }
 0x175   :  { %1011 = vst.msk [vmem:[#allocation3 + $0x50] sm:$0x3] %vm529_vm0, %v1010_v51  ;;  %v549_v62 = vld [vmem:[#allocation2 + $0x24] sm:$0x3]  ;;  %v767_v55 = vld [vmem:[#allocation2 + $0x18] sm:$0x3] }
 0x176   :  { %1068 = vrot.lane.b32.xlu1 %v1066_v33, %s3718_s2  ;;  %550 = vst.msk [vmem:[#allocation3 + $0x20] sm:$0x3] %vm529_vm0, %v549_v62  ;;  %v593_v63 = vrot.slane %v591_v34, 2  ;;  %v769_v0 = vrot.slane %v767_v55, 4  ;;  %v943_v1 = vld [vmem:[#allocation2 + $0x3a] sm:$0x3] }
 0x177   :  { %601 = vrot.lane.b32.xlu0 %v599_v36, %s3718_s2  ;;  %v605_v44 = vld [vmem:[#allocation2 + $0x2a] sm:$0x3]  ;;  %v772_v2 = vld [vmem:[#allocation2 + $0x30] sm:$0x3]  ;;  %v779_v3 = vld [vmem:[#allocation2 + $0x38] sm:$0x3] }
 0x178   :  { %771 = vst.msk [vmem:[#allocation3 + $0x8] sm:$0x30] %vm541_vm1, %v769_v0  ;;  %v774_v10 = vrot.slane %v772_v2, 2  ;;  %v781_v29 = vrot.slane %v779_v3, 6  ;;  %v607_v5 = vrot.slane %v605_v44, 6 }
 0x179   :  { %v696_v60 = vld [vmem:[#allocation2 + $0x6] sm:$0x3]  ;;  %v789_v6 = vld [vmem:[#allocation2 + $0x54] sm:$0x3]  ;;  %v531_v35 = vld [vmem:[#allocation2 + $0x4] sm:$0x3] }
 0x17a   :  { %812 = vrot.lane.b32.xlu1 %v811_v39, %s3718_s2  ;;  %776 = vst.msk [vmem:[#allocation3 + $0x8] sm:$0xc0] %vm547_vm2, %v774_v10  ;;  %v619_v17 = vld [vmem:[#allocation2 + $0x46] sm:$0x3]  ;;  %v791_v37 = vrot.slane %v789_v6, 2  ;;  %v533_v7 = vrot.slane %v531_v35, 6 }
 0x17b   :  { %858 = vrot.lane.b32.xlu0 %v856_v41, %s3719_s3  ;;  %783 = vst.msk [vmem:[#allocation3 + $0x28] sm:$0xc] %vm535_vm3, %v781_v29  ;;  %v543_v8 = vld [vmem:[#allocation2 + $0x20] sm:$0x3]  ;;  %v621_v9 = vrot.slane %v619_v17, 2 }
 0x17c   :  { %793 = vst.msk [vmem:[#allocation3 + $0x28] sm:$0xc0] %vm547_vm2, %v791_v37  ;;  %v545_v11 = vrot.slane %v543_v8, 2  ;;  %v551_v12 = vld [vmem:[#allocation2 + $0x28] sm:$0x3] }
 0x17d   :  { %536 = vst.msk [vmem:[#allocation3] sm:$0xc] %vm535_vm3, %v533_v7  ;;  %v727_v13 = vld [vmem:[#allocation2 + $0x2a] sm:$0x3]  ;;  %v862_v14 = vld [vmem:[#allocation2 + $0x18] sm:$0x3] }
 0x17e   :  { %819 = vrot.lane.b32.xlu1 %v818_v43, %s3718_s2  ;;  %v553_v15 = vrot.slane %v551_v12, 6  ;;  %548 = vst.msk [vmem:[#allocation3] sm:$0xc0] %vm547_vm2, %v545_v11  ;;  %v561_v16 = vld [vmem:[#allocation2 + $0x44] sm:$0x3]  ;;  %v864_v20 = vrot.slane %v862_v14, 6 }
 0x17f   :  { %885 = vrot.lane.b32.xlu0 %v883_v46, %s3719_s3  ;;  %v563_v18 = vrot.slane %v561_v16, 2  ;;  %v794_v19 = vld [vmem:[#allocation2 + $0x58] sm:$0x3]  ;;  %v850_v21 = vld [vmem:[#allocation2 + $0x5a] sm:$0x3] }
 0x180   :  { %555 = vst.msk [vmem:[#allocation3 + $0x20] sm:$0xc] %vm535_vm3, %v553_v15  ;;  %v876_v23 = vld [vmem:[#allocation2 + $0x34] sm:$0x3]  ;;  %v1192_v24 = vld [vmem:[#allocation2 + $0x30] sm:$0x3] }
 0x181   :  { %795 = vst.msk [vmem:[#allocation3 + $0x48] sm:$0x3] %vm529_vm0, %v794_v19  ;;  %v878_v25 = vrot.slane %v876_v23, 2  ;;  %1193 = vst.msk [vmem:[#allocation3 + $0x18] sm:$0x3] %vm529_vm0, %v1192_v24 }
 0x182   :  { %832 = vrot.lane.b32.xlu1 %v831_v49, %s3718_s2  ;;  %565 = vst.msk [vmem:[#allocation3 + $0x20] sm:$0xc0] %vm547_vm2, %v563_v18  ;;  %v910_v26 = vld [vmem:[#allocation2 + $0x5c] sm:$0x3]  ;;  %v1209_v59 = vld [vmem:[#allocation2 + $0x54] sm:$0x3] }
 0x183   :  { %634 = vrot.lane.b32.xlu0 %v632_v50, %s3719_s3  ;;  %v889_v27 = vld [vmem:[#allocation2 + $0x3c] sm:$0x3]  ;;  %1210 = vst.msk [vmem:[#allocation3 + $0x38] sm:$0x3] %vm529_vm0, %v1209_v59  ;;  %v976_v45 = vld [vmem:[#allocation2 + $0x20] sm:$0x3] }
 0x184   :  { %977 = vst.msk [vmem:[#allocation3 + $0x10] sm:$0x3] %vm529_vm0, %v976_v45  ;;  %v891_v28 = vrot.slane %v889_v27, 6  ;;  %v993_v31 = vld [vmem:[#allocation2 + $0x44] sm:$0x3] }
 0x185   :  { %v970_v33 = vld [vmem:[#allocation2 + $0x5e] sm:$0x3]  ;;  %v903_v36 = vld [vmem:[#allocation2 + $0x58] sm:$0x3]  ;;  %994 = vst.msk [vmem:[#allocation3 + $0x30] sm:$0x3] %vm529_vm0, %v993_v31 }
 0x186   :  { %846 = vrot.lane.b32.xlu1 %v845_v53, %s3718_s2  ;;  %v639_v38 = vld [vmem:[#allocation2 + $0x8] sm:$0x3]  ;;  %v905_v39 = vrot.slane %v903_v36, 2  ;;  %v1228_v41 = vld [vmem:[#allocation2 + $0x32] sm:$0x3] }
 0x187   :  { %665 = vrot.lane.b32.xlu0 %v663_v56, %s3719_s3  ;;  %v655_v42 = vld [vmem:[#allocation2 + $0x24] sm:$0x3]  ;;  %v641_v43 = vrot.slane %v639_v38, 6  ;;  %v1255_v46 = vld [vmem:[#allocation2 + $0x56] sm:$0x3] }
 0x188   :  { %v1226_v47 = vld [vmem:[#allocation2 + $0x78] sm:$0x3]  ;;  %v1194_v49 = vld [vmem:[#allocation2 + $0x34] sm:$0x3]  ;;  %v657_v50 = vrot.slane %v655_v42, 2 }
 0x189   :  { %1227 = vst.msk [vmem:[#allocation3 + $0x58] sm:$0x3] %vm529_vm0, %v1226_v47  ;;  %v1196_v52 = vrot.slane %v1194_v49, 6  ;;  %v762_v53 = vld [vmem:[#allocation2 + $0x14] sm:$0x3]  ;;  %vm1834_vm0 = vcmask 517120  }
 0x18a   :  { %578 = vrot.lane.b32.xlu1 %v577_v22, %s3718_s2  ;;  %v1204_v54 = vld [vmem:[#allocation2 + $0x50] sm:$0x3]  ;;  %v764_v56 = vrot.slane %v762_v53, 6  ;;  %v1211_v61 = vld [vmem:[#allocation2 + $0x58] sm:$0x3] }
 0x18b   :  { %918 = vrot.lane.b32.xlu0 %v916_v4, %s3720_s30  ;;  %v1206_v57 = vrot.slane %v1204_v54, 2  ;;  %v784_v58 = vld [vmem:[#allocation2 + $0x50] sm:$0x3]  ;;  %1198 = vst.msk [vmem:[#allocation3 + $0x18] sm:$0xc] %vm535_vm3, %v1196_v52  ;;  %v1213_v40 = vrot.slane %v1211_v61, 6 }
 0x18c   :  { %v786_v22 = vrot.slane %v784_v58, 4  ;;  %v537_v4 = vld [vmem:[#allocation2 + $0x8] sm:$0x3]  ;;  %v1221_v34 = vld [vmem:[#allocation2 + $0x74] sm:$0x3] }
 0x18d   :  { %v1012_v51 = vld [vmem:[#allocation2 + $0x22] sm:$0x3]  ;;  %v669_v62 = vld [vmem:[#allocation2 + $0x2c] sm:$0x3]  ;;  %766 = vst.msk [vmem:[#allocation3 + $0x8] sm:$0xc] %vm535_vm3, %v764_v56 }
 0x18e   :  { %594 = vrot.lane.b32.xlu1 %v593_v63, %s3718_s2  ;;  %1208 = vst.msk [vmem:[#allocation3 + $0x18] sm:$0xc0] %vm547_vm2, %v1206_v57  ;;  %v539_v55 = vrot.slane %v537_v4, 4  ;;  %v1223_v63 = vrot.slane %v1221_v34, 2  ;;  %v556_v0 = vld [vmem:[#allocation2 + $0x40] sm:$0x3] }
 0x18f   :  { %945 = vrot.lane.b32.xlu0 %v943_v1, %s3720_s30  ;;  %v978_v1 = vld [vmem:[#allocation2 + $0x24] sm:$0x3]  ;;  %788 = vst.msk [vmem:[#allocation3 + $0x28] sm:$0x30] %vm541_vm1, %v786_v22  ;;  %v558_v44 = vrot.slane %v556_v0, 4  ;;  %v671_v11 = vrot.slane %v669_v62, 6 }
 0x190   :  { %1215 = vst.msk [vmem:[#allocation3 + $0x38] sm:$0xc] %vm535_vm3, %v1213_v40  ;;  %v980_v2 = vrot.slane %v978_v1, 6  ;;  %v988_v10 = vld [vmem:[#allocation2 + $0x40] sm:$0x3] }
 0x191   :  { %v995_v3 = vld [vmem:[#allocation2 + $0x48] sm:$0x3]  ;;  %542 = vst.msk [vmem:[#allocation3] sm:$0x30] %vm541_vm1, %v539_v55  ;;  %v990_v29 = vrot.slane %v988_v10, 2  ;;  %v3534_v10 = vld [vmem:[%s4731_s4 + $0x40] sm:$0xff]  }
 0x192   :  { %608 = vrot.lane.b32.xlu1 %v607_v5, %s3718_s2  ;;  %1225 = vst.msk [vmem:[#allocation3 + $0x38] sm:$0xc0] %vm547_vm2, %v1223_v63  ;;  %v997_v5 = vrot.slane %v995_v3, 6  ;;  %v1199_v6 = vld [vmem:[#allocation2 + $0x38] sm:$0x3]  ;;  %v3535_v3 = vld [vmem:[%s4731_s4] sm:$0xff]   ;;  %3313 = vmatprep.subr.bf16.mxu1 %v3534_v10 }
 0x193   :  { %698 = vrot.lane.b32.xlu0 %v696_v60, %s3720_s30  ;;  %v1005_v60 = vld [vmem:[#allocation2 + $0x64] sm:$0x3]  ;;  %560 = vst.msk [vmem:[#allocation3 + $0x20] sm:$0x30] %vm541_vm1, %v558_v44  ;;  %v1201_v37 = vrot.slane %v1199_v6, 4  ;;  %3314 = vmatpush3.bf16.msra.mxu1 %v3535_v3 }
 0x194   :  { %982 = vst.msk [vmem:[#allocation3 + $0x10] sm:$0xc] %vm535_vm3, %v980_v2  ;;  %v1007_v17 = vrot.slane %v1005_v60, 2  ;;  %v1216_v35 = vld [vmem:[#allocation2 + $0x70] sm:$0x3] }
 0x195   :  { %992 = vst.msk [vmem:[#allocation3 + $0x10] sm:$0xc0] %vm547_vm2, %v990_v29  ;;  %v1218_v7 = vrot.slane %v1216_v35, 4  ;;  %v983_v8 = vld [vmem:[#allocation2 + $0x28] sm:$0x3] }
 0x196   :  { %622 = vrot.lane.b32.xlu1 %v621_v9, %s3718_s2  ;;  %999 = vst.msk [vmem:[#allocation3 + $0x30] sm:$0xc] %vm535_vm3, %v997_v5  ;;  %v1000_v9 = vld [vmem:[#allocation2 + $0x60] sm:$0x3]  ;;  %v985_v12 = vrot.slane %v983_v8, 4  ;;  %v3536_v35 = vld [vmem:[%s4731_s4 + $0x48] sm:$0xff]  }
 0x197   :  { %729 = vrot.lane.b32.xlu0 %v727_v13, %s3720_s30  ;;  %1009 = vst.msk [vmem:[#allocation3 + $0x30] sm:$0xc0] %vm547_vm2, %v1007_v17  ;;  %v1002_v13 = vrot.slane %v1000_v9, 4  ;;  %v1039_v14 = vld [vmem:[#allocation2 + $0x46] sm:$0x3]  ;;  %3315 = vmatprep.subr.bf16.mxu1 %v3536_v35  ;;  %vm3722_vm2 = vmmov 0  }
 0x198   :  { %1203 = vst.msk [vmem:[#allocation3 + $0x18] sm:$0x30] %vm541_vm1, %v1201_v37  ;;  %v683_v15 = vld [vmem:[#allocation2 + $0x48] sm:$0x3]  ;;  %1220 = vst.msk [vmem:[#allocation3 + $0x38] sm:$0x30] %vm541_vm1, %v1218_v7 }
 0x199   :  { %987 = vst.msk [vmem:[#allocation3 + $0x10] sm:$0x30] %vm541_vm1, %v985_v12  ;;  %1004 = vst.msk [vmem:[#allocation3 + $0x30] sm:$0x30] %vm541_vm1, %v1002_v13  ;;  %v685_v16 = vrot.slane %v683_v15, 2  ;;  %v3537_v7 = vld [vmem:[%s4731_s4 + $0x8] sm:$0xff]  }
 0x19a   :  { %865 = vrot.lane.b32.xlu1 %v864_v20, %s3719_s3  ;;  %v1288_v18 = vld [vmem:[#allocation2 + $0x34] sm:$0x3]  ;;  %v922_v19 = vld [vmem:[#allocation2 + $0x1a] sm:$0x3]  ;;  %v936_v23 = vld [vmem:[#allocation2 + $0x36] sm:$0x3]  ;;  %3316 = vmatpush3.bf16.msra.mxu1 %v3537_v7 }
 0x19b   :  { %852 = vrot.lane.b32.xlu0 %v850_v21, %s3718_s2  ;;  %v924_v20 = vrot.slane %v922_v19, 6  ;;  %v1315_v21 = vld [vmem:[#allocation2 + $0x58] sm:$0x3]  ;;  %v938_v24 = vrot.slane %v936_v23, 2  ;;  %v1099_v59 = vld [vmem:[#allocation2 + $0x48] sm:$0x3] }
 0x19c   :  { %v963_v45 = vld [vmem:[#allocation2 + $0x5a] sm:$0x3]  ;;  %v1348_v31 = vld [vmem:[#allocation2 + $0x36] sm:$0x3]  ;;  %v1132_v42 = vld [vmem:[#allocation2 + $0x26] sm:$0x3] }
 0x19d   :  { %v1375_v38 = vld [vmem:[#allocation2 + $0x5a] sm:$0x3]  ;;  %v1159_v47 = vld [vmem:[#allocation2 + $0x4a] sm:$0x3]  ;;  %v1234_v53 = vld [vmem:[#allocation2 + $0x36] sm:$0x3] }
 0x19e   :  { %879 = vrot.lane.b32.xlu1 %v878_v25, %s3719_s3  ;;  %v1072_v25 = vld [vmem:[#allocation2 + $0x24] sm:$0x3]  ;;  %v747_v49 = vld [vmem:[#allocation2 + $0x4a] sm:$0x3]  ;;  %v1282_v52 = vld [vmem:[#allocation2 + $0x7a] sm:$0x3] }
 0x19f   :  { %912 = vrot.lane.b32.xlu0 %v910_v26, %s3719_s3  ;;  %v949_v26 = vld [vmem:[#allocation2 + $0x3e] sm:$0x3]  ;;  %v802_v54 = vld [vmem:[#allocation2 + $0x16] sm:$0x3]  ;;  %v1236_v56 = vrot.slane %v1234_v53, 6  ;;  %vm1848_vm1 = vcmask 1041920  }
 0x1a0   :  { %v951_v27 = vrot.slane %v949_v26, 6  ;;  %v804_v57 = vrot.slane %v802_v54, 6  ;;  %v1248_v58 = vld [vmem:[#allocation2 + $0x52] sm:$0x3]  ;;  %v583_v62 = vld [vmem:[#allocation2 + $0xa] sm:$0x3] }
 0x1a1   :  { %v836_v61 = vld [vmem:[#allocation2 + $0x52] sm:$0x3]  ;;  %v1250_v4 = vrot.slane %v1248_v58, 2  ;;  %v585_v1 = vrot.slane %v583_v62, 4  ;;  %v1275_v44 = vld [vmem:[#allocation2 + $0x76] sm:$0x3] }
 0x1a2   :  { %892 = vrot.lane.b32.xlu1 %v891_v28, %s3719_s3  ;;  %v965_v28 = vrot.slane %v963_v45, 2  ;;  %v838_v34 = vrot.slane %v836_v61, 4  ;;  %v612_v2 = vld [vmem:[#allocation2 + $0x42] sm:$0x3]  ;;  %v1277_v60 = vrot.slane %v1275_v44, 2  ;;  %v3538_v15 = vld [vmem:[%s4731_s4 + $0x50] sm:$0xff]  }
 0x1a3   :  { %972 = vrot.lane.b32.xlu0 %v970_v33, %s3720_s30  ;;  %v703_v33 = vld [vmem:[#allocation2 + $0xa] sm:$0x3]  ;;  %v614_v6 = vrot.slane %v612_v2, 4  ;;  %v1018_v17 = vld [vmem:[#allocation2 + $0x26] sm:$0x3]  ;;  %3317 = vmatprep.subr.bf16.mxu1 %v3538_v15  ;;  %v3541_v26 = vld [vmem:[%s4731_s4 + $0x18] sm:$0xff]  }
 0x1a4   :  { %v705_v36 = vrot.slane %v703_v33, 6  ;;  %v869_v37 = vld [vmem:[#allocation2 + $0x1c] sm:$0x3]  ;;  %v1032_v13 = vld [vmem:[#allocation2 + $0x42] sm:$0x3]  ;;  %v3546_v61 = vld [vmem:[%s4731_s4 + $0x70] sm:$0xff]  }
 0x1a5   :  { %v871_v12 = vrot.slane %v869_v37, 4  ;;  %v1045_v23 = vld [vmem:[#allocation2 + $0x4a] sm:$0x3]  ;;  %v676_v33 = vld [vmem:[#allocation2 + $0x44] sm:$0x3]  ;;  %vm2375_vm3 = vcmask 1041408  }
 0x1a6   :  { %906 = vrot.lane.b32.xlu1 %v905_v39, %s3719_s3  ;;  %v719_v39 = vld [vmem:[#allocation2 + $0x26] sm:$0x3]  ;;  %v1047_v45 = vrot.slane %v1045_v23, 6  ;;  %v956_v58 = vld [vmem:[#allocation2 + $0x56] sm:$0x3] }
 0x1a7   :  { %1230 = vrot.lane.b32.xlu0 %v1228_v41, %s3718_s2  ;;  %v721_v41 = vrot.slane %v719_v39, 2  ;;  %v1321_v62 = vld [vmem:[#allocation2 + $0x5c] sm:$0x3]  ;;  %v1335_v3 = vld [vmem:[#allocation2 + $0x78] sm:$0x3] }
 0x1a8   :  { %v1323_v2 = vrot.slane %v1321_v62, 6  ;;  %v1078_v37 = vld [vmem:[#allocation2 + $0x28] sm:$0x3]  ;;  %v1241_v35 = vld [vmem:[#allocation2 + $0x3a] sm:$0x3] }
 0x1aa   :  { %642 = vrot.lane.b32.xlu1 %v641_v43, %s3719_s3  ;;  %v733_v43 = vld [vmem:[#allocation2 + $0x2e] sm:$0x3] }
 0x1ab   :  { %1257 = vrot.lane.b32.xlu0 %v1255_v46, %s3718_s2  ;;  %v735_v46 = vrot.slane %v733_v43, 6  ;;  %v678_v43 = vrot.slane %v676_v33, 4 }
 0x1ae   :  { %658 = vrot.lane.b32.xlu1 %v657_v50, %s3719_s3  ;;  %v749_v50 = vrot.slane %v747_v49, 2  ;;  %v3544_v49 = vld [vmem:[%s4731_s4 + $0x68] sm:$0xff]  }
 0x1af   :  { %1014 = vrot.lane.b32.xlu0 %v1012_v51, %s3718_s2  ;;  %v1261_v51 = vld [vmem:[#allocation2 + $0x5a] sm:$0x3] }
 0x1b0   :  { %v1263_v0 = vrot.slane %v1261_v51, 6  ;;  %v958_v51 = vrot.slane %v956_v58, 4 }
 0x1b2   :  { %672 = vrot.lane.b32.xlu1 %v671_v11, %s3719_s3  ;;  %v1020_v11 = vrot.slane %v1018_v17, 6 }
 0x1b3   :  { %1041 = vrot.lane.b32.xlu0 %v1039_v14, %s3718_s2  ;;  %v896_v14 = vld [vmem:[#allocation2 + $0x54] sm:$0x3] }
 0x1b6   :  { %686 = vrot.lane.b32.xlu1 %v685_v16, %s3719_s3  ;;  %v3539_v16 = vld [vmem:[%s4731_s4 + $0x10] sm:$0xff]  }
 0x1b7   :  { %1290 = vrot.lane.b32.xlu0 %v1288_v18, %s3719_s3  ;;  %3318 = vmatpush3.bf16.msra.mxu1 %v3539_v16 }
 0x1ba   :  { %925 = vrot.lane.b32.xlu1 %v924_v20, %s3720_s30  ;;  %v1034_v20 = vrot.slane %v1032_v13, 2  ;;  %v1268_v13 = vld [vmem:[#allocation2 + $0x72] sm:$0x3] }
 0x1bb   :  { %1317 = vrot.lane.b32.xlu0 %v1315_v21, %s3719_s3  ;;  %v898_v21 = vrot.slane %v896_v14, 4 }
 0x1be   :  { %939 = vrot.lane.b32.xlu1 %v938_v24, %s3720_s30  ;;  %v647_v24 = vld [vmem:[#allocation2 + $0xc] sm:$0x3] }
 0x1bf   :  { %1074 = vrot.lane.b32.xlu0 %v1072_v25, %s3719_s3  ;;  %v3540_v25 = vld [vmem:[%s4731_s4 + $0x58] sm:$0xff]  }
 0x1c0   :  { %3319 = vmatprep.subr.bf16.mxu1 %v3540_v25 }
 0x1c1   :  { %3320 = vmatpush3.bf16.msra.mxu1 %v3541_v26  ;;  %v1119_v26 = vld [vmem:[#allocation2 + $0x68] sm:$0x3] }
 0x1c2   :  { %952 = vrot.lane.b32.xlu1 %v951_v27, %s3720_s30 }
 0x1c3   :  { %1101 = vrot.lane.b32.xlu0 %v1099_v59, %s3719_s3 }
 0x1c6   :  { %966 = vrot.lane.b32.xlu1 %v965_v28, %s3720_s30  ;;  %v649_v28 = vrot.slane %v647_v24, 4 }
 0x1c7   :  { %1350 = vrot.lane.b32.xlu0 %v1348_v31, %s3720_s30  ;;  %v1059_v31 = vld [vmem:[#allocation2 + $0x66] sm:$0x3] }
 0x1ca   :  { %706 = vrot.lane.b32.xlu1 %v705_v36, %s3720_s30  ;;  %v3542_v36 = vld [vmem:[%s4731_s4 + $0x60] sm:$0xff]  }
 0x1cb   :  { %1377 = vrot.lane.b32.xlu0 %v1375_v38, %s3720_s30  ;;  %v3543_v38 = vld [vmem:[%s4731_s4 + $0x20] sm:$0xff]   ;;  %3321 = vmatprep.subr.bf16.mxu1 %v3542_v36  ;;  %v1354_v36 = vld [vmem:[#allocation2 + $0x3a] sm:$0x3] }
 0x1cc   :  { %3322 = vmatpush3.bf16.msra.mxu1 %v3543_v38  ;;  %v1301_v38 = vld [vmem:[#allocation2 + $0x3c] sm:$0x3] }
 0x1cd   :  { %3323 = vmatprep.subr.bf16.mxu1 %v3544_v49 }
 0x1ce   :  { %722 = vrot.lane.b32.xlu1 %v721_v41, %s3720_s30 }
 0x1cf   :  { %1134 = vrot.lane.b32.xlu0 %v1132_v42, %s3720_s30  ;;  %v1061_v42 = vrot.slane %v1059_v31, 2  ;;  %v1121_v31 = vrot.slane %v1119_v26, 2 }
 0x1d2   :  { %736 = vrot.lane.b32.xlu1 %v735_v46, %s3720_s30  ;;  %v1294_v46 = vld [vmem:[#allocation2 + $0x38] sm:$0x3] }
 0x1d3   :  { %1161 = vrot.lane.b32.xlu0 %v1159_v47, %s3720_s30  ;;  %v929_v47 = vld [vmem:[#allocation2 + $0x1e] sm:$0x3]  ;;  %v1296_v54 = vrot.slane %v1294_v46, 6  ;;  %v1368_v46 = vld [vmem:[#allocation2 + $0x56] sm:$0x3] }
 0x1d6   :  { %750 = vrot.lane.b32.xlu1 %v749_v50, %s3720_s30  ;;  %v3545_v50 = vld [vmem:[%s4731_s4 + $0x28] sm:$0xff]  }
 0x1d7   :  { %1284 = vrot.lane.b32.xlu0 %v1282_v52, %s3718_s2  ;;  %3324 = vmatpush3.bf16.msra.mxu1 %v3545_v50 }
 0x1d8   :  { %3325 = vmatprep.subr.bf16.mxu1 %v3546_v61 }
 0x1da   :  { %1237 = vrot.lane.b32.xlu1 %v1236_v56, %s3718_s2  ;;  %v931_v56 = vrot.slane %v929_v47, 4  ;;  %v1328_v47 = vld [vmem:[#allocation2 + $0x74] sm:$0x3] }
 0x1db   :  { %805 = vrot.lane.b32.xlu0 %v804_v57, %s3718_s2  ;;  %v1308_v57 = vld [vmem:[#allocation2 + $0x54] sm:$0x3] }
 0x1dc   :  { %v629_v22 = vpop.permute.xlu1 %628 }
 0x1dd   :  { %v799_v40 = vpop.permute.xlu0 %798  ;;  %631 = vst.msk [vmem:[#allocation3 + $0x40] sm:$0x3] %vm573_vm4, %v629_v22  ;;  %v3547_v22 = vld [vmem:[%s4731_s4 + $0x30] sm:$0xff]  }
 0x1de   :  { %801 = vst.msk [vmem:[#allocation3 + $0x8] sm:$0x3] %vm573_vm4, %v799_v40  ;;  %1251 = vrot.lane.b32.xlu1 %v1250_v4, %s3718_s2  ;;  %3326 = vmatpush3.bf16.msra.mxu1 %v3547_v22 }
 0x1df   :  { %839 = vrot.lane.b32.xlu0 %v838_v34, %s3718_s2  ;;  %v1310_v34 = vrot.slane %v1308_v57, 2 }
 0x1e0   :  { %v693_v55 = vpop.permute.xlu1 %692 }
 0x1e1   :  { %v826_v63 = vpop.permute.xlu0 %825  ;;  %695 = vst.msk [vmem:[#allocation3 + $0x40] sm:$0x3] %vm637_vm5, %v693_v55  ;;  %v711_v55 = vld [vmem:[#allocation2 + $0xe] sm:$0x3] }
 0x1e2   :  { %828 = vst.msk [vmem:[#allocation3 + $0x28] sm:$0x3] %vm573_vm4, %v826_v63  ;;  %1264 = vrot.lane.b32.xlu1 %v1263_v0, %s3718_s2  ;;  %v3548_v63 = vld [vmem:[%s4731_s4 + $0x78] sm:$0xff]   ;;  %v713_v10 = vrot.slane %v711_v55, 4 }
 0x1e3   :  { %586 = vrot.lane.b32.xlu0 %v585_v1, %s3718_s2  ;;  %v3549_v0 = vld [vmem:[%s4731_s4 + $0x38] sm:$0xff]   ;;  %3327 = vmatprep.subr.bf16.mxu1 %v3548_v63  ;;  %v1138_v63 = vld [vmem:[#allocation2 + $0x2a] sm:$0x3] }
 0x1e4   :  { %v757_v29 = vpop.permute.xlu1 %756  ;;  %3328 = vmatpush3.bf16.msra.mxu1 %v3549_v0  ;;  %v1361_v0 = vld [vmem:[#allocation2 + $0x3e] sm:$0x3] }
 0x1e5   :  { %v571_v5 = vpop.permute.xlu0 %570  ;;  %759 = vst.msk [vmem:[#allocation3 + $0x40] sm:$0x3] %vm701_vm6, %v757_v29  ;;  %v740_v29 = vld [vmem:[#allocation2 + $0x46] sm:$0x3] }
 0x1e6   :  { %574 = vst.msk [vmem:[#allocation3] sm:$0x3] %vm573_vm4, %v571_v5  ;;  %1278 = vrot.lane.b32.xlu1 %v1277_v60, %s3718_s2  ;;  %v742_v17 = vrot.slane %v740_v29, 4  ;;  %v1388_v29 = vld [vmem:[#allocation2 + $0x76] sm:$0x3] }
 0x1e7   :  { %615 = vrot.lane.b32.xlu0 %v614_v6, %s3718_s2  ;;  %v1337_v6 = vrot.slane %v1335_v3, 2  ;;  %v1152_v3 = vld [vmem:[#allocation2 + $0x46] sm:$0x3] }
 0x1e8   :  { %v1069_v8 = vpop.permute.xlu1 %1068 }
 0x1e9   :  { %v602_v9 = vpop.permute.xlu0 %601  ;;  %1071 = vst.msk [vmem:[#allocation3 + $0x50] sm:$0x3] %vm573_vm4, %v1069_v8 }
 0x1ea   :  { %604 = vst.msk [vmem:[#allocation3 + $0x20] sm:$0x3] %vm573_vm4, %v602_v9  ;;  %1021 = vrot.lane.b32.xlu1 %v1020_v11, %s3718_s2  ;;  %v1080_v9 = vrot.slane %v1078_v37, 6  ;;  %v1243_v11 = vrot.slane %v1241_v35, 4  ;;  %v1165_v37 = vld [vmem:[#allocation2 + $0x4e] sm:$0x3] }
 0x1eb   :  { %872 = vrot.lane.b32.xlu0 %v871_v12, %s3719_s3  ;;  %v1092_v12 = vld [vmem:[#allocation2 + $0x44] sm:$0x3]  ;;  %v1145_v35 = vld [vmem:[#allocation2 + $0x2e] sm:$0x3] }
 0x1ec   :  { %v813_v18 = vpop.permute.xlu1 %812  ;;  %v1094_v16 = vrot.slane %v1092_v12, 2  ;;  %v1179_v12 = vld [vmem:[#allocation2 + $0x6a] sm:$0x3] }
 0x1ed   :  { %v859_v19 = vpop.permute.xlu0 %858  ;;  %815 = vst.msk [vmem:[#allocation3 + $0x8] sm:$0x30] %vm589_vm7, %v813_v18  ;;  %v1270_v18 = vrot.slane %v1268_v13, 4  ;;  %v1172_v13 = vld [vmem:[#allocation2 + $0x66] sm:$0x3] }
 0x1ee   :  { %861 = vst.msk [vmem:[#allocation3 + $0x8] sm:$0x3] %vm637_vm5, %v859_v19  ;;  %1035 = vrot.lane.b32.xlu1 %v1034_v20, %s3718_s2  ;;  %v1105_v19 = vld [vmem:[#allocation2 + $0x4c] sm:$0x3]  ;;  %v1025_v20 = vld [vmem:[#allocation2 + $0x2a] sm:$0x3] }
 0x1ef   :  { %899 = vrot.lane.b32.xlu0 %v898_v21, %s3719_s3  ;;  %v1107_v24 = vrot.slane %v1105_v19, 6  ;;  %v1027_v25 = vrot.slane %v1025_v20, 4  ;;  %v1174_v19 = vrot.slane %v1172_v13, 4  ;;  %v1416_v13 = vld [vmem:[#allocation3 + $0x40] sm:$0xff] }
 0x1f0   :  { %v820_v27 = vpop.permute.xlu1 %819 }
 0x1f1   :  { %v886_v59 = vpop.permute.xlu0 %885  ;;  %822 = vst.msk [vmem:[#allocation3 + $0x8] sm:$0xc0] %vm597_vm8, %v820_v27  ;;  %v1052_v27 = vld [vmem:[#allocation2 + $0x62] sm:$0x3] }
 0x1f2   :  { %888 = vst.msk [vmem:[#allocation3 + $0x28] sm:$0x3] %vm637_vm5, %v886_v59  ;;  %1048 = vrot.lane.b32.xlu1 %v1047_v45, %s3718_s2  ;;  %v3550_v59 = vld [vmem:[%s4731_s4 + $0xc0] sm:$0xff]   ;;  %v1054_v33 = vrot.slane %v1052_v27, 4  ;;  %v1186_v27 = vld [vmem:[#allocation2 + $0x6e] sm:$0x3] }
 0x1f3   :  { %650 = vrot.lane.b32.xlu0 %v649_v28, %s3719_s3  ;;  %3341 = vmatprep.subr.bf16.mxu1 %v3550_v59  ;;  %v1402_v59 = vld [vmem:[#allocation2 + $0x7e] sm:$0x3] }
 0x1f4   :  { %v833_v39 = vpop.permute.xlu1 %832 }
 0x1f5   :  { %v635_v41 = vpop.permute.xlu0 %634  ;;  %835 = vst.msk [vmem:[#allocation3 + $0x28] sm:$0xc] %vm581_vm9, %v833_v39 }
 0x1f6   :  { %638 = vst.msk [vmem:[#allocation3] sm:$0x3] %vm637_vm5, %v635_v41  ;;  %1062 = vrot.lane.b32.xlu1 %v1061_v42, %s3718_s2  ;;  %v1356_v42 = vrot.slane %v1354_v36, 6 }
 0x1f7   :  { %679 = vrot.lane.b32.xlu0 %v678_v43, %s3719_s3  ;;  %v1303_v43 = vrot.slane %v1301_v38, 4 }
 0x1f8   :  { %v847_v52 = vpop.permute.xlu1 %846 }
 0x1f9   :  { %v666_v53 = vpop.permute.xlu0 %665  ;;  %849 = vst.msk [vmem:[#allocation3 + $0x28] sm:$0xc0] %vm597_vm8, %v847_v52  ;;  %v1370_v52 = vrot.slane %v1368_v46, 2 }
 0x1fa   :  { %668 = vst.msk [vmem:[#allocation3 + $0x20] sm:$0x3] %vm637_vm5, %v666_v53  ;;  %1297 = vrot.lane.b32.xlu1 %v1296_v54, %s3719_s3  ;;  %v1330_v53 = vrot.slane %v1328_v47, 4  ;;  %v1381_v54 = vld [vmem:[#allocation2 + $0x5e] sm:$0x3] }
 0x1fb   :  { %932 = vrot.lane.b32.xlu0 %v931_v56, %s3720_s30  ;;  %v1085_v56 = vld [vmem:[#allocation2 + $0x2c] sm:$0x3]  ;;  %v1383_v61 = vrot.slane %v1381_v54, 6 }
 0x1fc   :  { %v579_v40 = vpop.permute.xlu1 %578  ;;  %v1087_v22 = vrot.slane %v1085_v56, 4 }
 0x1fd   :  { %v919_v4 = vpop.permute.xlu0 %918  ;;  %582 = vst.msk [vmem:[#allocation3] sm:$0xc] %vm581_vm9, %v579_v40  ;;  %v1395_v40 = vld [vmem:[#allocation2 + $0x7a] sm:$0x3] }
 0x1fe   :  { %921 = vst.msk [vmem:[#allocation3 + $0x8] sm:$0x3] %vm701_vm6, %v919_v4  ;;  %1311 = vrot.lane.b32.xlu1 %v1310_v34, %s3719_s3  ;;  %v1112_v4 = vld [vmem:[#allocation2 + $0x64] sm:$0x3]  ;;  %v1397_v62 = vrot.slane %v1395_v40, 2 }
 0x1ff   :  { %959 = vrot.lane.b32.xlu0 %v958_v51, %s3720_s30  ;;  %v1114_v55 = vrot.slane %v1112_v4, 4 }
 0x200   :  { %v595_v1 = vpop.permute.xlu1 %594 }
 0x201   :  { %v946_v44 = vpop.permute.xlu0 %945  ;;  %598 = vst.msk [vmem:[#allocation3] sm:$0xc0] %vm597_vm8, %v595_v1 }
 0x202   :  { %948 = vst.msk [vmem:[#allocation3 + $0x28] sm:$0x3] %vm701_vm6, %v946_v44  ;;  %1324 = vrot.lane.b32.xlu1 %v1323_v2, %s3719_s3  ;;  %v1140_v2 = vrot.slane %v1138_v63, 6 }
 0x203   :  { %714 = vrot.lane.b32.xlu0 %v713_v10, %s3720_s30  ;;  %v1363_v10 = vrot.slane %v1361_v0, 4 }
 0x204   :  { %v609_v5 = vpop.permute.xlu1 %608 }
 0x205   :  { %v699_v60 = vpop.permute.xlu0 %698  ;;  %611 = vst.msk [vmem:[#allocation3 + $0x20] sm:$0xc] %vm581_vm9, %v609_v5 }
 0x206   :  { %702 = vst.msk [vmem:[#allocation3] sm:$0x3] %vm701_vm6, %v699_v60  ;;  %1338 = vrot.lane.b32.xlu1 %v1337_v6, %s3719_s3  ;;  %v1154_v6 = vrot.slane %v1152_v3, 2 }
 0x207   :  { %743 = vrot.lane.b32.xlu0 %v742_v17, %s3720_s30  ;;  %v1390_v17 = vrot.slane %v1388_v29, 4 }
 0x208   :  { %v623_v7 = vpop.permute.xlu1 %622 }
 0x209   :  { %v730_v8 = vpop.permute.xlu0 %729  ;;  %625 = vst.msk [vmem:[#allocation3 + $0x20] sm:$0xc0] %vm597_vm8, %v623_v7 }
 0x20a   :  { %732 = vst.msk [vmem:[#allocation3 + $0x20] sm:$0x3] %vm701_vm6, %v730_v8  ;;  %1081 = vrot.lane.b32.xlu1 %v1080_v9, %s3719_s3  ;;  %v1167_v9 = vrot.slane %v1165_v37, 6 }
 0x20b   :  { %1244 = vrot.lane.b32.xlu0 %v1243_v11, %s3718_s2  ;;  %v1147_v11 = vrot.slane %v1145_v35, 4  ;;  %v3552_v35 = vld [vmem:[%s4731_s4 + $0xc8] sm:$0xff]  }
 0x20c   :  { %v4197_v14 = vpop.permute.xlu1 %865 }
 0x20d   :  { %v853_v15 = vpop.permute.xlu0 %852 }
 0x20e   :  { %855 = vst.msk [vmem:[#allocation3 + $0x48] sm:$0x3] %vm573_vm4, %v853_v15  ;;  %1095 = vrot.lane.b32.xlu1 %v1094_v16, %s3719_s3 }
 0x20f   :  { %1271 = vrot.lane.b32.xlu0 %v1270_v18, %s3718_s2  ;;  %v1181_v18 = vrot.slane %v1179_v12, 2  ;;  %v3554_v12 = vld [vmem:[%s4731_s4 + $0xd0] sm:$0xff]  }
 0x210   :  { %v880_v21 = vpop.permute.xlu1 %879 }
 0x211   :  { %v913_v23 = vpop.permute.xlu0 %912  ;;  %882 = vst.msk [vmem:[#allocation3 + $0x8] sm:$0xc0] %vm661_vm10, %v880_v21 }
 0x212   :  { %915 = vst.msk [vmem:[#allocation3 + $0x48] sm:$0x3] %vm637_vm5, %v913_v23  ;;  %1108 = vrot.lane.b32.xlu1 %v1107_v24, %s3719_s3  ;;  %v1126_v23 = vld [vmem:[#allocation2 + $0x6c] sm:$0x3]  ;;  %v1342_v24 = vld [vmem:[#allocation2 + $0x7c] sm:$0x3] }
 0x213   :  { %1028 = vrot.lane.b32.xlu0 %v1027_v25, %s3718_s2 }
 0x214   :  { %v893_v45 = vpop.permute.xlu1 %892 }
 0x215   :  { %v973_v28 = vpop.permute.xlu0 %972  ;;  %895 = vst.msk [vmem:[#allocation3 + $0x28] sm:$0xc] %vm645_vm11, %v893_v45 }
 0x216   :  { %975 = vst.msk [vmem:[#allocation3 + $0x48] sm:$0x3] %vm701_vm6, %v973_v28  ;;  %1122 = vrot.lane.b32.xlu1 %v1121_v31, %s3719_s3 }
 0x217   :  { %1055 = vrot.lane.b32.xlu0 %v1054_v33, %s3718_s2 }
 0x218   :  { %v907_v39 = vpop.permute.xlu1 %906 }
 0x219   :  { %v1231_v41 = vpop.permute.xlu0 %1230  ;;  %909 = vst.msk [vmem:[#allocation3 + $0x28] sm:$0xc0] %vm661_vm10, %v907_v39 }
 0x21a   :  { %1233 = vst.msk [vmem:[#allocation3 + $0x18] sm:$0x3] %vm573_vm4, %v1231_v41  ;;  %1357 = vrot.lane.b32.xlu1 %v1356_v42, %s3720_s30 }
 0x21b   :  { %1304 = vrot.lane.b32.xlu0 %v1303_v43, %s3719_s3 }
 0x21c   :  { %v643_v49 = vpop.permute.xlu1 %642 }
 0x21d   :  { %v1258_v50 = vpop.permute.xlu0 %1257  ;;  %646 = vst.msk [vmem:[#allocation3] sm:$0xc] %vm645_vm11, %v643_v49  ;;  %v1417_v3 = vld [vmem:[#allocation3 + $0x48] sm:$0xff] }
 0x21e   :  { %1260 = vst.msk [vmem:[#allocation3 + $0x38] sm:$0x3] %vm573_vm4, %v1258_v50  ;;  %1371 = vrot.lane.b32.xlu1 %v1370_v52, %s3720_s30 }
 0x21f   :  { %1331 = vrot.lane.b32.xlu0 %v1330_v53, %s3719_s3 }
 0x220   :  { %v659_v57 = vpop.permute.xlu1 %658 }
 0x221   :  { %v1015_v58 = vpop.permute.xlu0 %1014  ;;  %662 = vst.msk [vmem:[#allocation3] sm:$0xc0] %vm661_vm10, %v659_v57 }
 0x222   :  { %1017 = vst.msk [vmem:[#allocation3 + $0x10] sm:$0x3] %vm573_vm4, %v1015_v58  ;;  %1384 = vrot.lane.b32.xlu1 %v1383_v61, %s3720_s30 }
 0x223   :  { %1088 = vrot.lane.b32.xlu0 %v1087_v22, %s3719_s3 }
 0x224   :  { %v673_v34 = vpop.permute.xlu1 %672 }
 0x225   :  { %v1042_v51 = vpop.permute.xlu0 %1041  ;;  %675 = vst.msk [vmem:[#allocation3 + $0x20] sm:$0xc] %vm645_vm11, %v673_v34 }
 0x226   :  { %1044 = vst.msk [vmem:[#allocation3 + $0x30] sm:$0x3] %vm573_vm4, %v1042_v51  ;;  %1398 = vrot.lane.b32.xlu1 %v1397_v62, %s3720_s30 }
 0x227   :  { %1115 = vrot.lane.b32.xlu0 %v1114_v55, %s3719_s3 }
 0x228   :  { %v687_v1 = vpop.permute.xlu1 %686 }
 0x229   :  { %v1291_v44 = vpop.permute.xlu0 %1290  ;;  %689 = vst.msk [vmem:[#allocation3 + $0x20] sm:$0xc0] %vm661_vm10, %v687_v1 }
 0x22a   :  { %1293 = vst.msk [vmem:[#allocation3 + $0x18] sm:$0x3] %vm637_vm5, %v1291_v44  ;;  %1141 = vrot.lane.b32.xlu1 %v1140_v2, %s3720_s30 }
 0x22b   :  { %1364 = vrot.lane.b32.xlu0 %v1363_v10, %s3720_s30 }
 0x22c   :  { %v926_v5 = vpop.permute.xlu1 %925 }
 0x22d   :  { %v1318_v60 = vpop.permute.xlu0 %1317 }
 0x22e   :  { %1320 = vst.msk [vmem:[#allocation3 + $0x38] sm:$0x3] %vm637_vm5, %v1318_v60  ;;  %1155 = vrot.lane.b32.xlu1 %v1154_v6, %s3720_s30 }
 0x22f   :  { %1391 = vrot.lane.b32.xlu0 %v1390_v17, %s3720_s30  ;;  %v3551_v17 = vld [vmem:[%s4731_s4 + $0x80] sm:$0xff]  }
 0x230   :  { %v940_v7 = vpop.permute.xlu1 %939 }
 0x231   :  { %v1075_v8 = vpop.permute.xlu0 %1074  ;;  %942 = vst.msk [vmem:[#allocation3 + $0x8] sm:$0xc0] %vm725_vm12, %v940_v7  ;;  %v1425_v7 = vpack.c.bf16 %v1417_v3, %v1417_v3  ;;  %v3569_v3 = vld [vmem:[%s4734_s7 + $0x8] sm:$0xff]  }
 0x232   :  { %1077 = vst.msk [vmem:[#allocation3 + $0x10] sm:$0x3] %vm637_vm5, %v1075_v8  ;;  %1168 = vrot.lane.b32.xlu1 %v1167_v9, %s3720_s30 }
 0x233   :  { %1148 = vrot.lane.b32.xlu0 %v1147_v11, %s3720_s30  ;;  %v3553_v11 = vld [vmem:[%s4731_s4 + $0x88] sm:$0xff]  }
 0x234   :  { %v953_v15 = vpop.permute.xlu1 %952 }
 0x235   :  { %v1102_v16 = vpop.permute.xlu0 %1101  ;;  %955 = vst.msk [vmem:[#allocation3 + $0x28] sm:$0xc] %vm709_vm13, %v953_v15 }
 0x236   :  { %1104 = vst.msk [vmem:[#allocation3 + $0x30] sm:$0x3] %vm637_vm5, %v1102_v16  ;;  %1182 = vrot.lane.b32.xlu1 %v1181_v18, %s3720_s30  ;;  %v3555_v18 = vld [vmem:[%s4731_s4 + $0x90] sm:$0xff]  }
 0x237   :  { %1175 = vrot.lane.b32.xlu0 %v1174_v19, %s3720_s30  ;;  %v1424_v19 = vpack.c.bf16 %v1416_v13, %v1416_v13 }
 0x238   :  { %v967_v20 = vpop.permute.xlu1 %966 }
 0x239   :  { %v1351_v21 = vpop.permute.xlu0 %1350  ;;  %969 = vst.msk [vmem:[#allocation3 + $0x28] sm:$0xc0] %vm725_vm12, %v967_v20  ;;  %v3556_v20 = vld [vmem:[%s4731_s4 + $0xd8] sm:$0xff]  }
 0x23a   :  { %1353 = vst.msk [vmem:[#allocation3 + $0x18] sm:$0x3] %vm701_vm6, %v1351_v21  ;;  %1128 = vrot.lane.b32.xlu1 %v1126_v23, %s3719_s3 }
 0x23b   :  { %1344 = vrot.lane.b32.xlu0 %v1342_v24, %s3719_s3  ;;  %v3557_v24 = vld [vmem:[%s4731_s4 + $0x98] sm:$0xff]  }
 0x23c   :  { %v707_v25 = vpop.permute.xlu1 %706 }
 0x23d   :  { %v1378_v26 = vpop.permute.xlu0 %1377  ;;  %710 = vst.msk [vmem:[#allocation3] sm:$0xc] %vm709_vm13, %v707_v25  ;;  %v3558_v25 = vld [vmem:[%s4731_s4 + $0xe0] sm:$0xff]  }
 0x23e   :  { %1380 = vst.msk [vmem:[#allocation3 + $0x38] sm:$0x3] %vm701_vm6, %v1378_v26  ;;  %1188 = vrot.lane.b32.xlu1 %v1186_v27, %s3720_s30 }
 0x23f   :  { %1404 = vrot.lane.b32.xlu0 %v1402_v59, %s3720_s30  ;;  %v3559_v59 = vld [vmem:[%s4731_s4 + $0xa0] sm:$0xff]  }
 0x240   :  { %v723_v45 = vpop.permute.xlu1 %722 }
 0x241   :  { %v1135_v28 = vpop.permute.xlu0 %1134  ;;  %726 = vst.msk [vmem:[#allocation3] sm:$0xc0] %vm725_vm12, %v723_v45  ;;  %v3560_v45 = vld [vmem:[%s4731_s4 + $0xe8] sm:$0xff]  }
 0x242   :  { %1137 = vst.msk [vmem:[#allocation3 + $0x10] sm:$0x3] %vm701_vm6, %v1135_v28 }
 0x244   :  { %v737_v31 = vpop.permute.xlu1 %736 }
 0x245   :  { %v1162_v33 = vpop.permute.xlu0 %1161  ;;  %739 = vst.msk [vmem:[#allocation3 + $0x20] sm:$0xc] %vm709_vm13, %v737_v31 }
 0x246   :  { %1164 = vst.msk [vmem:[#allocation3 + $0x30] sm:$0x3] %vm701_vm6, %v1162_v33  ;;  %v3561_v33 = vld [vmem:[%s4731_s4 + $0xa8] sm:$0xff]  }
 0x248   :  { %v751_v36 = vpop.permute.xlu1 %750 }
 0x249   :  { %v1285_v38 = vpop.permute.xlu0 %1284  ;;  %753 = vst.msk [vmem:[#allocation3 + $0x20] sm:$0xc0] %vm725_vm12, %v751_v36  ;;  %v3562_v36 = vld [vmem:[%s4731_s4 + $0xf0] sm:$0xff]  }
 0x24a   :  { %1287 = vst.msk [vmem:[#allocation3 + $0x58] sm:$0x3] %vm573_vm4, %v1285_v38 }
 0x24c   :  { %v1238_v39 = vpop.permute.xlu1 %1237 }
 0x24d   :  { %v806_v41 = vpop.permute.xlu0 %805  ;;  %1240 = vst.msk [vmem:[#allocation3 + $0x18] sm:$0xc] %vm581_vm9, %v1238_v39 }
 0x24e   :  { %808 = vst.msk [vmem:[#allocation3 + $0x8] sm:$0xc] %vm581_vm9, %v806_v41  ;;  %v3563_v41 = vld [vmem:[%s4731_s4 + $0xb0] sm:$0xff]  }
 0x24f   :  { %868 = vst.msk [vmem:[#allocation3 + $0x8] sm:$0xc] %vm645_vm11, %v4197_v14 }
 0x250   :  { %928 = vst.msk [vmem:[#allocation3 + $0x8] sm:$0xc] %vm709_vm13, %v926_v5  ;;  %v1252_v42 = vpop.permute.xlu1 %1251 }
 0x251   :  { %v840_v43 = vpop.permute.xlu0 %839  ;;  %1254 = vst.msk [vmem:[#allocation3 + $0x18] sm:$0xc0] %vm597_vm8, %v1252_v42  ;;  %v3564_v42 = vld [vmem:[%s4731_s4 + $0xf8] sm:$0xff]  }
 0x252   :  { %842 = vst.msk [vmem:[#allocation3 + $0x28] sm:$0x30] %vm589_vm7, %v840_v43 }
 0x254   :  { %v1265_v46 = vpop.permute.xlu1 %1264 }
 0x255   :  { %v587_v47 = vpop.permute.xlu0 %586  ;;  %1267 = vst.msk [vmem:[#allocation3 + $0x38] sm:$0xc] %vm581_vm9, %v1265_v46 }
 0x256   :  { %590 = vst.msk [vmem:[#allocation3] sm:$0x30] %vm589_vm7, %v587_v47  ;;  %v3565_v47 = vld [vmem:[%s4731_s4 + $0xb8] sm:$0xff]  }
 0x258   :  { %v1279_v49 = vpop.permute.xlu1 %1278 }
 0x259   :  { %v616_v50 = vpop.permute.xlu0 %615  ;;  %1281 = vst.msk [vmem:[#allocation3 + $0x38] sm:$0xc0] %vm597_vm8, %v1279_v49 }
 0x25a   :  { %618 = vst.msk [vmem:[#allocation3 + $0x20] sm:$0x30] %vm589_vm7, %v616_v50 }
 0x25c   :  { %v1022_v14 = vpop.permute.xlu1 %1021 }
 0x25d   :  { %v873_v52 = vpop.permute.xlu0 %872  ;;  %1024 = vst.msk [vmem:[#allocation3 + $0x10] sm:$0xc] %vm581_vm9, %v1022_v14 }
 0x25e   :  { %875 = vst.msk [vmem:[#allocation3 + $0x8] sm:$0x30] %vm653_vm14, %v873_v52 }
 0x260   :  { %v1036_v53 = vpop.permute.xlu1 %1035 }
 0x261   :  { %v900_v54 = vpop.permute.xlu0 %899  ;;  %1038 = vst.msk [vmem:[#allocation3 + $0x10] sm:$0xc0] %vm597_vm8, %v1036_v53 }
 0x262   :  { %902 = vst.msk [vmem:[#allocation3 + $0x28] sm:$0x30] %vm653_vm14, %v900_v54 }
 0x264   :  { %v1049_v56 = vpop.permute.xlu1 %1048 }
 0x265   :  { %v651_v57 = vpop.permute.xlu0 %650  ;;  %1051 = vst.msk [vmem:[#allocation3 + $0x30] sm:$0xc] %vm581_vm9, %v1049_v56 }
 0x266   :  { %654 = vst.msk [vmem:[#allocation3] sm:$0x30] %vm653_vm14, %v651_v57 }
 0x268   :  { %v1063_v58 = vpop.permute.xlu1 %1062 }
 0x269   :  { %v680_v61 = vpop.permute.xlu0 %679  ;;  %1065 = vst.msk [vmem:[#allocation3 + $0x30] sm:$0xc0] %vm597_vm8, %v1063_v58 }
 0x26a   :  { %682 = vst.msk [vmem:[#allocation3 + $0x20] sm:$0x30] %vm653_vm14, %v680_v61 }
 0x26c   :  { %v1298_v22 = vpop.permute.xlu1 %1297 }
 0x26d   :  { %v933_v40 = vpop.permute.xlu0 %932  ;;  %1300 = vst.msk [vmem:[#allocation3 + $0x18] sm:$0xc] %vm645_vm11, %v1298_v22 }
 0x26e   :  { %935 = vst.msk [vmem:[#allocation3 + $0x8] sm:$0x30] %vm717_vm15, %v933_v40 }
 0x270   :  { %v1312_v4 = vpop.permute.xlu1 %1311 }
 0x271   :  { %v960_v34 = vpop.permute.xlu0 %959  ;;  %1314 = vst.msk [vmem:[#allocation3 + $0x18] sm:$0xc0] %vm661_vm10, %v1312_v4 }
 0x272   :  { %962 = vst.msk [vmem:[#allocation3 + $0x28] sm:$0x30] %vm717_vm15, %v960_v34 }
 0x274   :  { %v1325_v51 = vpop.permute.xlu1 %1324 }
 0x275   :  { %v715_v62 = vpop.permute.xlu0 %714  ;;  %1327 = vst.msk [vmem:[#allocation3 + $0x38] sm:$0xc] %vm645_vm11, %v1325_v51  ;;  %v1409_v0 = vld [vmem:[#allocation3 + $0x8] sm:$0xff] }
 0x276   :  { %718 = vst.msk [vmem:[#allocation3] sm:$0x30] %vm717_vm15, %v715_v62 }
 0x278   :  { %v1339_v55 = vpop.permute.xlu1 %1338 }
 0x279   :  { %v744_v63 = vpop.permute.xlu0 %743  ;;  %v1413_v1 = vld [vmem:[#allocation3 + $0x28] sm:$0xff]  ;;  %1341 = vst.msk [vmem:[#allocation3 + $0x38] sm:$0xc0] %vm661_vm10, %v1339_v55 }
 0x27a   :  { %746 = vst.msk [vmem:[#allocation3 + $0x20] sm:$0x30] %vm717_vm15, %v744_v63  ;;  %v1421_v44 = vpack.c.bf16 %v1413_v1, %v1409_v0 }
 0x27c   :  { %1716 = vmatprep.mubr.bf16.mxu1 %v1421_v44  ;;  %v1082_v2 = vpop.permute.xlu1 %1081  ;;  %v3566_v44 = vld [vmem:[%s4734_s7 + $0x40] sm:$0xff]  }
 0x27d   :  { %v1245_v10 = vpop.permute.xlu0 %1244  ;;  %1084 = vst.msk [vmem:[#allocation3 + $0x10] sm:$0xc] %vm645_vm11, %v1082_v2  ;;  %v1408_v60 = vld [vmem:[#allocation3] sm:$0xff]  ;;  %3369 = vmatprep.subr.bf16.mxu0 %v3566_v44 }
 0x27e   :  { %1247 = vst.msk [vmem:[#allocation3 + $0x18] sm:$0x30] %vm589_vm7, %v1245_v10  ;;  %v3567_v2 = vld [vmem:[%s4734_s7] sm:$0xff]   ;;  %v3568_v10 = vld [vmem:[%s4734_s7 + $0x48] sm:$0xff]  }
 0x27f   :  { %3370 = vmatpush3.bf16.msra.mxu0 %v3567_v2 }
 0x280   :  { %v1096_v29 = vpop.permute.xlu1 %1095  ;;  %3371 = vmatprep.subr.bf16.mxu0 %v3568_v10 }
 0x281   :  { %v1272_v5 = vpop.permute.xlu0 %1271  ;;  %v1412_v6 = vld [vmem:[#allocation3 + $0x20] sm:$0xff]  ;;  %1098 = vst.msk [vmem:[#allocation3 + $0x10] sm:$0xc0] %vm661_vm10, %v1096_v29 }
 0x282   :  { %1274 = vst.msk [vmem:[#allocation3 + $0x38] sm:$0x30] %vm589_vm7, %v1272_v5  ;;  %v1420_v37 = vpack.c.bf16 %v1412_v6, %v1408_v60  ;;  %v3576_v29 = vld [vmem:[%s4734_s7 + $0xc0] sm:$0xff]   ;;  %v3570_v60 = vld [vmem:[%s4734_s7 + $0x50] sm:$0xff]   ;;  %v3578_v6 = vld [vmem:[%s4734_s7 + $0xc8] sm:$0xff]  }
 0x283   :  { %v3577_v5 = vld [vmem:[%s4734_s7 + $0x80] sm:$0xff]   ;;  %3372 = vmatpush3.bf16.msra.mxu0 %v3569_v3 }
 0x284   :  { %1717 = vmatmul.mubr.bf16.vlgmr.msra.gmra.mrb[0].mxu1 %v1420_v37  ;;  %v1109_v8 = vpop.permute.xlu1 %1108  ;;  %v3571_v37 = vld [vmem:[%s4734_s7 + $0x10] sm:$0xff]   ;;  %3373 = vmatprep.subr.bf16.mxu0 %v3570_v60  ;;  %v1780_v60 = vld [vmem:[%s4732_s5] sm:$0x1] }
 0x285   :  { %v1029_v9 = vpop.permute.xlu0 %1028  ;;  %1724 = vmatprep.mubr.bf16.mxu1 %v1425_v7  ;;  %3342 = vmatpush3.bf16.msra.mxu1 %v3551_v17  ;;  %1111 = vst.msk [vmem:[#allocation3 + $0x30] sm:$0xc] %vm645_vm11, %v1109_v8  ;;  %v3580_v17 = vld [vmem:[%s4734_s7 + $0x88] sm:$0xff]   ;;  %v3572_v8 = vld [vmem:[%s4734_s7 + $0x58] sm:$0xff]  }
 0x286   :  { %1031 = vst.msk [vmem:[#allocation3 + $0x10] sm:$0x30] %vm589_vm7, %v1029_v9  ;;  %3343 = vmatprep.subr.bf16.mxu1 %v3552_v35  ;;  %v3582_v35 = vld [vmem:[%s4734_s7 + $0xd0] sm:$0xff]  }
 0x287   :  { %3374 = vmatpush3.bf16.msra.mxu0 %v3571_v37 }
 0x288   :  { %v1123_v15 = vpop.permute.xlu1 %1122  ;;  %3375 = vmatprep.subr.bf16.mxu0 %v3572_v8 }
 0x289   :  { %v1056_v16 = vpop.permute.xlu0 %1055  ;;  %3344 = vmatpush3.bf16.msra.mxu1 %v3553_v11  ;;  %1125 = vst.msk [vmem:[#allocation3 + $0x30] sm:$0xc0] %vm661_vm10, %v1123_v15  ;;  %v3573_v15 = vld [vmem:[%s4734_s7 + $0x18] sm:$0xff]  }
 0x28a   :  { %1058 = vst.msk [vmem:[#allocation3 + $0x30] sm:$0x30] %vm589_vm7, %v1056_v16  ;;  %3345 = vmatprep.subr.bf16.mxu1 %v3554_v12 }
 0x28b   :  { %3376 = vmatpush3.bf16.msra.mxu0 %v3573_v15 }
 0x28c   :  { %1725 = vmatmul.mubr.bf16.gmra.mrb[4].mxu1 %v1424_v19  ;;  %v1358_v21 = vpop.permute.xlu1 %1357  ;;  %v3575_v19 = vld [vmem:[%s4734_s7 + $0x20] sm:$0xff]  }
 0x28d   :  { %v1305_v23 = vpop.permute.xlu0 %1304  ;;  %3346 = vmatpush3.bf16.msra.mxu1 %v3555_v18  ;;  %1360 = vst.msk [vmem:[#allocation3 + $0x18] sm:$0xc] %vm709_vm13, %v1358_v21  ;;  %v3574_v18 = vld [vmem:[%s4734_s7 + $0x60] sm:$0xff]   ;;  %v3579_v21 = vld [vmem:[%s4734_s7 + $0x68] sm:$0xff]  }
 0x28e   :  { %1307 = vst.msk [vmem:[#allocation3 + $0x18] sm:$0x30] %vm653_vm14, %v1305_v23  ;;  %3347 = vmatprep.subr.bf16.mxu1 %v3556_v20  ;;  %3377 = vmatprep.subr.bf16.mxu0 %v3574_v18 }
 0x28f   :  { %3378 = vmatpush3.bf16.msra.mxu0 %v3575_v19  ;;  %v3584_v19 = vld [vmem:[%s4734_s7 + $0xd8] sm:$0xff]  }
 0x290   :  { %v1372_v26 = vpop.permute.xlu1 %1371  ;;  %3379 = vmatprep.subr.bf16.mxu0 %v3579_v21  ;;  %v3585_v21 = vld [vmem:[%s4734_s7 + $0x70] sm:$0xff]  }
 0x291   :  { %v1332_v27 = vpop.permute.xlu0 %1331  ;;  %3348 = vmatpush3.bf16.msra.mxu1 %v3557_v24  ;;  %1374 = vst.msk [vmem:[#allocation3 + $0x18] sm:$0xc0] %vm725_vm12, %v1372_v26 }
 0x292   :  { %1334 = vst.msk [vmem:[#allocation3 + $0x38] sm:$0x30] %vm653_vm14, %v1332_v27  ;;  %3349 = vmatprep.subr.bf16.mxu1 %v3558_v25  ;;  %v3581_v27 = vld [vmem:[%s4734_s7 + $0x28] sm:$0xff]  }
 0x293   :  { %3380 = vmatpush3.bf16.msra.mxu0 %v3581_v27 }
 0x294   :  { %v1385_v28 = vpop.permute.xlu1 %1384  ;;  %3381 = vmatprep.subr.bf16.mxu0 %v3585_v21  ;;  %v3621_v21 = vld [vmem:[%s4737_s10 + $0x44] ss:$16 sps:$4 sm:$0xff]  }
 0x295   :  { %v1089_v31 = vpop.permute.xlu0 %1088  ;;  %3350 = vmatpush3.bf16.msra.mxu1 %v3559_v59  ;;  %1387 = vst.msk [vmem:[#allocation3 + $0x38] sm:$0xc] %vm709_vm13, %v1385_v28 }
 0x296   :  { %1091 = vst.msk [vmem:[#allocation3 + $0x10] sm:$0x30] %vm653_vm14, %v1089_v31  ;;  %3351 = vmatprep.subr.bf16.mxu1 %v3560_v45 }
 0x298   :  { %v1399_v38 = vpop.permute.xlu1 %1398 }
 0x299   :  { %v1116_v39 = vpop.permute.xlu0 %1115  ;;  %3352 = vmatpush3.bf16.msra.mxu1 %v3561_v33  ;;  %1401 = vst.msk [vmem:[#allocation3 + $0x38] sm:$0xc0] %vm725_vm12, %v1399_v38 }
 0x29a   :  { %1118 = vst.msk [vmem:[#allocation3 + $0x30] sm:$0x30] %vm653_vm14, %v1116_v39  ;;  %3353 = vmatprep.subr.bf16.mxu1 %v3562_v36 }
 0x29c   :  { %v1142_v43 = vpop.permute.xlu1 %1141 }
 0x29d   :  { %v1365_v46 = vpop.permute.xlu0 %1364  ;;  %3354 = vmatpush3.bf16.msra.mxu1 %v3563_v41  ;;  %1144 = vst.msk [vmem:[#allocation3 + $0x10] sm:$0xc] %vm709_vm13, %v1142_v43 }
 0x29e   :  { %1367 = vst.msk [vmem:[#allocation3 + $0x18] sm:$0x30] %vm717_vm15, %v1365_v46  ;;  %3355 = vmatprep.subr.bf16.mxu1 %v3564_v42 }
 0x2a0   :  { %v1156_v49 = vpop.permute.xlu1 %1155 }
 0x2a1   :  { %v1392_v50 = vpop.permute.xlu0 %1391  ;;  %3356 = vmatpush3.bf16.msra.mxu1 %v3565_v47  ;;  %1158 = vst.msk [vmem:[#allocation3 + $0x10] sm:$0xc0] %vm725_vm12, %v1156_v49 }
 0x2a2   :  { %1394 = vst.msk [vmem:[#allocation3 + $0x38] sm:$0x30] %vm717_vm15, %v1392_v50  ;;  %3391 = vmatprep.subr.bf16.mxu1 %v3576_v29 }
 0x2a4   :  { %v1169_v14 = vpop.permute.xlu1 %1168 }
 0x2a5   :  { %v1149_v52 = vpop.permute.xlu0 %1148  ;;  %1171 = vst.msk [vmem:[#allocation3 + $0x30] sm:$0xc] %vm709_vm13, %v1169_v14  ;;  %v1411_v56 = vld [vmem:[#allocation3 + $0x18] sm:$0xff] }
 0x2a6   :  { %1151 = vst.msk [vmem:[#allocation3 + $0x10] sm:$0x30] %vm717_vm15, %v1149_v52 }
 0x2a8   :  { %v1183_v53 = vpop.permute.xlu1 %1182 }
 0x2a9   :  { %v1176_v54 = vpop.permute.xlu0 %1175  ;;  %v1415_v57 = vld [vmem:[#allocation3 + $0x38] sm:$0xff]  ;;  %1185 = vst.msk [vmem:[#allocation3 + $0x30] sm:$0xc0] %vm725_vm12, %v1183_v53 }
 0x2aa   :  { %1178 = vst.msk [vmem:[#allocation3 + $0x30] sm:$0x30] %vm717_vm15, %v1176_v54  ;;  %v1423_v58 = vpack.c.bf16 %v1415_v57, %v1411_v56 }
 0x2ac   :  { %1764 = vmatprep.mubr.bf16.mxu1 %v1423_v58  ;;  %v1129_v61 = vpop.permute.xlu1 %1128 }
 0x2ad   :  { %v1345_v22 = vpop.permute.xlu0 %1344  ;;  %1131 = vst.msk [vmem:[#allocation3 + $0x50] sm:$0x3] %vm637_vm5, %v1129_v61  ;;  %v1410_v34 = vld [vmem:[#allocation3 + $0x10] sm:$0xff] }
 0x2ae   :  { %1347 = vst.msk [vmem:[#allocation3 + $0x58] sm:$0x3] %vm637_vm5, %v1345_v22 }
 0x2b0   :  { %v1189_v40 = vpop.permute.xlu1 %1188 }
 0x2b1   :  { %v1405_v4 = vpop.permute.xlu0 %1404  ;;  %v1414_v51 = vld [vmem:[#allocation3 + $0x30] sm:$0xff]  ;;  %1191 = vst.msk [vmem:[#allocation3 + $0x50] sm:$0x3] %vm701_vm6, %v1189_v40 }
 0x2b2   :  { %1407 = vst.msk [vmem:[#allocation3 + $0x58] sm:$0x3] %vm701_vm6, %v1405_v4  ;;  %v1422_v62 = vpack.c.bf16 %v1414_v51, %v1410_v34 }
 0x2b4   :  { %1765 = vmatmul.mubr.bf16.vlgmr.msra.gmra.mrb[8].mxu1 %v1422_v62 }
 0x2b5   :  { %3392 = vmatpush3.bf16.msra.mxu1 %v3577_v5 }
 0x2b6   :  { %3393 = vmatprep.subr.bf16.mxu1 %v3578_v6 }
 0x2b8   :  { %v1418_v63 = vld [vmem:[#allocation3 + $0x50] sm:$0xff] }
 0x2b9   :  { %v1419_v55 = vld [vmem:[#allocation3 + $0x58] sm:$0xff]  ;;  %v1426_v1 = vpack.c.bf16 %v1418_v63, %v1418_v63  ;;  %3394 = vmatpush3.bf16.msra.mxu1 %v3580_v17  ;;  %v3721_v17 = vmov 1983009808  }
 0x2ba   :  { %v1427_v0 = vpack.c.bf16 %v1419_v55, %v1419_v55  ;;  %3395 = vmatprep.subr.bf16.mxu1 %v3582_v35  ;;  %v1838_v37 = vunpack.c.l.s4 %v3721_v17  ;;  %v3602_v17 = vld [vmem:[%s4734_s7 + $0x118] sm:$0xff]  }
 0x2bc   :  { %1772 = vmatprep.mubr.bf16.mxu1 %v1427_v0 }
 0x2bd   :  { %1773 = vmatmul.mubr.bf16.gmra.mrb[12].mxu1 %v1426_v1 }
 0x357   :  { %v3329_v7 = vpop.f32.mrb[0].mxu1 }
 0x358   :  { %v3330_v9 = vpop.f32.mrb[1].mxu1 }
 0x359   :  { %v3331_v11 = vadd.f32 %v3330_v9, %v3329_v7  ;;  %v3332_v12 = vpop.f32.mrb[2].mxu1  ;;  %v1781_v7 = vld [vmem:[%s4733_s6] sm:$0x1] }
 0x35a   :  { %v3333_v13 = vpop.f32.mrb[3].mxu1 }
 0x35b   :  { %v3334_v16 = vadd.f32 %v3333_v13, %v3332_v12  ;;  %v3583_v12 = vld [vmem:[%s4734_s7 + $0x90] sm:$0xff]  }
 0x35c   :  { %3396 = vmatpush3.bf16.msra.mxu1 %v3583_v12  ;;  %v3607_v12 = vld [vmem:[%s4737_s10] ss:$16 sps:$4 sm:$0xff]  }
 0x35d   :  { %3397 = vmatprep.subr.bf16.mxu1 %v3584_v19  ;;  %v3613_v19 = vld [vmem:[%s4737_s10 + $0x20] ss:$16 sps:$4 sm:$0xff]  }
 0x35f   :  { %v3335_v20 = vpop.f32.mrb[4].mxu1 }
 0x360   :  { %v3336_v23 = vpop.f32.mrb[5].mxu1 }
 0x361   :  { %v3337_v24 = vadd.f32 %v3336_v23, %v3335_v20  ;;  %v3338_v25 = vpop.f32.mrb[6].mxu1  ;;  %v3586_v23 = vld [vmem:[%s4734_s7 + $0x98] sm:$0xff]  }
 0x362   :  { %v3339_v26 = vpop.f32.mrb[7].mxu1  ;;  %3398 = vmatpush3.bf16.msra.mxu1 %v3586_v23  ;;  %v3624_v23 = vld [vmem:[%s4737_s10 + $0x4c] ss:$16 sps:$4 sm:$0xff]  }
 0x387   :  { %v3357_v59 = vpop.f32.mrb[8].mxu1 }
 0x388   :  { %v3358_v45 = vpop.f32.mrb[9].mxu1 }
 0x389   :  { %v3359_v28 = vadd.f32 %v3358_v45, %v3357_v59  ;;  %v3360_v31 = vpop.f32.mrb[10].mxu1  ;;  %v3588_v45 = vld [vmem:[%s4734_s7 + $0xe0] sm:$0xff]  }
 0x38a   :  { %v3361_v33 = vpop.f32.mrb[11].mxu1  ;;  %3399 = vmatprep.subr.bf16.mxu1 %v3588_v45  ;;  %v3723_v45 = vmov 0  }
 0x38b   :  { %v1767_v36 = vadd.f32 %v3359_v28, %v3331_v11  ;;  %v3362_v38 = vadd.f32 %v3361_v33, %v3360_v31  ;;  %v1839_v11 = vunpack.c.0.s8 %v1838_v37  ;;  %v3589_v28 = vld [vmem:[%s4734_s7 + $0xa0] sm:$0xff]  }
 0x38c   :  { %3400 = vmatpush3.bf16.msra.mxu1 %v3589_v28  ;;  %v3603_v37 = vld [vmem:[%s4734_s7 + $0x120] sm:$0xff]   ;;  %v3628_v28 = vld [vmem:[%s4737_s10 + $0x68] ss:$16 sps:$4 sm:$0xff]  }
 0x38d   :  { %v1770_v39 = vadd.f32 %v3362_v38, %v3334_v16  ;;  %v1791_v41 = vmul.f32 %v1767_v36, %v1767_v36  ;;  %v1842_v27 = vsub.s32 %v1839_v11, %v3980_v30  ;;  %v3590_v38 = vld [vmem:[%s4734_s7 + $0xe8] sm:$0xff]  }
 0x38e   :  { %3401 = vmatprep.subr.bf16.mxu1 %v3590_v38  ;;  %v3634_v38 = vld [vmem:[%s4737_s10 + $0x88] ss:$16 sps:$4 sm:$0xff]  }
 0x38f   :  { %v1782_v42 = vadd.f32 %v1770_v39, %v1767_v36  ;;  %v1792_v43 = vmul.f32 %v1770_v39, %v1770_v39 }
 0x390   :  { %v3363_v46 = vpop.f32.mrb[12].mxu1 }
 0x391   :  { %v1794_v47 = vadd.f32 %v1792_v43, %v1791_v41  ;;  %v3364_v49 = vpop.f32.mrb[13].mxu1  ;;  %v3593_v41 = vld [vmem:[%s4734_s7 + $0x38] sm:$0xff]  }
 0x392   :  { %v3365_v50 = vadd.f32 %v3364_v49, %v3363_v46  ;;  %v3366_v14 = vpop.f32.mrb[14].mxu1 }
 0x393   :  { %v3367_v52 = vpop.f32.mrb[15].mxu1 }
 0x394   :  { %v1775_v53 = vadd.f32 %v3365_v50, %v3337_v24  ;;  %v3587_v24 = vld [vmem:[%s4734_s7 + $0x30] sm:$0xff]  }
 0x395   :  { %3382 = vmatpush3.bf16.msra.mxu0 %v3587_v24  ;;  %v3619_v24 = vld [vmem:[%s4737_s10 + $0x40] ss:$16 sps:$4 sm:$0xff]  }
 0x396   :  { %v1783_v54 = vadd.f32 %v1782_v42, %v1775_v53  ;;  %v1793_v56 = vmul.f32 %v1775_v53, %v1775_v53 }
 0x398   :  { %v1784_v57 = vrot.slane %v1783_v54, 4  ;;  %v1795_v58 = vadd.f32 %v1794_v47, %v1793_v56  ;;  %v3592_v47 = vld [vmem:[%s4734_s7 + $0xa8] sm:$0xff]   ;;  %v3595_v56 = vld [vmem:[%s4734_s7 + $0xb0] sm:$0xff]  }
 0x399   :  { %3402 = vmatpush3.bf16.msra.mxu1 %v3592_v47  ;;  %v3648_v47 = vld [vmem:[%s4737_s10 + $0xcc] ss:$16 sps:$4 sm:$0xff]  }
 0x39a   :  { %v1785_v61 = vadd.f32 %v1784_v57, %v1783_v54  ;;  %v1796_v22 = vrot.slane %v1795_v58, 4 }
 0x39c   :  { %v1786_v40 = vrot.slane %v1785_v61, 2  ;;  %v1797_v4 = vadd.f32 %v1796_v22, %v1795_v58  ;;  %v3596_v58 = vld [vmem:[%s4734_s7 + $0xf8] sm:$0xff]  }
 0x39d   :  { %v3597_v22 = vld [vmem:[%s4734_s7 + $0xb8] sm:$0xff]  }
 0x39e   :  { %v1787_v34 = vadd.f32 %v1786_v40, %v1785_v61  ;;  %v1798_v51 = vrot.slane %v1797_v4, 2 }
 0x3a0   :  { %v1788_v62 = vrot.slane %v1787_v34, 1  ;;  %v1799_v55 = vadd.f32 %v1798_v51, %v1797_v4 }
 0x3a2   :  { %v1789_v63 = vadd.f32 %v1788_v62, %v1787_v34  ;;  %v1800_v0 = vrot.slane %v1799_v55, 1 }
 0x3a4   :  { %v1790_v1 = vmul.f32 0.055555556, %v1789_v63  ;;  %v1801_v44 = vadd.f32 %v1800_v0, %v1799_v55 }
 0x3a6   :  { %v1802_v2 = vmul.f32 0.055555556, %v1801_v44  ;;  %v1803_v10 = vmul.f32 %v1790_v1, %v1790_v1 }
 0x3a8   :  { %v1804_v3 = vsub.f32 %v1802_v2, %v1803_v10  ;;  %v3598_v2 = vld [vmem:[%s4734_s7 + $0x100] sm:$0xff]  }
 0x3aa   :  { %v1805_v29 = vmax.f32 %v1804_v3, 0.0 }
 0x3ac   :  { %v1806_v5 = vadd.f32 1e-05, %v1805_v29 }
 0x3ae   :  { %3689 = vrsqrt.f32 %v1806_v5 }
 0x3b8   :  { %v3690_v6 = vpop.eup %3689 }
 0x3b9   :  { %v1808_v35 = vmul.f32 %v3690_v6, %v1780_v60  ;;  %v3600_v60 = vld [vmem:[%s4734_s7 + $0x108] sm:$0xff]   ;;  %v3601_v6 = vld [vmem:[%s4734_s7 + $0x110] sm:$0xff]  }
 0x3bb   :  { %v1809_v8 = vmul.f32 %v1808_v35, %v1790_v1  ;;  %v1815_v9 = vrot.slane %v1808_v35, %v3986_v32  ;;  %v3604_v35 = vld [vmem:[%s4734_s7 + $0x128] sm:$0xff]  }
 0x3bd   :  { %v1810_v13 = vsub.f32 %v1781_v7, %v1809_v8  ;;  %v1819_v15 = vmul.f32 %v1815_v9, %v1775_v53  ;;  %v1817_v16 = vmul.f32 %v1815_v9, %v1767_v36  ;;  %v1818_v18 = vmul.f32 %v1815_v9, %v1770_v39  ;;  %v3591_v39 = vld [vmem:[%s4734_s7 + $0x78] sm:$0xff]   ;;  %v3594_v53 = vld [vmem:[%s4734_s7 + $0xf0] sm:$0xff]  }
 0x3be   :  { %3383 = vmatprep.subr.bf16.mxu0 %v3591_v39  ;;  %3403 = vmatprep.subr.bf16.mxu1 %v3594_v53  ;;  %v3605_v7 = vld [vmem:[%s4734_s7 + $0x130] sm:$0xff]   ;;  %v3606_v8 = vld [vmem:[%s4734_s7 + $0x138] sm:$0xff]   ;;  %s3693_s7 = scalar_lea.vmem %s3072_s25, 32 }
 0x3bf   :  { %v1824_v20 = vrot.slane %v1810_v13, %v3986_v32  ;;  %3384 = vmatpush3.bf16.msra.mxu0 %v3593_v41  ;;  %3404 = vmatpush3.bf16.msra.mxu1 %v3595_v56  ;;  %v3609_v13 = vld [vmem:[%s4737_s10 + $0x4] ss:$16 sps:$4 sm:$0xff]   ;;  %v3642_v41 = vld [vmem:[%s4737_s10 + $0xac] ss:$16 sps:$4 sm:$0xff]   ;;  %v3649_v53 = vld [vmem:[%s4737_s10 + $0xe0] ss:$16 sps:$4 sm:$0xff]   ;;  %p3694_p0 = scmp.ne.s32.totalorder %s3072_s25, %s3693_s7  ;;  %p3699_p2 = scmp.lt.s32.totalorder %s3693_s7, %s3693_s7 }
 0x3c0   :  { %3466 = vmatprep.subr.bf16.mxu0 %v3717_v48  ;;  %3405 = vmatprep.subr.bf16.mxu1 %v3596_v58  ;;  %v3639_v39 = vld [vmem:[%s4737_s10 + $0xa4] ss:$16 sps:$4 sm:$0xff]  }
 0x3c1   :  { %v1828_v25 = vadd.f32 %v1824_v20, %v1819_v15  ;;  %v1826_v26 = vadd.f32 %v1824_v20, %v1817_v16  ;;  %v1827_v59 = vadd.f32 %v1824_v20, %v1818_v18  ;;  %v3610_v15 = vld [vmem:[%s4737_s10 + $0x8] ss:$16 sps:$4 sm:$0xff]   ;;  %v3615_v16 = vld [vmem:[%s4737_s10 + $0x24] ss:$16 sps:$4 sm:$0xff]   ;;  %v3618_v18 = vld [vmem:[%s4737_s10 + $0x2c] ss:$16 sps:$4 sm:$0xff]   ;;  %p3700_p3 = por %p3699_p2, %p3698_p1 }
 0x3c2   :  { %v3616_v20 = vld [vmem:[%s4737_s10 + $0x28] ss:$16 sps:$4 sm:$0xff]   ;;  %v3655_v56 = vld [vmem:[%s4739_s12 + $0x40] sm:$0xff]  }
 0x3c3   :  { %v1831_v31 = vmax.f32 %v1828_v25, 0.0  ;;  %v1829_v33 = vmax.f32 %v1826_v26, 0.0  ;;  %v1830_v36 = vmax.f32 %v1827_v59, 0.0  ;;  %3406 = vmatpush3.bf16.msra.mxu1 %v3597_v22  ;;  %v3622_v25 = vld [vmem:[%s4737_s10 + $0x48] ss:$16 sps:$4 sm:$0xff]   ;;  %p3701_p4 = pnand %p3700_p3, %p3694_p0 }
 0x3c4   :  { %2631 = vmatprep.subr.bf16.mxu1 %v3609_v13  ;;  %v3627_v26 = vld [vmem:[%s4737_s10 + $0x64] ss:$16 sps:$4 sm:$0xff]   ;;  %v3625_v59 = vld [vmem:[%s4737_s10 + $0x60] ss:$16 sps:$4 sm:$0xff]  }
 0x3c5   :  { %v1843_v42 = vrot.slane %v1829_v33, %v1842_v27  ;;  %v1850_v43 = vcombine.high %v1829_v33, %v1829_v33  ;;  %v1879_v46 = vcombine.high %v1830_v36, %v1830_v36  ;;  %1894 = vst.msk [vmem:[#allocation4 + $0x8] sm:$0x3] %vm1834_vm0, %v1831_v31  ;;  %1835 = vst.msk [vmem:[#allocation4] sm:$0x3] %vm1834_vm0, %v1829_v33  ;;  %v3633_v31 = vld [vmem:[%s4737_s10 + $0x84] ss:$16 sps:$4 sm:$0xff]  }
 0x3c6   :  { %1865 = vst.msk [vmem:[#allocation4 + $0x4] sm:$0x3] %vm1834_vm0, %v1830_v36  ;;  %v1873_v14 = vrot.slane %v1830_v36, %v1842_v27  ;;  %v3636_v33 = vld [vmem:[%s4737_s10 + $0x8c] ss:$16 sps:$4 sm:$0xff]   ;;  %v3631_v36 = vld [vmem:[%s4737_s10 + $0x80] ss:$16 sps:$4 sm:$0xff]  }
 0x3c7   :  { %v1844_v49 = vcombine.high %v1843_v42, %v1843_v42  ;;  %v1857_v50 = vrot.slane %v1850_v43, %v1842_v27  ;;  %v1886_v52 = vrot.slane %v1879_v46, %v1842_v27  ;;  %v3637_v42 = vld [vmem:[%s4737_s10 + $0xa0] ss:$16 sps:$4 sm:$0xff]   ;;  %v3640_v43 = vld [vmem:[%s4737_s10 + $0xa8] ss:$16 sps:$4 sm:$0xff]   ;;  %v3645_v46 = vld [vmem:[%s4737_s10 + $0xc4] ss:$16 sps:$4 sm:$0xff]  }
 0x3c8   :  { %v1874_v57 = vcombine.high %v1873_v14, %v1873_v14  ;;  %v3651_v14 = vld [vmem:[%s4737_s10 + $0xe4] ss:$16 sps:$4 sm:$0xff]  }
 0x3c9   :  { %1845 = vrot.lane.b32.xlu0 %v1844_v49, %s3719_s3  ;;  %v1860_v54 = vcombine.high %v1857_v50, %v1857_v50  ;;  %1859 = vst.msk [vmem:[#allocation4 + $0x2] sm:$0x3] %vm1834_vm0, %v1857_v50  ;;  %1888 = vst.msk [vmem:[#allocation4 + $0x6] sm:$0x3] %vm1834_vm0, %v1886_v52  ;;  %v1889_v61 = vcombine.high %v1886_v52, %v1886_v52  ;;  %v3643_v49 = vld [vmem:[%s4737_s10 + $0xc0] ss:$16 sps:$4 sm:$0xff]  }
 0x3ca   :  { %v3646_v50 = vld [vmem:[%s4737_s10 + $0xc8] ss:$16 sps:$4 sm:$0xff]   ;;  %v3654_v52 = vld [vmem:[%s4737_s10 + $0xec] ss:$16 sps:$4 sm:$0xff]  }
 0x3cb   :  { %1861 = vrot.lane.b32.xlu1 %v1860_v54, %s3719_s3  ;;  %v3652_v54 = vld [vmem:[%s4737_s10 + $0xe8] ss:$16 sps:$4 sm:$0xff]  }
 0x3cc   :  { %v3143_v9 = vld.sshfl [vmem:[#allocation4 + $0x8] sm:$0x3 pattern:$0x76325410] }
 0x3cd   :  { %1875 = vrot.lane.b32.xlu0 %v1874_v57, %s3719_s3  ;;  %v1932_v11 = vpack.c.bf16 %v3143_v9, %v3143_v9  ;;  %v3656_v57 = vld [vmem:[%s4739_s12 + $0xc0] sm:$0xff]  }
 0x3cf   :  { %1890 = vrot.lane.b32.xlu1 %v1889_v61, %s3719_s3 }
 0x43b   :  { %v1846_v40 = vpop.permute.xlu0 %1845 }
 0x43c   :  { %1849 = vst.msk [vmem:[#allocation4] sm:$0x3] %vm1848_vm1, %v1846_v40 }
 0x43d   :  { %v1862_v4 = vpop.permute.xlu1 %1861 }
 0x43e   :  { %1864 = vst.msk [vmem:[#allocation4 + $0x2] sm:$0x3] %vm1848_vm1, %v1862_v4 }
 0x43f   :  { %v1876_v34 = vpop.permute.xlu0 %1875 }
 0x440   :  { %1878 = vst.msk [vmem:[#allocation4 + $0x4] sm:$0x3] %vm1848_vm1, %v1876_v34 }
 0x441   :  { %v1891_v51 = vpop.permute.xlu1 %1890 }
 0x442   :  { %1893 = vst.msk [vmem:[#allocation4 + $0x6] sm:$0x3] %vm1848_vm1, %v1891_v51 }
 0x449   :  { %v1895_v62 = vld [vmem:[#allocation4] sm:$0xff] }
 0x44a   :  { %v1906_v55 = vrot.slane %v1895_v62, %v1842_v27  ;;  %v1899_v63 = vcombine.high %v1895_v62, %v1895_v62 }
 0x44c   :  { %v1914_v0 = vcombine.high %v1906_v55, %v1906_v55  ;;  %v1913_v1 = vrot.slane %v1899_v63, %v1842_v27  ;;  %v1928_v3 = vpack.c.bf16 %v1906_v55, %v1906_v55  ;;  %v3630_v27 = vld [vmem:[%s4737_s10 + $0x6c] ss:$16 sps:$4 sm:$0xff]  }
 0x44e   :  { %v1929_v44 = vpack.c.bf16 %v1914_v0, %v1914_v0  ;;  %v1915_v10 = vcombine.high %v1913_v1, %v1913_v1  ;;  %v1930_v5 = vpack.c.bf16 %v1913_v1, %v1913_v1 }
 0x450   :  { %2285 = vmatprep.mubr.bf16.mxu0 %v1929_v44  ;;  %v1931_v29 = vpack.c.bf16 %v1915_v10, %v1915_v10 }
 0x451   :  { %2286 = vmatmul.mubr.bf16.vlgmr.msra.gmra.mrb[32].mxu0 %v1928_v3 }
 0x452   :  { %3467 = vmatpush3.bf16.msra.mxu0 %v3598_v2  ;;  %2325 = vmatprep.mubr.bf16.mxu1 %v1931_v29 }
 0x453   :  { %2326 = vmatmul.mubr.bf16.vlgmr.msra.gmra.mrb[16].mxu1 %v1930_v5  ;;  %3468 = vmatprep.subr.bf16.mxu0 %v3717_v48 }
 0x454   :  { %3482 = vmatprep.mubr.msk.bf16.mxu0 %vm3722_vm2, %v3717_v48  ;;  %2632 = vmatpush1.bf16.msra.mxu1 %v3607_v12 }
 0x455   :  { %2633 = vmatprep.subr.bf16.mxu1 %v3615_v16  ;;  %2663 = vmatprep.mubr.bf16.mxu1 %v3723_v45 }
 0x456   :  { %3469 = vmatpush3.bf16.msra.mxu0 %v3600_v60 }
 0x457   :  { %3470 = vmatprep.subr.bf16.mxu0 %v3717_v48 }
 0x458   :  { %2634 = vmatpush1.bf16.msra.mxu1 %v3613_v19 }
 0x459   :  { %2635 = vmatprep.subr.bf16.mxu1 %v3621_v21 }
 0x45a   :  { %3471 = vmatpush3.bf16.msra.mxu0 %v3601_v6 }
 0x45b   :  { %3472 = vmatprep.subr.bf16.mxu0 %v3717_v48 }
 0x45c   :  { %2636 = vmatpush1.bf16.msra.mxu1 %v3619_v24  ;;  %v2373_v24 = vld [vmem:[%s4735_s8] sm:$0x1] }
 0x45d   :  { %2637 = vmatprep.subr.bf16.mxu1 %v3627_v26 }
 0x45e   :  { %3473 = vmatpush3.bf16.msra.mxu0 %v3602_v17 }
 0x45f   :  { %3474 = vmatprep.subr.bf16.mxu0 %v3717_v48 }
 0x460   :  { %2638 = vmatpush1.bf16.msra.mxu1 %v3625_v59 }
 0x461   :  { %2639 = vmatprep.subr.bf16.mxu1 %v3633_v31 }
 0x462   :  { %3475 = vmatpush3.bf16.msra.mxu0 %v3603_v37 }
 0x463   :  { %3476 = vmatprep.subr.bf16.mxu0 %v3717_v48 }
 0x464   :  { %2640 = vmatpush1.bf16.msra.mxu1 %v3631_v36 }
 0x465   :  { %2641 = vmatprep.subr.bf16.mxu1 %v3639_v39  ;;  %v3657_v39 = vld [vmem:[%s4739_s12] sm:$0xff]  }
 0x466   :  { %3477 = vmatpush3.bf16.msra.mxu0 %v3604_v35 }
 0x467   :  { %3478 = vmatprep.subr.bf16.mxu0 %v3717_v48 }
 0x468   :  { %2642 = vmatpush1.bf16.msra.mxu1 %v3637_v42 }
 0x469   :  { %2643 = vmatprep.subr.bf16.mxu1 %v3645_v46  ;;  %v3660_v46 = vld [vmem:[%s4739_s12 + $0xc8] sm:$0xff]  }
 0x46a   :  { %3479 = vmatpush3.bf16.msra.mxu0 %v3605_v7 }
 0x46b   :  { %3480 = vmatprep.subr.bf16.mxu0 %v3717_v48  ;;  %v3612_v48 = vld [vmem:[%s4737_s10 + $0xc] ss:$16 sps:$4 sm:$0xff]  }
 0x46c   :  { %2644 = vmatpush1.bf16.msra.mxu1 %v3643_v49  ;;  %v3662_v49 = vld [vmem:[%s4739_s12 + $0x88] sm:$0xff]  }
 0x46d   :  { %2645 = vmatprep.subr.bf16.mxu1 %v3651_v14  ;;  %v3664_v14 = vld [vmem:[%s4739_s12 + $0xd0] sm:$0xff]  }
 0x46e   :  { %3481 = vmatpush3.bf16.msra.mxu0 %v3606_v8 }
 0x46f   :  { %2672 = vmatprep.subr.bf16.mxu0 %v3612_v48 }
 0x470   :  { %2646 = vmatpush1.bf16.msra.mxu1 %v3649_v53  ;;  %v3666_v53 = vld [vmem:[%s4739_s12 + $0x90] sm:$0xff]  }
 0x471   :  { %3483 = vmatmul.mubr.bf16.vlgmr.msra.gmra.mrb[36].mxu0 %v1932_v11  ;;  %3422 = vmatprep.subr.bf16.mxu1 %v3655_v56  ;;  %v3668_v56 = vld [vmem:[%s4739_s12 + $0xd8] sm:$0xff]  }
 0x472   :  { %2673 = vmatpush1.bf16.msra.mxu0 %v3610_v15  ;;  %2704 = vmatprep.mubr.bf16.mxu0 %v3723_v45 }
 0x473   :  { %2674 = vmatprep.subr.bf16.mxu0 %v3618_v18 }
 0x476   :  { %2675 = vmatpush1.bf16.msra.mxu0 %v3616_v20 }
 0x477   :  { %2676 = vmatprep.subr.bf16.mxu0 %v3624_v23 }
 0x47a   :  { %2677 = vmatpush1.bf16.msra.mxu0 %v3622_v25 }
 0x47b   :  { %2678 = vmatprep.subr.bf16.mxu0 %v3630_v27  ;;  %v2374_v27 = vld [vmem:[%s4736_s9] sm:$0x1] }
 0x47e   :  { %2679 = vmatpush1.bf16.msra.mxu0 %v3628_v28 }
 0x47f   :  { %2680 = vmatprep.subr.bf16.mxu0 %v3636_v33 }
 0x482   :  { %2681 = vmatpush1.bf16.msra.mxu0 %v3634_v38 }
 0x483   :  { %2682 = vmatprep.subr.bf16.mxu0 %v3642_v41  ;;  %v3658_v41 = vld [vmem:[%s4739_s12 + $0x80] sm:$0xff]  }
 0x486   :  { %2683 = vmatpush1.bf16.msra.mxu0 %v3640_v43  ;;  %v3659_v43 = vld [vmem:[%s4739_s12 + $0x48] sm:$0xff]  }
 0x487   :  { %2684 = vmatprep.subr.bf16.mxu0 %v3648_v47  ;;  %v3661_v47 = vld [vmem:[%s4739_s12 + $0x8] sm:$0xff]  }
 0x48a   :  { %2685 = vmatpush1.bf16.msra.mxu0 %v3646_v50  ;;  %v3663_v50 = vld [vmem:[%s4739_s12 + $0x50] sm:$0xff]  }
 0x48b   :  { %2686 = vmatprep.subr.bf16.mxu0 %v3654_v52  ;;  %v3665_v52 = vld [vmem:[%s4739_s12 + $0x10] sm:$0xff]  }
 0x48e   :  { %2687 = vmatpush1.bf16.msra.mxu0 %v3652_v54  ;;  %v3667_v54 = vld [vmem:[%s4739_s12 + $0x58] sm:$0xff]  }
 0x48f   :  { %3444 = vmatprep.subr.bf16.mxu0 %v3656_v57  ;;  %v3669_v57 = vld [vmem:[%s4739_s12 + $0x18] sm:$0xff]  }
 0x524   :  { %v3385_v58 = vpop.f32.mrb[32].mxu0 }
 0x525   :  { %v3386_v61 = vpop.f32.mrb[33].mxu0 }
 0x526   :  { %v3387_v22 = vadd.f32 %v3386_v61, %v3385_v58  ;;  %v3388_v40 = vpop.f32.mrb[34].mxu0  ;;  %v3407_v4 = vpop.f32.mrb[16].mxu1  ;;  %v3670_v58 = vld [vmem:[%s4739_s12 + $0x98] sm:$0xff]   ;;  %v3671_v61 = vld [vmem:[%s4739_s12 + $0x60] sm:$0xff]  }
 0x527   :  { %v3389_v34 = vpop.f32.mrb[35].mxu0  ;;  %v3408_v51 = vpop.f32.mrb[17].mxu1  ;;  %v3673_v40 = vld [vmem:[%s4739_s12 + $0x20] sm:$0xff]  }
 0x528   :  { %v3409_v62 = vadd.f32 %v3408_v51, %v3407_v4  ;;  %v3410_v55 = vpop.f32.mrb[18].mxu1  ;;  %v3674_v4 = vld [vmem:[%s4739_s12 + $0xa0] sm:$0xff]   ;;  %v3675_v34 = vld [vmem:[%s4739_s12 + $0x68] sm:$0xff]  }
 0x529   :  { %v3411_v63 = vpop.f32.mrb[19].mxu1  ;;  %v3676_v51 = vld [vmem:[%s4739_s12 + $0xe8] sm:$0xff]  }
 0x52a   :  { %v2328_v0 = vadd.f32 %v3409_v62, %v3387_v22  ;;  %v3672_v22 = vld [vmem:[%s4739_s12 + $0xe0] sm:$0xff]   ;;  %v3677_v62 = vld [vmem:[%s4739_s12 + $0x28] sm:$0xff]   ;;  %v3679_v63 = vld [vmem:[%s4739_s12 + $0x70] sm:$0xff]  }
 0x52b   :  { %v3678_v55 = vld [vmem:[%s4739_s12 + $0xa8] sm:$0xff]  }
 0x544   :  { %v2367_v1 = vpop.f32.mrb[36].mxu0 }
 0x545   :  { %v2368_v44 = vadd.f32 %v2367_v1, %v2328_v0  ;;  %v3484_v2 = vpop.f32.mrb[37].mxu0  ;;  %v3680_v0 = vld [vmem:[%s4739_s12 + $0xf0] sm:$0xff]  }
 0x546   :  { %v2370_v10 = vpop.f32.mrb[38].mxu0  ;;  %v3681_v1 = vld [vmem:[%s4739_s12 + $0x30] sm:$0xff]   ;;  %v3683_v2 = vld [vmem:[%s4739_s12 + $0x78] sm:$0xff]  }
 0x547   :  { %v2376_v3 = vsel %vm2375_vm3, %v2368_v44, 0.0  ;;  %v2384_v29 = vmul.f32 %v2368_v44, %v2368_v44  ;;  %v3485_v5 = vpop.f32.mrb[39].mxu0  ;;  %v3684_v10 = vld [vmem:[%s4739_s12 + $0xf8] sm:$0xff]  }
 0x548   :  { %v2377_v60 = vrot.slane %v2376_v3, 4  ;;  %v2461_v5 = vsub.s32 2, %v3980_v30 }
 0x549   :  { %v2385_v6 = vsel %vm2375_vm3, %v2384_v29, 0.0  ;;  %v3686_v29 = vld [vmem:[%s4739_s12 + $0xb8] sm:$0xff]  }
 0x54a   :  { %v2378_v17 = vadd.f32 %v2377_v60, %v2376_v3  ;;  %v2386_v37 = vrot.slane %v2385_v6, 4  ;;  %v3685_v3 = vld [vmem:[%s4739_s12 + $0x38] sm:$0xff]   ;;  %v2449_v60 = vld [vmem:[%s4738_s11] sm:$0xf] }
 0x54c   :  { %v2379_v35 = vrot.slane %v2378_v17, 2  ;;  %v2387_v7 = vadd.f32 %v2386_v37, %v2385_v6  ;;  %v2457_v6 = vsub.s32 1, %v3980_v30  ;;  %v2454_v37 = vrot.slane %v2449_v60, %v3986_v32 }
 0x54e   :  { %v2380_v8 = vadd.f32 %v2379_v35, %v2378_v17  ;;  %v2388_v9 = vrot.slane %v2387_v7, 2  ;;  %v2465_v17 = vsub.s32 3, %v3980_v30  ;;  %v2462_v35 = vrot.slane %v2449_v60, %v2461_v5 }
 0x550   :  { %v2381_v11 = vrot.slane %v2380_v8, 1  ;;  %v2389_v12 = vadd.f32 %v2388_v9, %v2387_v7  ;;  %v2458_v7 = vrot.slane %v2449_v60, %v2457_v6 }
 0x552   :  { %v2382_v13 = vadd.f32 %v2381_v11, %v2380_v8  ;;  %v2390_v15 = vrot.slane %v2389_v12, 1  ;;  %v2466_v8 = vrot.slane %v2449_v60, %v2465_v17 }
 0x554   :  { %v2383_v48 = vmul.f32 0.5, %v2382_v13  ;;  %v2391_v16 = vadd.f32 %v2390_v15, %v2389_v12 }
 0x556   :  { %v2392_v18 = vmul.f32 0.5, %v2391_v16  ;;  %v2393_v19 = vmul.f32 %v2383_v48, %v2383_v48 }
 0x558   :  { %v2394_v20 = vsub.f32 %v2392_v18, %v2393_v19 }
 0x55a   :  { %v2395_v21 = vmax.f32 %v2394_v20, 0.0 }
 0x55c   :  { %v2396_v23 = vadd.f32 1e-05, %v2395_v21 }
 0x55e   :  { %3691 = vrsqrt.f32 %v2396_v23 }
 0x568   :  { %v3692_v25 = vpop.eup %3691 }
 0x569   :  { %v2398_v26 = vmul.f32 %v3692_v25, %v2373_v24 }
 0x56b   :  { %v2399_v59 = vmul.f32 %v2398_v26, %v2383_v48  ;;  %v2405_v45 = vrot.slane %v2398_v26, %v3986_v32 }
 0x56d   :  { %v2400_v28 = vsub.f32 %v2374_v27, %v2399_v59  ;;  %v2407_v31 = vmul.f32 %v2405_v45, %v2368_v44  ;;  %v3682_v44 = vld [vmem:[%s4739_s12 + $0xb0] sm:$0xff]  }
 0x56f   :  { %v2412_v33 = vrot.slane %v2400_v28, %v3986_v32 }
 0x571   :  { %v2414_v36 = vadd.f32 %v2412_v33, %v2407_v31  ;;  %v3216_v33 = vld [vmem:[%s4740_s13] ss:$0 sm:$0xff] }
 0x573   :  { %v2415_v38 = vmax.f32 %v2414_v36, 0.0 }
 0x575   :  { %v2416_v42 = vpack.c.bf16 %v2415_v38, %v2415_v38 }
 0x577   :  { %2664 = vmatmul.mubr.bf16.vlgmr.msra.gmra.mrb[20].mxu1 %v2416_v42  ;;  %2705 = vmatmul.mubr.bf16.vlgmr.msra.gmra.mrb[40].mxu0 %v2416_v42 }
 0x578   :  { %3423 = vmatpush3.bf16.msra.mxu1 %v3657_v39  ;;  %3445 = vmatpush3.bf16.msra.mxu0 %v3658_v41 }
 0x579   :  { %3424 = vmatprep.subr.bf16.mxu1 %v3659_v43  ;;  %3446 = vmatprep.subr.bf16.mxu0 %v3660_v46 }
 0x57c   :  { %3425 = vmatpush3.bf16.msra.mxu1 %v3661_v47  ;;  %3447 = vmatpush3.bf16.msra.mxu0 %v3662_v49 }
 0x57d   :  { %3426 = vmatprep.subr.bf16.mxu1 %v3663_v50  ;;  %3448 = vmatprep.subr.bf16.mxu0 %v3664_v14 }
 0x580   :  { %3427 = vmatpush3.bf16.msra.mxu1 %v3665_v52  ;;  %3449 = vmatpush3.bf16.msra.mxu0 %v3666_v53 }
 0x581   :  { %3428 = vmatprep.subr.bf16.mxu1 %v3667_v54  ;;  %3450 = vmatprep.subr.bf16.mxu0 %v3668_v56 }
 0x584   :  { %3429 = vmatpush3.bf16.msra.mxu1 %v3669_v57  ;;  %3451 = vmatpush3.bf16.msra.mxu0 %v3670_v58 }
 0x585   :  { %3430 = vmatprep.subr.bf16.mxu1 %v3671_v61  ;;  %3452 = vmatprep.subr.bf16.mxu0 %v3672_v22 }
 0x588   :  { %3431 = vmatpush3.bf16.msra.mxu1 %v3673_v40  ;;  %3453 = vmatpush3.bf16.msra.mxu0 %v3674_v4 }
 0x589   :  { %3432 = vmatprep.subr.bf16.mxu1 %v3675_v34  ;;  %3454 = vmatprep.subr.bf16.mxu0 %v3676_v51 }
 0x58c   :  { %3433 = vmatpush3.bf16.msra.mxu1 %v3677_v62  ;;  %3455 = vmatpush3.bf16.msra.mxu0 %v3678_v55 }
 0x58d   :  { %3434 = vmatprep.subr.bf16.mxu1 %v3679_v63  ;;  %3456 = vmatprep.subr.bf16.mxu0 %v3680_v0 }
 0x590   :  { %3435 = vmatpush3.bf16.msra.mxu1 %v3681_v1  ;;  %3457 = vmatpush3.bf16.msra.mxu0 %v3682_v44 }
 0x591   :  { %3436 = vmatprep.subr.bf16.mxu1 %v3683_v2  ;;  %3458 = vmatprep.subr.bf16.mxu0 %v3684_v10 }
 0x594   :  { %3437 = vmatpush3.bf16.msra.mxu1 %v3685_v3  ;;  %3459 = vmatpush3.bf16.msra.mxu0 %v3686_v29 }
 0x64a   :  { %v2665_v9 = vpop.f32.mrb[20].mxu1  ;;  %v2706_v11 = vpop.f32.mrb[40].mxu0 }
 0x64b   :  { %v2666_v12 = vadd.f32 %v2665_v9, %v2454_v37  ;;  %v2707_v13 = vadd.f32 %v2706_v11, %v2462_v35  ;;  %v2667_v15 = vpop.f32.mrb[21].mxu1  ;;  %v2708_v48 = vpop.f32.mrb[41].mxu0 }
 0x64c   :  { %v2668_v16 = vadd.f32 %v2667_v15, %v2458_v7  ;;  %v2709_v18 = vadd.f32 %v2708_v48, %v2466_v8  ;;  %v2669_v19 = vpop.f32.mrb[22].mxu1  ;;  %v2710_v20 = vpop.f32.mrb[42].mxu0 }
 0x64d   :  { %v2713_v21 = vmax.f32 %v2666_v12, 0.0  ;;  %v2715_v23 = vmax.f32 %v2707_v13, 0.0  ;;  %v2670_v24 = vpop.f32.mrb[23].mxu1  ;;  %v2711_v25 = vpop.f32.mrb[43].mxu0 }
 0x64e   :  { %v2714_v30 = vmax.f32 %v2668_v16, 0.0  ;;  %v2716_v26 = vmax.f32 %v2709_v18, 0.0 }
 0x64f   :  { %v2717_v59 = vpack.c.bf16 %v2713_v21, %v2713_v21  ;;  %v2719_v45 = vpack.c.bf16 %v2715_v23, %v2715_v23 }
 0x650   :  { %v2718_v32 = vpack.c.bf16 %v2714_v30, %v2714_v30  ;;  %v2720_v27 = vpack.c.bf16 %v2716_v26, %v2716_v26 }
 0x652   :  { %3016 = vmatprep.mubr.bf16.mxu1 %v2718_v32  ;;  %3056 = vmatprep.mubr.bf16.mxu0 %v2720_v27 }
 0x653   :  { %3017 = vmatmul.mubr.bf16.vlgmr.msra.gmra.mrb[24].mxu1 %v2717_v59  ;;  %3057 = vmatmul.mubr.bf16.vlgmr.msra.gmra.mrb[44].mxu0 %v2719_v45 }
 0x726   :  { %v3438_v28 = vpop.f32.mrb[24].mxu1  ;;  %v3460_v31 = vpop.f32.mrb[44].mxu0 }
 0x727   :  { %v3439_v36 = vpop.f32.mrb[25].mxu1  ;;  %v3461_v38 = vpop.f32.mrb[45].mxu0 }
 0x728   :  { %v3440_v39 = vadd.f32 %v3439_v36, %v3438_v28  ;;  %v3462_v41 = vadd.f32 %v3461_v38, %v3460_v31  ;;  %v3441_v42 = vpop.f32.mrb[26].mxu1  ;;  %v3463_v43 = vpop.f32.mrb[46].mxu0 }
 0x729   :  { %v3442_v46 = vpop.f32.mrb[27].mxu1  ;;  %v3464_v47 = vpop.f32.mrb[47].mxu0 }
 0x72a   :  { %v3019_v49 = vadd.f32 %v3440_v39, %v3216_v33 }
 0x72c   :  { %v3059_v50 = vadd.f32 %v3462_v41, %v3019_v49 }
 0x72e   :  { %3064 = vst [vmem:[#allocation5] sm:$0x3] %v3059_v50 }
 0x72f   :  { %3704 = shalt.err (!%p3701_p4)
}
 0x730   :  { %s3705_s26 = scalar_lea.hbm %s4741_s14, 32 }
 0x731   :  { %p3706_p5 = scmp.ne.s32.totalorder %s4741_s14, %s3705_s26  ;;  %p3709_p6 = scmp.lt.u32.totalorder %s3705_s26, %s4741_s14 }
 0x733   :  { %p3711_p7 = pnand %p3709_p6, %p3706_p5 }
 0x735   :  { %3714 = shalt.err (!%p3711_p7)
}
 0x736   :  { %3074 = dma.vmem_to_hbm [thread:$0]  %s3072_s25, 32, %s4741_s14, [#allocation6]  }
 0x737   :  { %3715 = dma.done.wait [#allocation6], 32  }
 0x738   :  { %3716 = vsyncadd [#allocation6], 4294967264 }
 0x739   :  { %3078 = vsyncpa [#allocation6], 1 }

</bundles_post_ra>
